<compile_context>
chip_gen: v7x
topology: tpu7x:2x2x1
jax: 0.10.0
libtpu: 0.0.40
codegen_flags: <defaults>
</compile_context>

<pallas_src>
import jax
import jax.numpy as jnp
from jax.experimental import pallas as pl
from jax.experimental.pallas import tpu as pltpu

NEG_INF = -1e30


def _round_up(x, m):
    return ((x + m - 1) // m) * m


def _pick_time_chunk(n, target=8):
    # Largest chunk <= target dividing n; chunks smaller than the axis must be
    # sublane-aligned (multiple of 8) so output blocks obey the (8,128) rule.
    if n <= target:
        return n
    for c in range(target, 0, -1):
        if n % c == 0 and (c % 8 == 0 or c == n):
            return c
    return n


def _vmem_limit(nbytes):
    # Explicit scoped-VMEM request: resident block bytes + double-buffer headroom.
    return int(min(100 << 20, max(4 << 20, 4 * nbytes)))


def _fuse_gate_params(w, b, hp):
    # w: (3, D, H) per-gate weights, b: (3, 1, H) per-gate biases (gate order r,z,n)
    # -> (D, 3*hp), (1, 3*hp) with every gate block starting on a 128-lane boundary.
    _, d, h = w.shape
    wp = jnp.pad(w, ((0, 0), (0, 0), (0, hp - h)))
    bp = jnp.pad(b, ((0, 0), (0, 0), (0, hp - h)))
    wf = jnp.transpose(wp, (1, 0, 2)).reshape(d, 3 * hp)
    bf = bp.reshape(1, 3 * hp)
    return wf, bf


# ----------------------------------------------------------------------------
# Encoder GRU recurrence: time-chunked grid, h carried in VMEM scratch,
# fused single gate matmul per step, coalesced chunk store, (B,S,H) output.
# ----------------------------------------------------------------------------
def encoder_gru_kernel(gi_ref, whh_ref, bhh_ref, out_ref, hfin_ref,
                       h_ref, oacc_ref):
    tc, bb, g = gi_ref.shape          # (time_chunk, batch_block, 3*Hp)
    h_dim = whh_ref.shape[0]
    hp = g // 3

    @pl.when(pl.program_id(1) == 0)
    def _():
        h_ref[...] = jnp.zeros_like(h_ref)

    whh = whh_ref[...]                                       # (H, 3Hp) bf16
    bhh = jnp.broadcast_to(bhh_ref[...], (bb, g))            # pre-broadcast once

    h = h_ref[...]                                           # f32 (bb, H)
    for t in range(tc):                                      # tc small & static
        # one fused hidden->gates matmul per serial step (3x fewer MXU pushes)
        gh = jnp.dot(h.astype(jnp.bfloat16), whh,
                     preferred_element_type=jnp.float32) + bhh
        gi = gi_ref[t].astype(jnp.float32)
        r = jax.nn.sigmoid(gi[:, 0:h_dim] + gh[:, 0:h_dim])
        z = jax.nn.sigmoid(gi[:, hp:hp + h_dim] + gh[:, hp:hp + h_dim])
        n = jnp.tanh(gi[:, 2 * hp:2 * hp + h_dim]
                     + r * gh[:, 2 * hp:2 * hp + h_dim])
        h = (1.0 - z) * n + z * h
        oacc_ref[:, t, :] = h

    h_ref[...] = h
    out_ref[...] = oacc_ref[...].astype(out_ref.dtype)       # one coalesced store
    hfin_ref[...] = h.astype(hfin_ref.dtype)


def encoder_forward(gi, whh, bhh, *, time_chunk=8):
    S, B, G = gi.shape
    H = whh.shape[0]
    tc = _pick_time_chunk(S, time_chunk)
    bb = B  # TODO(synk): split batch into >=8-row blocks at real sizes so the
    #        'parallel' axis actually shards across v7x's two TensorCores.
    nb, nc = B // bb, S // tc
    blk = (tc * bb * G * 2 + H * G * 2 + G * 4 + bb * tc * H * 2
           + bb * H * 4 + bb * H * 4 + bb * tc * H * 4)
    return pl.pallas_call(
        encoder_gru_kernel,
        out_shape=(jax.ShapeDtypeStruct((B, S, H), jnp.bfloat16),
                   jax.ShapeDtypeStruct((B, H), jnp.float32)),
        grid=(nb, nc),
        in_specs=[
            pl.BlockSpec((tc, bb, G), lambda b, c: (c, b, 0)),
            pl.BlockSpec((H, G), lambda b, c: (0, 0)),
            pl.BlockSpec((1, G), lambda b, c: (0, 0)),
        ],
        out_specs=(
            pl.BlockSpec((bb, tc, H), lambda b, c: (b, c, 0)),
            pl.BlockSpec((bb, H), lambda b, c: (b, 0)),
        ),
        scratch_shapes=[pltpu.VMEM((bb, H), jnp.float32),
                        pltpu.VMEM((bb, tc, H), jnp.float32)],
        compiler_params=pltpu.CompilerParams(
            dimension_semantics=("parallel", "arbitrary"),
            vmem_limit_bytes=_vmem_limit(blk)),
    )(gi, whh, bhh)


# ----------------------------------------------------------------------------
# Decoder: GRU cell (fused gate matmul) + Luong dot attention (MXU, hoisted
# enc_T) + fused combine projection.  Time-chunked, h carried in scratch,
# outputs written in final (B,T,H)/(B,T,S) layout with coalesced chunk stores.
# ----------------------------------------------------------------------------
def decoder_gru_attn_kernel(gi_ref, h0_ref, enc_ref, enct_ref, whh_ref,
                            bhh_ref, wcomb_ref, bc_ref,
                            comb_ref, attn_ref,
                            h_ref, cacc_ref, aacc_ref):
    tc, bb, g = gi_ref.shape
    h_dim = whh_ref.shape[0]
    hp = g // 3

    @pl.when(pl.program_id(1) == 0)
    def _():
        h_ref[...] = h0_ref[...].astype(jnp.float32)

    whh = whh_ref[...]                                       # (H, 3Hp) bf16
    bhh = jnp.broadcast_to(bhh_ref[...], (bb, g))
    wcomb = wcomb_ref[...]                                   # (2H, H) bf16
    bc = jnp.broadcast_to(bc_ref[...], (bb, h_dim))
    enc = enc_ref[...]                                       # (bb, S, H) bf16
    enc_t = enct_ref[...]                                    # (bb, H, S) bf16

    h = h_ref[...]
    for t in range(tc):
        # --- GRU cell: single fused hidden->gates matmul on the serial path ---
        gh = jnp.dot(h.astype(jnp.bfloat16), whh,
                     preferred_element_type=jnp.float32) + bhh
        gi = gi_ref[t].astype(jnp.float32)
        r = jax.nn.sigmoid(gi[:, 0:h_dim] + gh[:, 0:h_dim])
        z = jax.nn.sigmoid(gi[:, hp:hp + h_dim] + gh[:, hp:hp + h_dim])
        n = jnp.tanh(gi[:, 2 * hp:2 * hp + h_dim]
                     + r * gh[:, 2 * hp:2 * hp + h_dim])
        h = (1.0 - z) * n + z * h                            # (bb, H)

        # --- dot-product attention (MXU); enc_T hoisted out of the loop ---
        q = h.astype(jnp.bfloat16)[:, None, :]               # (bb, 1, H)
        scores = jnp.einsum('bqh,bhs->bqs', q, enc_t,
                            preferred_element_type=jnp.float32)   # (bb,1,S)
        scores = scores - jnp.max(scores, axis=-1, keepdims=True)
        e = jnp.exp(scores)
        attn = e / jnp.sum(e, axis=-1, keepdims=True)        # exact (returned)
        ctx = jnp.einsum('bqs,bsh->bqh', attn.astype(jnp.bfloat16), enc,
                         preferred_element_type=jnp.float32)[:, 0, :]  # (bb,H)

        # --- fused combine: [h ; ctx] @ [wc_h ; wc_c] + bc, one MXU op ---
        hc = jnp.concatenate([h, ctx], axis=-1).astype(jnp.bfloat16)   # (bb,2H)
        combined = jnp.tanh(
            jnp.dot(hc, wcomb, preferred_element_type=jnp.float32) + bc)

        cacc_ref[:, t, :] = combined
        aacc_ref[:, t, :] = attn[:, 0, :]

    h_ref[...] = h
    comb_ref[...] = cacc_ref[...].astype(comb_ref.dtype)     # coalesced stores
    attn_ref[...] = aacc_ref[...].astype(attn_ref.dtype)


def decoder_forward(gi, h0, enc, enc_t, whh, bhh, wcomb, bc, *, time_chunk=8):
    T, B, G = gi.shape
    H = whh.shape[0]
    S = enc.shape[1]
    tc = _pick_time_chunk(T, time_chunk)
    bb = B
    nb, nc = B // bb, T // tc
    blk = (tc * bb * G * 2 + bb * H * 4 + 2 * bb * S * H * 2 + H * G * 2
           + G * 4 + 2 * H * H * 2 + H * 4 + bb * tc * H * 2 + bb * tc * S * 4
           + bb * H * 4 + bb * tc * H * 4 + bb * tc * S * 4)
    return pl.pallas_call(
        decoder_gru_attn_kernel,
        out_shape=(jax.ShapeDtypeStruct((B, T, H), jnp.bfloat16),
                   jax.ShapeDtypeStruct((B, T, S), jnp.float32)),
        grid=(nb, nc),
        in_specs=[
            pl.BlockSpec((tc, bb, G), lambda b, c: (c, b, 0)),
            pl.BlockSpec((bb, H), lambda b, c: (b, 0)),
            pl.BlockSpec((bb, S, H), lambda b, c: (b, 0, 0)),
            pl.BlockSpec((bb, H, S), lambda b, c: (b, 0, 0)),
            pl.BlockSpec((H, G), lambda b, c: (0, 0)),
            pl.BlockSpec((1, G), lambda b, c: (0, 0)),
            pl.BlockSpec((2 * H, H), lambda b, c: (0, 0)),
            pl.BlockSpec((1, H), lambda b, c: (0, 0)),
        ],
        out_specs=(
            pl.BlockSpec((bb, tc, H), lambda b, c: (b, c, 0)),
            pl.BlockSpec((bb, tc, S), lambda b, c: (b, c, 0)),
        ),
        scratch_shapes=[pltpu.VMEM((bb, H), jnp.float32),
                        pltpu.VMEM((bb, tc, H), jnp.float32),
                        pltpu.VMEM((bb, tc, S), jnp.float32)],
        compiler_params=pltpu.CompilerParams(
            dimension_semantics=("parallel", "arbitrary"),
            vmem_limit_bytes=_vmem_limit(blk)),
    )(gi, h0, enc, enc_t, whh, bhh, wcomb, bc)


# ----------------------------------------------------------------------------
# Batched vocab projection + per-step log_softmax over the (padded) vocab.
# Row-tiled grid ('parallel'), weight block pinned; Vp is lane-dense (x128).
# ----------------------------------------------------------------------------
def vocab_proj_logsoftmax_kernel(comb_ref, wo_ref, bo_ref, out_ref):
    logits = jnp.dot(comb_ref[...], wo_ref[...],
                     preferred_element_type=jnp.float32) + bo_ref[...]
    m = jnp.max(logits, axis=-1, keepdims=True)
    lse = jnp.log(jnp.sum(jnp.exp(logits - m), axis=-1, keepdims=True)) + m
    out_ref[...] = logits - lse


def vocab_projection(comb2d, wo_p, bo_p, *, row_block=256):
    N, H = comb2d.shape
    Vp = wo_p.shape[1]
    rt = N if N <= row_block else row_block
    assert N % rt == 0
    # TODO(synk): for production vocabularies (8-32k) also tile Vp with an
    # online (running max/sum) log-softmax instead of a resident (H,Vp) block.
    blk = rt * H * 2 + H * Vp * 2 + Vp * 4 + rt * Vp * 4
    return pl.pallas_call(
        vocab_proj_logsoftmax_kernel,
        out_shape=jax.ShapeDtypeStruct((N, Vp), jnp.float32),
        grid=(N // rt,),
        in_specs=[
            pl.BlockSpec((rt, H), lambda i: (i, 0)),
            pl.BlockSpec((H, Vp), lambda i: (0, 0)),
            pl.BlockSpec((1, Vp), lambda i: (0, 0)),
        ],
        out_specs=pl.BlockSpec((rt, Vp), lambda i: (i, 0)),
        compiler_params=pltpu.CompilerParams(
            dimension_semantics=("parallel",),
            vmem_limit_bytes=_vmem_limit(blk)),
    )(comb2d, wo_p, bo_p)


# ----------------------------------------------------------------------------
# Full forward (teacher_forcing_rate = 1.0, get_attention = True).
# ----------------------------------------------------------------------------
def seq2seq_with_attention_forward(params, enc_input, dec_input):
    H = params["enc_whh"].shape[1]
    Hp = _round_up(H, 128)

    # embeddings (XLA gather)
    # TODO(synk): decoder embedding dropout is identity in eval mode and is omitted.
    enc_emb = jnp.take(params["emb_enc"], enc_input, axis=0)      # (B, S, E)
    dec_emb = jnp.take(params["emb_dec"], dec_input, axis=0)      # (B, T, E)

    # hoisted input-side GRU projections for ALL timesteps (one batched matmul
    # per RNN), emitted directly in the fused lane-aligned gate layout.
    enc_wih_f, enc_bih_f = _fuse_gate_params(params["enc_wih"], params["enc_bih"], Hp)
    dec_wih_f, dec_bih_f = _fuse_gate_params(params["dec_wih"], params["dec_bih"], Hp)
    gi_enc = (jnp.einsum('bse,eg->sbg', enc_emb, enc_wih_f)
              + enc_bih_f).astype(jnp.bfloat16)                   # (S, B, 3Hp)
    gi_dec = (jnp.einsum('bte,eg->tbg', dec_emb, dec_wih_f)
              + dec_bih_f).astype(jnp.bfloat16)                   # (T, B, 3Hp)

    enc_whh_f, enc_bhh_f = _fuse_gate_params(params["enc_whh"], params["enc_bhh"], Hp)
    dec_whh_f, dec_bhh_f = _fuse_gate_params(params["dec_whh"], params["dec_bhh"], Hp)

    # encoder recurrence -> outputs already in (B, S, H), bf16
    enc_out, h_final = encoder_forward(
        gi_enc, enc_whh_f.astype(jnp.bfloat16), enc_bhh_f)

    # enc_T hoisted ONCE per forward (not per step / chunk), bf16.
    enc_t = jnp.swapaxes(enc_out, 1, 2)                           # (B, H, S)

    # decoder recurrence + attention -> (B, T, H) / (B, T, S), no transposes
    wcomb = jnp.concatenate([params["wc_h"], params["wc_c"]], axis=0)
    comb, attentions = decoder_forward(
        gi_dec, h_final, enc_out, enc_t,
        dec_whh_f.astype(jnp.bfloat16), dec_bhh_f,
        wcomb.astype(jnp.bfloat16), params["bc"])

    # lane-dense vocab projection + per-step log_softmax over V (padded lanes
    # carry bias = -1e30 and are stripped BEFORE the time-axis log_softmax).
    B, T, _ = comb.shape
    V = params["wo"].shape[1]
    Vp = _round_up(V, 128)
    wo_p = jnp.pad(params["wo"], ((0, 0), (0, Vp - V))).astype(jnp.bfloat16)
    bo_p = jnp.pad(params["bo"], ((0, 0), (0, Vp - V)), constant_values=NEG_INF)
    logp = vocab_projection(comb.reshape(B * T, H), wo_p, bo_p)   # (B*T, Vp)
    output = logp.reshape(B, T, Vp)[:, :, :V]                     # (B, T, V)

    # final F.log_softmax(output, dim=1): over the TIME axis, as in PyTorch.
    output = jax.nn.log_softmax(output, axis=1)
    return output, attentions


# ----------------------------------------------------------------------------
# Deterministic parameter init (per-gate weight layout, gate order r, z, n).
# ----------------------------------------------------------------------------
def init_params(key, V_enc, V_dec, E, H):
    ks = jax.random.split(key, 16)
    u = lambda k, s, sc: jax.random.uniform(k, s, jnp.float32, -1.0, 1.0) * sc
    return {
        "emb_enc": u(ks[0], (V_enc, E), 0.1),
        "emb_dec": u(ks[1], (V_dec, E), 0.1),
        "enc_wih": u(ks[2], (3, E, H), 0.1),
        "enc_whh": u(ks[3], (3, H, H), 0.1),
        "enc_bih": u(ks[4], (3, 1, H), 0.1),
        "enc_bhh": u(ks[5], (3, 1, H), 0.1),
        "dec_wih": u(ks[6], (3, E, H), 0.1),
        "dec_whh": u(ks[7], (3, H, H), 0.1),
        "dec_bih": u(ks[8], (3, 1, H), 0.1),
        "dec_bhh": u(ks[9], (3, 1, H), 0.1),
        "wc_h":    u(ks[10], (H, H), 0.1),
        "wc_c":    u(ks[11], (H, H), 0.1),
        "bc":      u(ks[12], (1, H), 0.1),
        "wo":      u(ks[13], (H, V_dec), 0.1),
        "bo":      u(ks[14], (1, V_dec), 0.1),
    }


if __name__ == "__main__":
    # seq lengths of 16 with time_chunk=8 exercise the chunk-carried hidden
    # state (2 time chunks per recurrence) while staying small.
    B, S_ENC, T_DEC = 2, 16, 16
    E, H = 32, 32
    V_ENC, V_DEC = 48, 64

    key = jax.random.PRNGKey(0)
    kp, k1, k2 = jax.random.split(key, 3)
    params = init_params(kp, V_ENC, V_DEC, E, H)

    enc_input = jax.random.randint(k1, (B, S_ENC), 0, V_ENC, dtype=jnp.int32)
    dec_input = jax.random.randint(k2, (B, T_DEC), 0, V_DEC, dtype=jnp.int32)

    output, attentions = jax.jit(seq2seq_with_attention_forward)(
        params, enc_input, dec_input)
    jax.block_until_ready((output, attentions))

    assert output.shape == (B, T_DEC, V_DEC)
    assert attentions.shape == (B, T_DEC, S_ENC)
    print("KERNEL_OK")
</pallas_src>

<mosaic_0001>
module attributes {stable_mosaic.version = 11 : i64} {
  func.func @encoder_gru_kernel(%arg0: i32, %arg1: i32, %arg2: memref<8x2x384xbf16, #tpu.memory_space<vmem>>, %arg3: memref<32x384xbf16, #tpu.memory_space<vmem>>, %arg4: memref<1x384xf32, #tpu.memory_space<vmem>>, %arg5: memref<2x8x32xbf16, #tpu.memory_space<vmem>>, %arg6: memref<2x32xf32, #tpu.memory_space<vmem>>, %arg7: memref<2x32xf32, #tpu.memory_space<vmem>>, %arg8: memref<2x8x32xf32, #tpu.memory_space<vmem>>) attributes {dimension_semantics = [#tpu.dimension_semantics<parallel>, #tpu.dimension_semantics<arbitrary>], iteration_bounds = array<i64: 1, 2>, scalar_prefetch = 0 : i64, scratch_operands = 2 : i64, tpu.core_type = #tpu.core_type<tc>, window_params = [{transform_indices = @transform_0, window_bounds = array<i64: 8, 2, 384>}, {pipeline_mode = #tpu.pipeline_mode<synchronous>, transform_indices = @transform_1, window_bounds = array<i64: 32, 384>}, {pipeline_mode = #tpu.pipeline_mode<synchronous>, transform_indices = @transform_2, window_bounds = array<i64: 1, 384>}, {transform_indices = @transform_3, window_bounds = array<i64: 2, 8, 32>}, {transform_indices = @transform_4, window_bounds = array<i64: 2, 32>}]} {
    %c0_i32 = arith.constant 0 : i32
    %0 = arith.cmpi eq, %arg1, %c0_i32 : i32
    %1 = arith.extui %0 : i1 to i32
    %c0_i32_0 = arith.constant 0 : i32
    %2 = arith.cmpi ne, %1, %c0_i32_0 : i32
    scf.if %2 {
      %cst_88 = arith.constant 0.000000e+00 : f32
      %293 = vector.broadcast %cst_88 : f32 to vector<2x32xf32>
      %c0_89 = arith.constant 0 : index
      %c0_90 = arith.constant 0 : index
      %294 = vector.load %arg7[%c0_89, %c0_90] : memref<2x32xf32, #tpu.memory_space<vmem>>, vector<2x32xf32>
      tpu.vector_store %arg7[%c0_89, %c0_90], %293 {strides = array<i32>} : memref<2x32xf32, #tpu.memory_space<vmem>>, vector<2x32xf32>,
    } else {
    }
    %c0 = arith.constant 0 : index
    %c0_1 = arith.constant 0 : index
    %3 = vector.load %arg3[%c0, %c0_1] : memref<32x384xbf16, #tpu.memory_space<vmem>>, vector<32x384xbf16>
    %c0_2 = arith.constant 0 : index
    %c0_3 = arith.constant 0 : index
    %4 = vector.load %arg4[%c0_2, %c0_3] : memref<1x384xf32, #tpu.memory_space<vmem>>, vector<1x384xf32>
    %5 = vector.shape_cast %4 : vector<1x384xf32> to vector<1x384xf32>
    %6 = vector.broadcast %5 : vector<1x384xf32> to vector<2x384xf32>
    %c0_4 = arith.constant 0 : index
    %c0_5 = arith.constant 0 : index
    %7 = vector.load %arg7[%c0_4, %c0_5] : memref<2x32xf32, #tpu.memory_space<vmem>>, vector<2x32xf32>
    %8 = arith.truncf %7 : vector<2x32xf32> to vector<2x32xbf16>
    %cst = arith.constant dense<0.000000e+00> : vector<2x384xf32>
    %9 = tpu.matmul %8, %3, %cst {dimension_numbers = #tpu.dot_dimension_numbers<[1], [0], [0], [1], [0, 0, 1, 1], [], []>} : vector<2x32xbf16>, vector<32x384xbf16>, vector<2x384xf32> -> vector<2x384xf32>
    %10 = arith.addf %9, %6 : vector<2x384xf32>
    %c0_6 = arith.constant 0 : index
    %c0_7 = arith.constant 0 : index
    %c0_8 = arith.constant 0 : index
    %11 = vector.load %arg2[%c0_6, %c0_7, %c0_8] : memref<8x2x384xbf16, #tpu.memory_space<vmem>>, vector<1x2x384xbf16>
    %12 = vector.shape_cast %11 : vector<1x2x384xbf16> to vector<2x384xbf16>
    %13 = arith.extf %12 : vector<2x384xbf16> to vector<2x384xf32>
    %14 = vector.extract_strided_slice %13 {offsets = [0, 0], sizes = [2, 32], strides = [1, 1]} : vector<2x384xf32> to vector<2x32xf32>
    %15 = vector.extract_strided_slice %10 {offsets = [0, 0], sizes = [2, 32], strides = [1, 1]} : vector<2x384xf32> to vector<2x32xf32>
    %16 = arith.addf %14, %15 : vector<2x32xf32>
    %17 = arith.negf %16 : vector<2x32xf32>
    %18 = math.exp %17 : vector<2x32xf32>
    %cst_9 = arith.constant 1.000000e+00 : f32
    %19 = vector.broadcast %cst_9 : f32 to vector<2x32xf32>
    %20 = arith.addf %19, %18 : vector<2x32xf32>
    %21 = arith.divf %19, %20 : vector<2x32xf32>
    %22 = vector.extract_strided_slice %13 {offsets = [0, 128], sizes = [2, 32], strides = [1, 1]} : vector<2x384xf32> to vector<2x32xf32>
    %23 = vector.extract_strided_slice %10 {offsets = [0, 128], sizes = [2, 32], strides = [1, 1]} : vector<2x384xf32> to vector<2x32xf32>
    %24 = arith.addf %22, %23 : vector<2x32xf32>
    %25 = arith.negf %24 : vector<2x32xf32>
    %26 = math.exp %25 : vector<2x32xf32>
    %cst_10 = arith.constant 1.000000e+00 : f32
    %27 = vector.broadcast %cst_10 : f32 to vector<2x32xf32>
    %28 = arith.addf %27, %26 : vector<2x32xf32>
    %29 = arith.divf %27, %28 : vector<2x32xf32>
    %30 = vector.extract_strided_slice %13 {offsets = [0, 256], sizes = [2, 32], strides = [1, 1]} : vector<2x384xf32> to vector<2x32xf32>
    %31 = vector.extract_strided_slice %10 {offsets = [0, 256], sizes = [2, 32], strides = [1, 1]} : vector<2x384xf32> to vector<2x32xf32>
    %32 = arith.mulf %21, %31 : vector<2x32xf32>
    %33 = arith.addf %30, %32 : vector<2x32xf32>
    %34 = math.tanh %33 : vector<2x32xf32>
    %cst_11 = arith.constant 1.000000e+00 : f32
    %35 = vector.broadcast %cst_11 : f32 to vector<2x32xf32>
    %36 = arith.subf %35, %29 : vector<2x32xf32>
    %37 = arith.mulf %36, %34 : vector<2x32xf32>
    %38 = arith.mulf %29, %7 : vector<2x32xf32>
    %39 = arith.addf %37, %38 : vector<2x32xf32>
    %c0_12 = arith.constant 0 : index
    %c0_13 = arith.constant 0 : index
    %c0_14 = arith.constant 0 : index
    %40 = vector.load %arg8[%c0_12, %c0_13, %c0_14] : memref<2x8x32xf32, #tpu.memory_space<vmem>>, vector<2x1x32xf32>
    %41 = vector.shape_cast %40 : vector<2x1x32xf32> to vector<2x32xf32>
    %42 = vector.shape_cast %39 : vector<2x32xf32> to vector<2x1x32xf32>
    tpu.vector_store %arg8[%c0_12, %c0_13, %c0_14], %42 {strides = array<i32>} : memref<2x8x32xf32, #tpu.memory_space<vmem>>, vector<2x1x32xf32>,
    %43 = arith.truncf %39 : vector<2x32xf32> to vector<2x32xbf16>
    %cst_15 = arith.constant dense<0.000000e+00> : vector<2x384xf32>
    %44 = tpu.matmul %43, %3, %cst_15 {dimension_numbers = #tpu.dot_dimension_numbers<[1], [0], [0], [1], [0, 0, 1, 1], [], []>} : vector<2x32xbf16>, vector<32x384xbf16>, vector<2x384xf32> -> vector<2x384xf32>
    %45 = arith.addf %44, %6 : vector<2x384xf32>
    %c1 = arith.constant 1 : index
    %c0_16 = arith.constant 0 : index
    %c0_17 = arith.constant 0 : index
    %46 = vector.load %arg2[%c1, %c0_16, %c0_17] : memref<8x2x384xbf16, #tpu.memory_space<vmem>>, vector<1x2x384xbf16>
    %47 = vector.shape_cast %46 : vector<1x2x384xbf16> to vector<2x384xbf16>
    %48 = arith.extf %47 : vector<2x384xbf16> to vector<2x384xf32>
    %49 = vector.extract_strided_slice %48 {offsets = [0, 0], sizes = [2, 32], strides = [1, 1]} : vector<2x384xf32> to vector<2x32xf32>
    %50 = vector.extract_strided_slice %45 {offsets = [0, 0], sizes = [2, 32], strides = [1, 1]} : vector<2x384xf32> to vector<2x32xf32>
    %51 = arith.addf %49, %50 : vector<2x32xf32>
    %52 = arith.negf %51 : vector<2x32xf32>
    %53 = math.exp %52 : vector<2x32xf32>
    %cst_18 = arith.constant 1.000000e+00 : f32
    %54 = vector.broadcast %cst_18 : f32 to vector<2x32xf32>
    %55 = arith.addf %54, %53 : vector<2x32xf32>
    %56 = arith.divf %54, %55 : vector<2x32xf32>
    %57 = vector.extract_strided_slice %48 {offsets = [0, 128], sizes = [2, 32], strides = [1, 1]} : vector<2x384xf32> to vector<2x32xf32>
    %58 = vector.extract_strided_slice %45 {offsets = [0, 128], sizes = [2, 32], strides = [1, 1]} : vector<2x384xf32> to vector<2x32xf32>
    %59 = arith.addf %57, %58 : vector<2x32xf32>
    %60 = arith.negf %59 : vector<2x32xf32>
    %61 = math.exp %60 : vector<2x32xf32>
    %cst_19 = arith.constant 1.000000e+00 : f32
    %62 = vector.broadcast %cst_19 : f32 to vector<2x32xf32>
    %63 = arith.addf %62, %61 : vector<2x32xf32>
    %64 = arith.divf %62, %63 : vector<2x32xf32>
    %65 = vector.extract_strided_slice %48 {offsets = [0, 256], sizes = [2, 32], strides = [1, 1]} : vector<2x384xf32> to vector<2x32xf32>
    %66 = vector.extract_strided_slice %45 {offsets = [0, 256], sizes = [2, 32], strides = [1, 1]} : vector<2x384xf32> to vector<2x32xf32>
    %67 = arith.mulf %56, %66 : vector<2x32xf32>
    %68 = arith.addf %65, %67 : vector<2x32xf32>
    %69 = math.tanh %68 : vector<2x32xf32>
    %cst_20 = arith.constant 1.000000e+00 : f32
    %70 = vector.broadcast %cst_20 : f32 to vector<2x32xf32>
    %71 = arith.subf %70, %64 : vector<2x32xf32>
    %72 = arith.mulf %71, %69 : vector<2x32xf32>
    %73 = arith.mulf %64, %39 : vector<2x32xf32>
    %74 = arith.addf %72, %73 : vector<2x32xf32>
    %c0_21 = arith.constant 0 : index
    %c1_22 = arith.constant 1 : index
    %c0_23 = arith.constant 0 : index
    %75 = vector.load %arg8[%c0_21, %c1_22, %c0_23] : memref<2x8x32xf32, #tpu.memory_space<vmem>>, vector<2x1x32xf32>
    %76 = vector.shape_cast %75 : vector<2x1x32xf32> to vector<2x32xf32>
    %77 = vector.shape_cast %74 : vector<2x32xf32> to vector<2x1x32xf32>
    tpu.vector_store %arg8[%c0_21, %c1_22, %c0_23], %77 {strides = array<i32>} : memref<2x8x32xf32, #tpu.memory_space<vmem>>, vector<2x1x32xf32>,
    %78 = arith.truncf %74 : vector<2x32xf32> to vector<2x32xbf16>
    %cst_24 = arith.constant dense<0.000000e+00> : vector<2x384xf32>
    %79 = tpu.matmul %78, %3, %cst_24 {dimension_numbers = #tpu.dot_dimension_numbers<[1], [0], [0], [1], [0, 0, 1, 1], [], []>} : vector<2x32xbf16>, vector<32x384xbf16>, vector<2x384xf32> -> vector<2x384xf32>
    %80 = arith.addf %79, %6 : vector<2x384xf32>
    %c2 = arith.constant 2 : index
    %c0_25 = arith.constant 0 : index
    %c0_26 = arith.constant 0 : index
    %81 = vector.load %arg2[%c2, %c0_25, %c0_26] : memref<8x2x384xbf16, #tpu.memory_space<vmem>>, vector<1x2x384xbf16>
    %82 = vector.shape_cast %81 : vector<1x2x384xbf16> to vector<2x384xbf16>
    %83 = arith.extf %82 : vector<2x384xbf16> to vector<2x384xf32>
    %84 = vector.extract_strided_slice %83 {offsets = [0, 0], sizes = [2, 32], strides = [1, 1]} : vector<2x384xf32> to vector<2x32xf32>
    %85 = vector.extract_strided_slice %80 {offsets = [0, 0], sizes = [2, 32], strides = [1, 1]} : vector<2x384xf32> to vector<2x32xf32>
    %86 = arith.addf %84, %85 : vector<2x32xf32>
    %87 = arith.negf %86 : vector<2x32xf32>
    %88 = math.exp %87 : vector<2x32xf32>
    %cst_27 = arith.constant 1.000000e+00 : f32
    %89 = vector.broadcast %cst_27 : f32 to vector<2x32xf32>
    %90 = arith.addf %89, %88 : vector<2x32xf32>
    %91 = arith.divf %89, %90 : vector<2x32xf32>
    %92 = vector.extract_strided_slice %83 {offsets = [0, 128], sizes = [2, 32], strides = [1, 1]} : vector<2x384xf32> to vector<2x32xf32>
    %93 = vector.extract_strided_slice %80 {offsets = [0, 128], sizes = [2, 32], strides = [1, 1]} : vector<2x384xf32> to vector<2x32xf32>
    %94 = arith.addf %92, %93 : vector<2x32xf32>
    %95 = arith.negf %94 : vector<2x32xf32>
    %96 = math.exp %95 : vector<2x32xf32>
    %cst_28 = arith.constant 1.000000e+00 : f32
    %97 = vector.broadcast %cst_28 : f32 to vector<2x32xf32>
    %98 = arith.addf %97, %96 : vector<2x32xf32>
    %99 = arith.divf %97, %98 : vector<2x32xf32>
    %100 = vector.extract_strided_slice %83 {offsets = [0, 256], sizes = [2, 32], strides = [1, 1]} : vector<2x384xf32> to vector<2x32xf32>
    %101 = vector.extract_strided_slice %80 {offsets = [0, 256], sizes = [2, 32], strides = [1, 1]} : vector<2x384xf32> to vector<2x32xf32>
    %102 = arith.mulf %91, %101 : vector<2x32xf32>
    %103 = arith.addf %100, %102 : vector<2x32xf32>
    %104 = math.tanh %103 : vector<2x32xf32>
    %cst_29 = arith.constant 1.000000e+00 : f32
    %105 = vector.broadcast %cst_29 : f32 to vector<2x32xf32>
    %106 = arith.subf %105, %99 : vector<2x32xf32>
    %107 = arith.mulf %106, %104 : vector<2x32xf32>
    %108 = arith.mulf %99, %74 : vector<2x32xf32>
    %109 = arith.addf %107, %108 : vector<2x32xf32>
    %c0_30 = arith.constant 0 : index
    %c2_31 = arith.constant 2 : index
    %c0_32 = arith.constant 0 : index
    %110 = vector.load %arg8[%c0_30, %c2_31, %c0_32] : memref<2x8x32xf32, #tpu.memory_space<vmem>>, vector<2x1x32xf32>
    %111 = vector.shape_cast %110 : vector<2x1x32xf32> to vector<2x32xf32>
    %112 = vector.shape_cast %109 : vector<2x32xf32> to vector<2x1x32xf32>
    tpu.vector_store %arg8[%c0_30, %c2_31, %c0_32], %112 {strides = array<i32>} : memref<2x8x32xf32, #tpu.memory_space<vmem>>, vector<2x1x32xf32>,
    %113 = arith.truncf %109 : vector<2x32xf32> to vector<2x32xbf16>
    %cst_33 = arith.constant dense<0.000000e+00> : vector<2x384xf32>
    %114 = tpu.matmul %113, %3, %cst_33 {dimension_numbers = #tpu.dot_dimension_numbers<[1], [0], [0], [1], [0, 0, 1, 1], [], []>} : vector<2x32xbf16>, vector<32x384xbf16>, vector<2x384xf32> -> vector<2x384xf32>
    %115 = arith.addf %114, %6 : vector<2x384xf32>
    %c3 = arith.constant 3 : index
    %c0_34 = arith.constant 0 : index
    %c0_35 = arith.constant 0 : index
    %116 = vector.load %arg2[%c3, %c0_34, %c0_35] : memref<8x2x384xbf16, #tpu.memory_space<vmem>>, vector<1x2x384xbf16>
    %117 = vector.shape_cast %116 : vector<1x2x384xbf16> to vector<2x384xbf16>
    %118 = arith.extf %117 : vector<2x384xbf16> to vector<2x384xf32>
    %119 = vector.extract_strided_slice %118 {offsets = [0, 0], sizes = [2, 32], strides = [1, 1]} : vector<2x384xf32> to vector<2x32xf32>
    %120 = vector.extract_strided_slice %115 {offsets = [0, 0], sizes = [2, 32], strides = [1, 1]} : vector<2x384xf32> to vector<2x32xf32>
    %121 = arith.addf %119, %120 : vector<2x32xf32>
    %122 = arith.negf %121 : vector<2x32xf32>
    %123 = math.exp %122 : vector<2x32xf32>
    %cst_36 = arith.constant 1.000000e+00 : f32
    %124 = vector.broadcast %cst_36 : f32 to vector<2x32xf32>
    %125 = arith.addf %124, %123 : vector<2x32xf32>
    %126 = arith.divf %124, %125 : vector<2x32xf32>
    %127 = vector.extract_strided_slice %118 {offsets = [0, 128], sizes = [2, 32], strides = [1, 1]} : vector<2x384xf32> to vector<2x32xf32>
    %128 = vector.extract_strided_slice %115 {offsets = [0, 128], sizes = [2, 32], strides = [1, 1]} : vector<2x384xf32> to vector<2x32xf32>
    %129 = arith.addf %127, %128 : vector<2x32xf32>
    %130 = arith.negf %129 : vector<2x32xf32>
    %131 = math.exp %130 : vector<2x32xf32>
    %cst_37 = arith.constant 1.000000e+00 : f32
    %132 = vector.broadcast %cst_37 : f32 to vector<2x32xf32>
    %133 = arith.addf %132, %131 : vector<2x32xf32>
    %134 = arith.divf %132, %133 : vector<2x32xf32>
    %135 = vector.extract_strided_slice %118 {offsets = [0, 256], sizes = [2, 32], strides = [1, 1]} : vector<2x384xf32> to vector<2x32xf32>
    %136 = vector.extract_strided_slice %115 {offsets = [0, 256], sizes = [2, 32], strides = [1, 1]} : vector<2x384xf32> to vector<2x32xf32>
    %137 = arith.mulf %126, %136 : vector<2x32xf32>
    %138 = arith.addf %135, %137 : vector<2x32xf32>
    %139 = math.tanh %138 : vector<2x32xf32>
    %cst_38 = arith.constant 1.000000e+00 : f32
    %140 = vector.broadcast %cst_38 : f32 to vector<2x32xf32>
    %141 = arith.subf %140, %134 : vector<2x32xf32>
    %142 = arith.mulf %141, %139 : vector<2x32xf32>
    %143 = arith.mulf %134, %109 : vector<2x32xf32>
    %144 = arith.addf %142, %143 : vector<2x32xf32>
    %c0_39 = arith.constant 0 : index
    %c3_40 = arith.constant 3 : index
    %c0_41 = arith.constant 0 : index
    %145 = vector.load %arg8[%c0_39, %c3_40, %c0_41] : memref<2x8x32xf32, #tpu.memory_space<vmem>>, vector<2x1x32xf32>
    %146 = vector.shape_cast %145 : vector<2x1x32xf32> to vector<2x32xf32>
    %147 = vector.shape_cast %144 : vector<2x32xf32> to vector<2x1x32xf32>
    tpu.vector_store %arg8[%c0_39, %c3_40, %c0_41], %147 {strides = array<i32>} : memref<2x8x32xf32, #tpu.memory_space<vmem>>, vector<2x1x32xf32>,
    %148 = arith.truncf %144 : vector<2x32xf32> to vector<2x32xbf16>
    %cst_42 = arith.constant dense<0.000000e+00> : vector<2x384xf32>
    %149 = tpu.matmul %148, %3, %cst_42 {dimension_numbers = #tpu.dot_dimension_numbers<[1], [0], [0], [1], [0, 0, 1, 1], [], []>} : vector<2x32xbf16>, vector<32x384xbf16>, vector<2x384xf32> -> vector<2x384xf32>
    %150 = arith.addf %149, %6 : vector<2x384xf32>
    %c4 = arith.constant 4 : index
    %c0_43 = arith.constant 0 : index
    %c0_44 = arith.constant 0 : index
    %151 = vector.load %arg2[%c4, %c0_43, %c0_44] : memref<8x2x384xbf16, #tpu.memory_space<vmem>>, vector<1x2x384xbf16>
    %152 = vector.shape_cast %151 : vector<1x2x384xbf16> to vector<2x384xbf16>
    %153 = arith.extf %152 : vector<2x384xbf16> to vector<2x384xf32>
    %154 = vector.extract_strided_slice %153 {offsets = [0, 0], sizes = [2, 32], strides = [1, 1]} : vector<2x384xf32> to vector<2x32xf32>
    %155 = vector.extract_strided_slice %150 {offsets = [0, 0], sizes = [2, 32], strides = [1, 1]} : vector<2x384xf32> to vector<2x32xf32>
    %156 = arith.addf %154, %155 : vector<2x32xf32>
    %157 = arith.negf %156 : vector<2x32xf32>
    %158 = math.exp %157 : vector<2x32xf32>
    %cst_45 = arith.constant 1.000000e+00 : f32
    %159 = vector.broadcast %cst_45 : f32 to vector<2x32xf32>
    %160 = arith.addf %159, %158 : vector<2x32xf32>
    %161 = arith.divf %159, %160 : vector<2x32xf32>
    %162 = vector.extract_strided_slice %153 {offsets = [0, 128], sizes = [2, 32], strides = [1, 1]} : vector<2x384xf32> to vector<2x32xf32>
    %163 = vector.extract_strided_slice %150 {offsets = [0, 128], sizes = [2, 32], strides = [1, 1]} : vector<2x384xf32> to vector<2x32xf32>
    %164 = arith.addf %162, %163 : vector<2x32xf32>
    %165 = arith.negf %164 : vector<2x32xf32>
    %166 = math.exp %165 : vector<2x32xf32>
    %cst_46 = arith.constant 1.000000e+00 : f32
    %167 = vector.broadcast %cst_46 : f32 to vector<2x32xf32>
    %168 = arith.addf %167, %166 : vector<2x32xf32>
    %169 = arith.divf %167, %168 : vector<2x32xf32>
    %170 = vector.extract_strided_slice %153 {offsets = [0, 256], sizes = [2, 32], strides = [1, 1]} : vector<2x384xf32> to vector<2x32xf32>
    %171 = vector.extract_strided_slice %150 {offsets = [0, 256], sizes = [2, 32], strides = [1, 1]} : vector<2x384xf32> to vector<2x32xf32>
    %172 = arith.mulf %161, %171 : vector<2x32xf32>
    %173 = arith.addf %170, %172 : vector<2x32xf32>
    %174 = math.tanh %173 : vector<2x32xf32>
    %cst_47 = arith.constant 1.000000e+00 : f32
    %175 = vector.broadcast %cst_47 : f32 to vector<2x32xf32>
    %176 = arith.subf %175, %169 : vector<2x32xf32>
    %177 = arith.mulf %176, %174 : vector<2x32xf32>
    %178 = arith.mulf %169, %144 : vector<2x32xf32>
    %179 = arith.addf %177, %178 : vector<2x32xf32>
    %c0_48 = arith.constant 0 : index
    %c4_49 = arith.constant 4 : index
    %c0_50 = arith.constant 0 : index
    %180 = vector.load %arg8[%c0_48, %c4_49, %c0_50] : memref<2x8x32xf32, #tpu.memory_space<vmem>>, vector<2x1x32xf32>
    %181 = vector.shape_cast %180 : vector<2x1x32xf32> to vector<2x32xf32>
    %182 = vector.shape_cast %179 : vector<2x32xf32> to vector<2x1x32xf32>
    tpu.vector_store %arg8[%c0_48, %c4_49, %c0_50], %182 {strides = array<i32>} : memref<2x8x32xf32, #tpu.memory_space<vmem>>, vector<2x1x32xf32>,
    %183 = arith.truncf %179 : vector<2x32xf32> to vector<2x32xbf16>
    %cst_51 = arith.constant dense<0.000000e+00> : vector<2x384xf32>
    %184 = tpu.matmul %183, %3, %cst_51 {dimension_numbers = #tpu.dot_dimension_numbers<[1], [0], [0], [1], [0, 0, 1, 1], [], []>} : vector<2x32xbf16>, vector<32x384xbf16>, vector<2x384xf32> -> vector<2x384xf32>
    %185 = arith.addf %184, %6 : vector<2x384xf32>
    %c5 = arith.constant 5 : index
    %c0_52 = arith.constant 0 : index
    %c0_53 = arith.constant 0 : index
    %186 = vector.load %arg2[%c5, %c0_52, %c0_53] : memref<8x2x384xbf16, #tpu.memory_space<vmem>>, vector<1x2x384xbf16>
    %187 = vector.shape_cast %186 : vector<1x2x384xbf16> to vector<2x384xbf16>
    %188 = arith.extf %187 : vector<2x384xbf16> to vector<2x384xf32>
    %189 = vector.extract_strided_slice %188 {offsets = [0, 0], sizes = [2, 32], strides = [1, 1]} : vector<2x384xf32> to vector<2x32xf32>
    %190 = vector.extract_strided_slice %185 {offsets = [0, 0], sizes = [2, 32], strides = [1, 1]} : vector<2x384xf32> to vector<2x32xf32>
    %191 = arith.addf %189, %190 : vector<2x32xf32>
    %192 = arith.negf %191 : vector<2x32xf32>
    %193 = math.exp %192 : vector<2x32xf32>
    %cst_54 = arith.constant 1.000000e+00 : f32
    %194 = vector.broadcast %cst_54 : f32 to vector<2x32xf32>
    %195 = arith.addf %194, %193 : vector<2x32xf32>
    %196 = arith.divf %194, %195 : vector<2x32xf32>
    %197 = vector.extract_strided_slice %188 {offsets = [0, 128], sizes = [2, 32], strides = [1, 1]} : vector<2x384xf32> to vector<2x32xf32>
    %198 = vector.extract_strided_slice %185 {offsets = [0, 128], sizes = [2, 32], strides = [1, 1]} : vector<2x384xf32> to vector<2x32xf32>
    %199 = arith.addf %197, %198 : vector<2x32xf32>
    %200 = arith.negf %199 : vector<2x32xf32>
    %201 = math.exp %200 : vector<2x32xf32>
    %cst_55 = arith.constant 1.000000e+00 : f32
    %202 = vector.broadcast %cst_55 : f32 to vector<2x32xf32>
    %203 = arith.addf %202, %201 : vector<2x32xf32>
    %204 = arith.divf %202, %203 : vector<2x32xf32>
    %205 = vector.extract_strided_slice %188 {offsets = [0, 256], sizes = [2, 32], strides = [1, 1]} : vector<2x384xf32> to vector<2x32xf32>
    %206 = vector.extract_strided_slice %185 {offsets = [0, 256], sizes = [2, 32], strides = [1, 1]} : vector<2x384xf32> to vector<2x32xf32>
    %207 = arith.mulf %196, %206 : vector<2x32xf32>
    %208 = arith.addf %205, %207 : vector<2x32xf32>
    %209 = math.tanh %208 : vector<2x32xf32>
    %cst_56 = arith.constant 1.000000e+00 : f32
    %210 = vector.broadcast %cst_56 : f32 to vector<2x32xf32>
    %211 = arith.subf %210, %204 : vector<2x32xf32>
    %212 = arith.mulf %211, %209 : vector<2x32xf32>
    %213 = arith.mulf %204, %179 : vector<2x32xf32>
    %214 = arith.addf %212, %213 : vector<2x32xf32>
    %c0_57 = arith.constant 0 : index
    %c5_58 = arith.constant 5 : index
    %c0_59 = arith.constant 0 : index
    %215 = vector.load %arg8[%c0_57, %c5_58, %c0_59] : memref<2x8x32xf32, #tpu.memory_space<vmem>>, vector<2x1x32xf32>
    %216 = vector.shape_cast %215 : vector<2x1x32xf32> to vector<2x32xf32>
    %217 = vector.shape_cast %214 : vector<2x32xf32> to vector<2x1x32xf32>
    tpu.vector_store %arg8[%c0_57, %c5_58, %c0_59], %217 {strides = array<i32>} : memref<2x8x32xf32, #tpu.memory_space<vmem>>, vector<2x1x32xf32>,
    %218 = arith.truncf %214 : vector<2x32xf32> to vector<2x32xbf16>
    %cst_60 = arith.constant dense<0.000000e+00> : vector<2x384xf32>
    %219 = tpu.matmul %218, %3, %cst_60 {dimension_numbers = #tpu.dot_dimension_numbers<[1], [0], [0], [1], [0, 0, 1, 1], [], []>} : vector<2x32xbf16>, vector<32x384xbf16>, vector<2x384xf32> -> vector<2x384xf32>
    %220 = arith.addf %219, %6 : vector<2x384xf32>
    %c6 = arith.constant 6 : index
    %c0_61 = arith.constant 0 : index
    %c0_62 = arith.constant 0 : index
    %221 = vector.load %arg2[%c6, %c0_61, %c0_62] : memref<8x2x384xbf16, #tpu.memory_space<vmem>>, vector<1x2x384xbf16>
    %222 = vector.shape_cast %221 : vector<1x2x384xbf16> to vector<2x384xbf16>
    %223 = arith.extf %222 : vector<2x384xbf16> to vector<2x384xf32>
    %224 = vector.extract_strided_slice %223 {offsets = [0, 0], sizes = [2, 32], strides = [1, 1]} : vector<2x384xf32> to vector<2x32xf32>
    %225 = vector.extract_strided_slice %220 {offsets = [0, 0], sizes = [2, 32], strides = [1, 1]} : vector<2x384xf32> to vector<2x32xf32>
    %226 = arith.addf %224, %225 : vector<2x32xf32>
    %227 = arith.negf %226 : vector<2x32xf32>
    %228 = math.exp %227 : vector<2x32xf32>
    %cst_63 = arith.constant 1.000000e+00 : f32
    %229 = vector.broadcast %cst_63 : f32 to vector<2x32xf32>
    %230 = arith.addf %229, %228 : vector<2x32xf32>
    %231 = arith.divf %229, %230 : vector<2x32xf32>
    %232 = vector.extract_strided_slice %223 {offsets = [0, 128], sizes = [2, 32], strides = [1, 1]} : vector<2x384xf32> to vector<2x32xf32>
    %233 = vector.extract_strided_slice %220 {offsets = [0, 128], sizes = [2, 32], strides = [1, 1]} : vector<2x384xf32> to vector<2x32xf32>
    %234 = arith.addf %232, %233 : vector<2x32xf32>
    %235 = arith.negf %234 : vector<2x32xf32>
    %236 = math.exp %235 : vector<2x32xf32>
    %cst_64 = arith.constant 1.000000e+00 : f32
    %237 = vector.broadcast %cst_64 : f32 to vector<2x32xf32>
    %238 = arith.addf %237, %236 : vector<2x32xf32>
    %239 = arith.divf %237, %238 : vector<2x32xf32>
    %240 = vector.extract_strided_slice %223 {offsets = [0, 256], sizes = [2, 32], strides = [1, 1]} : vector<2x384xf32> to vector<2x32xf32>
    %241 = vector.extract_strided_slice %220 {offsets = [0, 256], sizes = [2, 32], strides = [1, 1]} : vector<2x384xf32> to vector<2x32xf32>
    %242 = arith.mulf %231, %241 : vector<2x32xf32>
    %243 = arith.addf %240, %242 : vector<2x32xf32>
    %244 = math.tanh %243 : vector<2x32xf32>
    %cst_65 = arith.constant 1.000000e+00 : f32
    %245 = vector.broadcast %cst_65 : f32 to vector<2x32xf32>
    %246 = arith.subf %245, %239 : vector<2x32xf32>
    %247 = arith.mulf %246, %244 : vector<2x32xf32>
    %248 = arith.mulf %239, %214 : vector<2x32xf32>
    %249 = arith.addf %247, %248 : vector<2x32xf32>
    %c0_66 = arith.constant 0 : index
    %c6_67 = arith.constant 6 : index
    %c0_68 = arith.constant 0 : index
    %250 = vector.load %arg8[%c0_66, %c6_67, %c0_68] : memref<2x8x32xf32, #tpu.memory_space<vmem>>, vector<2x1x32xf32>
    %251 = vector.shape_cast %250 : vector<2x1x32xf32> to vector<2x32xf32>
    %252 = vector.shape_cast %249 : vector<2x32xf32> to vector<2x1x32xf32>
    tpu.vector_store %arg8[%c0_66, %c6_67, %c0_68], %252 {strides = array<i32>} : memref<2x8x32xf32, #tpu.memory_space<vmem>>, vector<2x1x32xf32>,
    %253 = arith.truncf %249 : vector<2x32xf32> to vector<2x32xbf16>
    %cst_69 = arith.constant dense<0.000000e+00> : vector<2x384xf32>
    %254 = tpu.matmul %253, %3, %cst_69 {dimension_numbers = #tpu.dot_dimension_numbers<[1], [0], [0], [1], [0, 0, 1, 1], [], []>} : vector<2x32xbf16>, vector<32x384xbf16>, vector<2x384xf32> -> vector<2x384xf32>
    %255 = arith.addf %254, %6 : vector<2x384xf32>
    %c7 = arith.constant 7 : index
    %c0_70 = arith.constant 0 : index
    %c0_71 = arith.constant 0 : index
    %256 = vector.load %arg2[%c7, %c0_70, %c0_71] : memref<8x2x384xbf16, #tpu.memory_space<vmem>>, vector<1x2x384xbf16>
    %257 = vector.shape_cast %256 : vector<1x2x384xbf16> to vector<2x384xbf16>
    %258 = arith.extf %257 : vector<2x384xbf16> to vector<2x384xf32>
    %259 = vector.extract_strided_slice %258 {offsets = [0, 0], sizes = [2, 32], strides = [1, 1]} : vector<2x384xf32> to vector<2x32xf32>
    %260 = vector.extract_strided_slice %255 {offsets = [0, 0], sizes = [2, 32], strides = [1, 1]} : vector<2x384xf32> to vector<2x32xf32>
    %261 = arith.addf %259, %260 : vector<2x32xf32>
    %262 = arith.negf %261 : vector<2x32xf32>
    %263 = math.exp %262 : vector<2x32xf32>
    %cst_72 = arith.constant 1.000000e+00 : f32
    %264 = vector.broadcast %cst_72 : f32 to vector<2x32xf32>
    %265 = arith.addf %264, %263 : vector<2x32xf32>
    %266 = arith.divf %264, %265 : vector<2x32xf32>
    %267 = vector.extract_strided_slice %258 {offsets = [0, 128], sizes = [2, 32], strides = [1, 1]} : vector<2x384xf32> to vector<2x32xf32>
    %268 = vector.extract_strided_slice %255 {offsets = [0, 128], sizes = [2, 32], strides = [1, 1]} : vector<2x384xf32> to vector<2x32xf32>
    %269 = arith.addf %267, %268 : vector<2x32xf32>
    %270 = arith.negf %269 : vector<2x32xf32>
    %271 = math.exp %270 : vector<2x32xf32>
    %cst_73 = arith.constant 1.000000e+00 : f32
    %272 = vector.broadcast %cst_73 : f32 to vector<2x32xf32>
    %273 = arith.addf %272, %271 : vector<2x32xf32>
    %274 = arith.divf %272, %273 : vector<2x32xf32>
    %275 = vector.extract_strided_slice %258 {offsets = [0, 256], sizes = [2, 32], strides = [1, 1]} : vector<2x384xf32> to vector<2x32xf32>
    %276 = vector.extract_strided_slice %255 {offsets = [0, 256], sizes = [2, 32], strides = [1, 1]} : vector<2x384xf32> to vector<2x32xf32>
    %277 = arith.mulf %266, %276 : vector<2x32xf32>
    %278 = arith.addf %275, %277 : vector<2x32xf32>
    %279 = math.tanh %278 : vector<2x32xf32>
    %cst_74 = arith.constant 1.000000e+00 : f32
    %280 = vector.broadcast %cst_74 : f32 to vector<2x32xf32>
    %281 = arith.subf %280, %274 : vector<2x32xf32>
    %282 = arith.mulf %281, %279 : vector<2x32xf32>
    %283 = arith.mulf %274, %249 : vector<2x32xf32>
    %284 = arith.addf %282, %283 : vector<2x32xf32>
    %c0_75 = arith.constant 0 : index
    %c7_76 = arith.constant 7 : index
    %c0_77 = arith.constant 0 : index
    %285 = vector.load %arg8[%c0_75, %c7_76, %c0_77] : memref<2x8x32xf32, #tpu.memory_space<vmem>>, vector<2x1x32xf32>
    %286 = vector.shape_cast %285 : vector<2x1x32xf32> to vector<2x32xf32>
    %287 = vector.shape_cast %284 : vector<2x32xf32> to vector<2x1x32xf32>
    tpu.vector_store %arg8[%c0_75, %c7_76, %c0_77], %287 {strides = array<i32>} : memref<2x8x32xf32, #tpu.memory_space<vmem>>, vector<2x1x32xf32>,
    %c0_78 = arith.constant 0 : index
    %c0_79 = arith.constant 0 : index
    %288 = vector.load %arg7[%c0_78, %c0_79] : memref<2x32xf32, #tpu.memory_space<vmem>>, vector<2x32xf32>
    tpu.vector_store %arg7[%c0_78, %c0_79], %284 {strides = array<i32>} : memref<2x32xf32, #tpu.memory_space<vmem>>, vector<2x32xf32>,
    %c0_80 = arith.constant 0 : index
    %c0_81 = arith.constant 0 : index
    %c0_82 = arith.constant 0 : index
    %289 = vector.load %arg8[%c0_80, %c0_81, %c0_82] : memref<2x8x32xf32, #tpu.memory_space<vmem>>, vector<2x8x32xf32>
    %290 = arith.truncf %289 : vector<2x8x32xf32> to vector<2x8x32xbf16>
    %c0_83 = arith.constant 0 : index
    %c0_84 = arith.constant 0 : index
    %c0_85 = arith.constant 0 : index
    %291 = vector.load %arg5[%c0_83, %c0_84, %c0_85] : memref<2x8x32xbf16, #tpu.memory_space<vmem>>, vector<2x8x32xbf16>
    tpu.vector_store %arg5[%c0_83, %c0_84, %c0_85], %290 {strides = array<i32>} : memref<2x8x32xbf16, #tpu.memory_space<vmem>>, vector<2x8x32xbf16>,
    %c0_86 = arith.constant 0 : index
    %c0_87 = arith.constant 0 : index
    %292 = vector.load %arg6[%c0_86, %c0_87] : memref<2x32xf32, #tpu.memory_space<vmem>>, vector<2x32xf32>
    tpu.vector_store %arg6[%c0_86, %c0_87], %284 {strides = array<i32>} : memref<2x32xf32, #tpu.memory_space<vmem>>, vector<2x32xf32>,
    return
  }
  func.func @transform_0(%arg0: i32, %arg1: i32) -> (i32, i32, i32) {
    %c0_i32 = arith.constant 0 : i32
    %c0_i32_0 = arith.constant 0 : i32
    return %arg1, %arg0, %c0_i32 : i32, i32, i32
  }
  func.func @transform_1(%arg0: i32, %arg1: i32) -> (i32, i32) {
    %c0_i32 = arith.constant 0 : i32
    %c0_i32_0 = arith.constant 0 : i32
    %c0_i32_1 = arith.constant 0 : i32
    return %c0_i32, %c0_i32_0 : i32, i32
  }
  func.func @transform_2(%arg0: i32, %arg1: i32) -> (i32, i32) {
    %c0_i32 = arith.constant 0 : i32
    %c0_i32_0 = arith.constant 0 : i32
    %c0_i32_1 = arith.constant 0 : i32
    return %c0_i32, %c0_i32_0 : i32, i32
  }
  func.func @transform_3(%arg0: i32, %arg1: i32) -> (i32, i32, i32) {
    %c0_i32 = arith.constant 0 : i32
    %c0_i32_0 = arith.constant 0 : i32
    return %arg0, %arg1, %c0_i32 : i32, i32, i32
  }
  func.func @transform_4(%arg0: i32, %arg1: i32) -> (i32, i32) {
    %c0_i32 = arith.constant 0 : i32
    %c0_i32_0 = arith.constant 0 : i32
    return %arg0, %c0_i32 : i32, i32
  }
}

module attributes {stable_mosaic.version = 11 : i64} {
  func.func @vocab_proj_logsoftmax_kernel(%arg0: i32, %arg1: memref<32x32xbf16, #tpu.memory_space<vmem>>, %arg2: memref<32x128xbf16, #tpu.memory_space<vmem>>, %arg3: memref<1x128xf32, #tpu.memory_space<vmem>>, %arg4: memref<32x128xf32, #tpu.memory_space<vmem>>) attributes {dimension_semantics = [#tpu.dimension_semantics<parallel>], iteration_bounds = array<i64: 1>, scalar_prefetch = 0 : i64, scratch_operands = 0 : i64, tpu.core_type = #tpu.core_type<tc>, window_params = [{transform_indices = @transform_0, window_bounds = array<i64: 32, 32>}, {pipeline_mode = #tpu.pipeline_mode<synchronous>, transform_indices = @transform_1, window_bounds = array<i64: 32, 128>}, {pipeline_mode = #tpu.pipeline_mode<synchronous>, transform_indices = @transform_2, window_bounds = array<i64: 1, 128>}, {transform_indices = @transform_3, window_bounds = array<i64: 32, 128>}]} {
    %c0 = arith.constant 0 : index
    %c0_0 = arith.constant 0 : index
    %0 = vector.load %arg1[%c0, %c0_0] : memref<32x32xbf16, #tpu.memory_space<vmem>>, vector<32x32xbf16>
    %c0_1 = arith.constant 0 : index
    %c0_2 = arith.constant 0 : index
    %1 = vector.load %arg2[%c0_1, %c0_2] : memref<32x128xbf16, #tpu.memory_space<vmem>>, vector<32x128xbf16>
    %cst = arith.constant dense<0.000000e+00> : vector<32x128xf32>
    %2 = tpu.matmul %0, %1, %cst {dimension_numbers = #tpu.dot_dimension_numbers<[1], [0], [0], [1], [0, 0, 1, 1], [], []>} : vector<32x32xbf16>, vector<32x128xbf16>, vector<32x128xf32> -> vector<32x128xf32>
    %c0_3 = arith.constant 0 : index
    %c0_4 = arith.constant 0 : index
    %3 = vector.load %arg3[%c0_3, %c0_4] : memref<1x128xf32, #tpu.memory_space<vmem>>, vector<1x128xf32>
    %4 = vector.broadcast %3 : vector<1x128xf32> to vector<32x128xf32>
    %5 = arith.addf %2, %4 : vector<32x128xf32>
    %cst_5 = arith.constant dense<0xFF800000> : vector<32xf32>
    %6 = vector.multi_reduction <maximumf>, %5, %cst_5 [1] : vector<32x128xf32> to vector<32xf32>
    %7 = vector.shape_cast %6 : vector<32xf32> to vector<32x1xf32>
    %8 = vector.broadcast %7 : vector<32x1xf32> to vector<32x128xf32>
    %9 = arith.subf %5, %8 : vector<32x128xf32>
    %10 = math.exp %9 : vector<32x128xf32>
    %cst_6 = arith.constant dense<0.000000e+00> : vector<32xf32>
    %11 = vector.multi_reduction <add>, %10, %cst_6 [1] : vector<32x128xf32> to vector<32xf32>
    %12 = vector.shape_cast %11 : vector<32xf32> to vector<32x1xf32>
    %13 = math.log %12 : vector<32x1xf32>
    %14 = arith.addf %13, %7 : vector<32x1xf32>
    %15 = vector.broadcast %14 : vector<32x1xf32> to vector<32x128xf32>
    %16 = arith.subf %5, %15 : vector<32x128xf32>
    %c0_7 = arith.constant 0 : index
    %c0_8 = arith.constant 0 : index
    %17 = vector.load %arg4[%c0_7, %c0_8] : memref<32x128xf32, #tpu.memory_space<vmem>>, vector<32x128xf32>
    tpu.vector_store %arg4[%c0_7, %c0_8], %16 {strides = array<i32>} : memref<32x128xf32, #tpu.memory_space<vmem>>, vector<32x128xf32>,
    return
  }
  func.func @transform_0(%arg0: i32) -> (i32, i32) {
    %c0_i32 = arith.constant 0 : i32
    %c0_i32_0 = arith.constant 0 : i32
    return %arg0, %c0_i32 : i32, i32
  }
  func.func @transform_1(%arg0: i32) -> (i32, i32) {
    %c0_i32 = arith.constant 0 : i32
    %c0_i32_0 = arith.constant 0 : i32
    %c0_i32_1 = arith.constant 0 : i32
    return %c0_i32, %c0_i32_0 : i32, i32
  }
  func.func @transform_2(%arg0: i32) -> (i32, i32) {
    %c0_i32 = arith.constant 0 : i32
    %c0_i32_0 = arith.constant 0 : i32
    %c0_i32_1 = arith.constant 0 : i32
    return %c0_i32, %c0_i32_0 : i32, i32
  }
  func.func @transform_3(%arg0: i32) -> (i32, i32) {
    %c0_i32 = arith.constant 0 : i32
    %c0_i32_0 = arith.constant 0 : i32
    return %arg0, %c0_i32 : i32, i32
  }
}

module attributes {stable_mosaic.version = 11 : i64} {
  func.func @decoder_gru_attn_kernel(%arg0: i32, %arg1: i32, %arg2: memref<8x2x384xbf16, #tpu.memory_space<vmem>>, %arg3: memref<2x32xf32, #tpu.memory_space<vmem>>, %arg4: memref<2x16x32xbf16, #tpu.memory_space<vmem>>, %arg5: memref<2x32x16xbf16, #tpu.memory_space<vmem>>, %arg6: memref<32x384xbf16, #tpu.memory_space<vmem>>, %arg7: memref<1x384xf32, #tpu.memory_space<vmem>>, %arg8: memref<64x32xbf16, #tpu.memory_space<vmem>>, %arg9: memref<1x32xf32, #tpu.memory_space<vmem>>, %arg10: memref<2x8x32xbf16, #tpu.memory_space<vmem>>, %arg11: memref<2x8x16xf32, #tpu.memory_space<vmem>>, %arg12: memref<2x32xf32, #tpu.memory_space<vmem>>, %arg13: memref<2x8x32xf32, #tpu.memory_space<vmem>>, %arg14: memref<2x8x16xf32, #tpu.memory_space<vmem>>) attributes {dimension_semantics = [#tpu.dimension_semantics<parallel>, #tpu.dimension_semantics<arbitrary>], iteration_bounds = array<i64: 1, 2>, scalar_prefetch = 0 : i64, scratch_operands = 3 : i64, tpu.core_type = #tpu.core_type<tc>, window_params = [{transform_indices = @transform_0, window_bounds = array<i64: 8, 2, 384>}, {transform_indices = @transform_1, window_bounds = array<i64: 2, 32>}, {transform_indices = @transform_2, window_bounds = array<i64: 2, 16, 32>}, {transform_indices = @transform_3, window_bounds = array<i64: 2, 32, 16>}, {pipeline_mode = #tpu.pipeline_mode<synchronous>, transform_indices = @transform_4, window_bounds = array<i64: 32, 384>}, {pipeline_mode = #tpu.pipeline_mode<synchronous>, transform_indices = @transform_5, window_bounds = array<i64: 1, 384>}, {pipeline_mode = #tpu.pipeline_mode<synchronous>, transform_indices = @transform_6, window_bounds = array<i64: 64, 32>}, {pipeline_mode = #tpu.pipeline_mode<synchronous>, transform_indices = @transform_7, window_bounds = array<i64: 1, 32>}, {transform_indices = @transform_8, window_bounds = array<i64: 2, 8, 32>}, {transform_indices = @transform_9, window_bounds = array<i64: 2, 8, 16>}]} {
    %c0_i32 = arith.constant 0 : i32
    %0 = arith.cmpi eq, %arg1, %c0_i32 : i32
    %1 = arith.extui %0 : i1 to i32
    %c0_i32_0 = arith.constant 0 : i32
    %2 = arith.cmpi ne, %1, %c0_i32_0 : i32
    scf.if %2 {
      %c0_166 = arith.constant 0 : index
      %c0_167 = arith.constant 0 : index
      %492 = vector.load %arg3[%c0_166, %c0_167] : memref<2x32xf32, #tpu.memory_space<vmem>>, vector<2x32xf32>
      %c0_168 = arith.constant 0 : index
      %c0_169 = arith.constant 0 : index
      %493 = vector.load %arg12[%c0_168, %c0_169] : memref<2x32xf32, #tpu.memory_space<vmem>>, vector<2x32xf32>
      tpu.vector_store %arg12[%c0_168, %c0_169], %492 {strides = array<i32>} : memref<2x32xf32, #tpu.memory_space<vmem>>, vector<2x32xf32>,
    } else {
    }
    %c0 = arith.constant 0 : index
    %c0_1 = arith.constant 0 : index
    %3 = vector.load %arg6[%c0, %c0_1] : memref<32x384xbf16, #tpu.memory_space<vmem>>, vector<32x384xbf16>
    %c0_2 = arith.constant 0 : index
    %c0_3 = arith.constant 0 : index
    %4 = vector.load %arg7[%c0_2, %c0_3] : memref<1x384xf32, #tpu.memory_space<vmem>>, vector<1x384xf32>
    %5 = vector.shape_cast %4 : vector<1x384xf32> to vector<1x384xf32>
    %6 = vector.broadcast %5 : vector<1x384xf32> to vector<2x384xf32>
    %c0_4 = arith.constant 0 : index
    %c0_5 = arith.constant 0 : index
    %7 = vector.load %arg8[%c0_4, %c0_5] : memref<64x32xbf16, #tpu.memory_space<vmem>>, vector<64x32xbf16>
    %c0_6 = arith.constant 0 : index
    %c0_7 = arith.constant 0 : index
    %8 = vector.load %arg9[%c0_6, %c0_7] : memref<1x32xf32, #tpu.memory_space<vmem>>, vector<1x32xf32>
    %9 = vector.shape_cast %8 : vector<1x32xf32> to vector<1x32xf32>
    %10 = vector.broadcast %9 : vector<1x32xf32> to vector<2x32xf32>
    %c0_8 = arith.constant 0 : index
    %c0_9 = arith.constant 0 : index
    %c0_10 = arith.constant 0 : index
    %11 = vector.load %arg4[%c0_8, %c0_9, %c0_10] : memref<2x16x32xbf16, #tpu.memory_space<vmem>>, vector<2x16x32xbf16>
    %c0_11 = arith.constant 0 : index
    %c0_12 = arith.constant 0 : index
    %c0_13 = arith.constant 0 : index
    %12 = vector.load %arg5[%c0_11, %c0_12, %c0_13] : memref<2x32x16xbf16, #tpu.memory_space<vmem>>, vector<2x32x16xbf16>
    %c0_14 = arith.constant 0 : index
    %c0_15 = arith.constant 0 : index
    %13 = vector.load %arg12[%c0_14, %c0_15] : memref<2x32xf32, #tpu.memory_space<vmem>>, vector<2x32xf32>
    %14 = arith.truncf %13 : vector<2x32xf32> to vector<2x32xbf16>
    %cst = arith.constant dense<0.000000e+00> : vector<2x384xf32>
    %15 = tpu.matmul %14, %3, %cst {dimension_numbers = #tpu.dot_dimension_numbers<[1], [0], [0], [1], [0, 0, 1, 1], [], []>} : vector<2x32xbf16>, vector<32x384xbf16>, vector<2x384xf32> -> vector<2x384xf32>
    %16 = arith.addf %15, %6 : vector<2x384xf32>
    %c0_16 = arith.constant 0 : index
    %c0_17 = arith.constant 0 : index
    %c0_18 = arith.constant 0 : index
    %17 = vector.load %arg2[%c0_16, %c0_17, %c0_18] : memref<8x2x384xbf16, #tpu.memory_space<vmem>>, vector<1x2x384xbf16>
    %18 = vector.shape_cast %17 : vector<1x2x384xbf16> to vector<2x384xbf16>
    %19 = arith.extf %18 : vector<2x384xbf16> to vector<2x384xf32>
    %20 = vector.extract_strided_slice %19 {offsets = [0, 0], sizes = [2, 32], strides = [1, 1]} : vector<2x384xf32> to vector<2x32xf32>
    %21 = vector.extract_strided_slice %16 {offsets = [0, 0], sizes = [2, 32], strides = [1, 1]} : vector<2x384xf32> to vector<2x32xf32>
    %22 = arith.addf %20, %21 : vector<2x32xf32>
    %23 = arith.negf %22 : vector<2x32xf32>
    %24 = math.exp %23 : vector<2x32xf32>
    %cst_19 = arith.constant 1.000000e+00 : f32
    %25 = vector.broadcast %cst_19 : f32 to vector<2x32xf32>
    %26 = arith.addf %25, %24 : vector<2x32xf32>
    %27 = arith.divf %25, %26 : vector<2x32xf32>
    %28 = vector.extract_strided_slice %19 {offsets = [0, 128], sizes = [2, 32], strides = [1, 1]} : vector<2x384xf32> to vector<2x32xf32>
    %29 = vector.extract_strided_slice %16 {offsets = [0, 128], sizes = [2, 32], strides = [1, 1]} : vector<2x384xf32> to vector<2x32xf32>
    %30 = arith.addf %28, %29 : vector<2x32xf32>
    %31 = arith.negf %30 : vector<2x32xf32>
    %32 = math.exp %31 : vector<2x32xf32>
    %cst_20 = arith.constant 1.000000e+00 : f32
    %33 = vector.broadcast %cst_20 : f32 to vector<2x32xf32>
    %34 = arith.addf %33, %32 : vector<2x32xf32>
    %35 = arith.divf %33, %34 : vector<2x32xf32>
    %36 = vector.extract_strided_slice %19 {offsets = [0, 256], sizes = [2, 32], strides = [1, 1]} : vector<2x384xf32> to vector<2x32xf32>
    %37 = vector.extract_strided_slice %16 {offsets = [0, 256], sizes = [2, 32], strides = [1, 1]} : vector<2x384xf32> to vector<2x32xf32>
    %38 = arith.mulf %27, %37 : vector<2x32xf32>
    %39 = arith.addf %36, %38 : vector<2x32xf32>
    %40 = math.tanh %39 : vector<2x32xf32>
    %cst_21 = arith.constant 1.000000e+00 : f32
    %41 = vector.broadcast %cst_21 : f32 to vector<2x32xf32>
    %42 = arith.subf %41, %35 : vector<2x32xf32>
    %43 = arith.mulf %42, %40 : vector<2x32xf32>
    %44 = arith.mulf %35, %13 : vector<2x32xf32>
    %45 = arith.addf %43, %44 : vector<2x32xf32>
    %46 = arith.truncf %45 : vector<2x32xf32> to vector<2x32xbf16>
    %47 = vector.shape_cast %46 : vector<2x32xbf16> to vector<2x1x32xbf16>
    "tpu.trace_start"() <{level = 10 : i32, message = "bqh,bhs->bqs"}> : () -> ()
    %cst_22 = arith.constant dense<0.000000e+00> : vector<2x1x16xf32>
    %48 = tpu.matmul %47, %12, %cst_22 {dimension_numbers = #tpu.dot_dimension_numbers<[2], [1], [1], [2], [0, 0, 0, 1, 1, 2], [0], [0]>} : vector<2x1x32xbf16>, vector<2x32x16xbf16>, vector<2x1x16xf32> -> vector<2x1x16xf32>
    "tpu.trace_stop"() : () -> ()
    %cst_23 = arith.constant dense<0xFF800000> : vector<2x1xf32>
    %49 = vector.multi_reduction <maximumf>, %48, %cst_23 [2] : vector<2x1x16xf32> to vector<2x1xf32>
    %50 = vector.shape_cast %49 : vector<2x1xf32> to vector<2x1x1xf32>
    %51 = vector.broadcast %50 : vector<2x1x1xf32> to vector<2x1x16xf32>
    %52 = arith.subf %48, %51 : vector<2x1x16xf32>
    %53 = math.exp %52 : vector<2x1x16xf32>
    %cst_24 = arith.constant dense<0.000000e+00> : vector<2x1xf32>
    %54 = vector.multi_reduction <add>, %53, %cst_24 [2] : vector<2x1x16xf32> to vector<2x1xf32>
    %55 = vector.shape_cast %54 : vector<2x1xf32> to vector<2x1x1xf32>
    %56 = vector.broadcast %55 : vector<2x1x1xf32> to vector<2x1x16xf32>
    %57 = arith.divf %53, %56 : vector<2x1x16xf32>
    %58 = arith.truncf %57 : vector<2x1x16xf32> to vector<2x1x16xbf16>
    "tpu.trace_start"() <{level = 10 : i32, message = "bqs,bsh->bqh"}> : () -> ()
    %cst_25 = arith.constant dense<0.000000e+00> : vector<2x1x32xf32>
    %59 = tpu.matmul %58, %11, %cst_25 {dimension_numbers = #tpu.dot_dimension_numbers<[2], [1], [1], [2], [0, 0, 0, 1, 1, 2], [0], [0]>} : vector<2x1x16xbf16>, vector<2x16x32xbf16>, vector<2x1x32xf32> -> vector<2x1x32xf32>
    "tpu.trace_stop"() : () -> ()
    %60 = vector.shape_cast %59 : vector<2x1x32xf32> to vector<2x32xf32>
    %61 = tpu.concatenate %45, %60 in 1 : vector<2x32xf32>, vector<2x32xf32> -> vector<2x64xf32>
    %62 = arith.truncf %61 : vector<2x64xf32> to vector<2x64xbf16>
    %cst_26 = arith.constant dense<0.000000e+00> : vector<2x32xf32>
    %63 = tpu.matmul %62, %7, %cst_26 {dimension_numbers = #tpu.dot_dimension_numbers<[1], [0], [0], [1], [0, 0, 1, 1], [], []>} : vector<2x64xbf16>, vector<64x32xbf16>, vector<2x32xf32> -> vector<2x32xf32>
    %64 = arith.addf %63, %10 : vector<2x32xf32>
    %65 = math.tanh %64 : vector<2x32xf32>
    %c0_27 = arith.constant 0 : index
    %c0_28 = arith.constant 0 : index
    %c0_29 = arith.constant 0 : index
    %66 = vector.load %arg13[%c0_27, %c0_28, %c0_29] : memref<2x8x32xf32, #tpu.memory_space<vmem>>, vector<2x1x32xf32>
    %67 = vector.shape_cast %66 : vector<2x1x32xf32> to vector<2x32xf32>
    %68 = vector.shape_cast %65 : vector<2x32xf32> to vector<2x1x32xf32>
    tpu.vector_store %arg13[%c0_27, %c0_28, %c0_29], %68 {strides = array<i32>} : memref<2x8x32xf32, #tpu.memory_space<vmem>>, vector<2x1x32xf32>,
    %69 = vector.shape_cast %57 : vector<2x1x16xf32> to vector<2x16xf32>
    %c0_30 = arith.constant 0 : index
    %c0_31 = arith.constant 0 : index
    %c0_32 = arith.constant 0 : index
    %70 = vector.load %arg14[%c0_30, %c0_31, %c0_32] : memref<2x8x16xf32, #tpu.memory_space<vmem>>, vector<2x1x16xf32>
    %71 = vector.shape_cast %70 : vector<2x1x16xf32> to vector<2x16xf32>
    %72 = vector.shape_cast %69 : vector<2x16xf32> to vector<2x1x16xf32>
    tpu.vector_store %arg14[%c0_30, %c0_31, %c0_32], %72 {strides = array<i32>} : memref<2x8x16xf32, #tpu.memory_space<vmem>>, vector<2x1x16xf32>,
    %73 = arith.truncf %45 : vector<2x32xf32> to vector<2x32xbf16>
    %cst_33 = arith.constant dense<0.000000e+00> : vector<2x384xf32>
    %74 = tpu.matmul %73, %3, %cst_33 {dimension_numbers = #tpu.dot_dimension_numbers<[1], [0], [0], [1], [0, 0, 1, 1], [], []>} : vector<2x32xbf16>, vector<32x384xbf16>, vector<2x384xf32> -> vector<2x384xf32>
    %75 = arith.addf %74, %6 : vector<2x384xf32>
    %c1 = arith.constant 1 : index
    %c0_34 = arith.constant 0 : index
    %c0_35 = arith.constant 0 : index
    %76 = vector.load %arg2[%c1, %c0_34, %c0_35] : memref<8x2x384xbf16, #tpu.memory_space<vmem>>, vector<1x2x384xbf16>
    %77 = vector.shape_cast %76 : vector<1x2x384xbf16> to vector<2x384xbf16>
    %78 = arith.extf %77 : vector<2x384xbf16> to vector<2x384xf32>
    %79 = vector.extract_strided_slice %78 {offsets = [0, 0], sizes = [2, 32], strides = [1, 1]} : vector<2x384xf32> to vector<2x32xf32>
    %80 = vector.extract_strided_slice %75 {offsets = [0, 0], sizes = [2, 32], strides = [1, 1]} : vector<2x384xf32> to vector<2x32xf32>
    %81 = arith.addf %79, %80 : vector<2x32xf32>
    %82 = arith.negf %81 : vector<2x32xf32>
    %83 = math.exp %82 : vector<2x32xf32>
    %cst_36 = arith.constant 1.000000e+00 : f32
    %84 = vector.broadcast %cst_36 : f32 to vector<2x32xf32>
    %85 = arith.addf %84, %83 : vector<2x32xf32>
    %86 = arith.divf %84, %85 : vector<2x32xf32>
    %87 = vector.extract_strided_slice %78 {offsets = [0, 128], sizes = [2, 32], strides = [1, 1]} : vector<2x384xf32> to vector<2x32xf32>
    %88 = vector.extract_strided_slice %75 {offsets = [0, 128], sizes = [2, 32], strides = [1, 1]} : vector<2x384xf32> to vector<2x32xf32>
    %89 = arith.addf %87, %88 : vector<2x32xf32>
    %90 = arith.negf %89 : vector<2x32xf32>
    %91 = math.exp %90 : vector<2x32xf32>
    %cst_37 = arith.constant 1.000000e+00 : f32
    %92 = vector.broadcast %cst_37 : f32 to vector<2x32xf32>
    %93 = arith.addf %92, %91 : vector<2x32xf32>
    %94 = arith.divf %92, %93 : vector<2x32xf32>
    %95 = vector.extract_strided_slice %78 {offsets = [0, 256], sizes = [2, 32], strides = [1, 1]} : vector<2x384xf32> to vector<2x32xf32>
    %96 = vector.extract_strided_slice %75 {offsets = [0, 256], sizes = [2, 32], strides = [1, 1]} : vector<2x384xf32> to vector<2x32xf32>
    %97 = arith.mulf %86, %96 : vector<2x32xf32>
    %98 = arith.addf %95, %97 : vector<2x32xf32>
    %99 = math.tanh %98 : vector<2x32xf32>
    %cst_38 = arith.constant 1.000000e+00 : f32
    %100 = vector.broadcast %cst_38 : f32 to vector<2x32xf32>
    %101 = arith.subf %100, %94 : vector<2x32xf32>
    %102 = arith.mulf %101, %99 : vector<2x32xf32>
    %103 = arith.mulf %94, %45 : vector<2x32xf32>
    %104 = arith.addf %102, %103 : vector<2x32xf32>
    %105 = arith.truncf %104 : vector<2x32xf32> to vector<2x32xbf16>
    %106 = vector.shape_cast %105 : vector<2x32xbf16> to vector<2x1x32xbf16>
    "tpu.trace_start"() <{level = 10 : i32, message = "bqh,bhs->bqs"}> : () -> ()
    %cst_39 = arith.constant dense<0.000000e+00> : vector<2x1x16xf32>
    %107 = tpu.matmul %106, %12, %cst_39 {dimension_numbers = #tpu.dot_dimension_numbers<[2], [1], [1], [2], [0, 0, 0, 1, 1, 2], [0], [0]>} : vector<2x1x32xbf16>, vector<2x32x16xbf16>, vector<2x1x16xf32> -> vector<2x1x16xf32>
    "tpu.trace_stop"() : () -> ()
    %cst_40 = arith.constant dense<0xFF800000> : vector<2x1xf32>
    %108 = vector.multi_reduction <maximumf>, %107, %cst_40 [2] : vector<2x1x16xf32> to vector<2x1xf32>
    %109 = vector.shape_cast %108 : vector<2x1xf32> to vector<2x1x1xf32>
    %110 = vector.broadcast %109 : vector<2x1x1xf32> to vector<2x1x16xf32>
    %111 = arith.subf %107, %110 : vector<2x1x16xf32>
    %112 = math.exp %111 : vector<2x1x16xf32>
    %cst_41 = arith.constant dense<0.000000e+00> : vector<2x1xf32>
    %113 = vector.multi_reduction <add>, %112, %cst_41 [2] : vector<2x1x16xf32> to vector<2x1xf32>
    %114 = vector.shape_cast %113 : vector<2x1xf32> to vector<2x1x1xf32>
    %115 = vector.broadcast %114 : vector<2x1x1xf32> to vector<2x1x16xf32>
    %116 = arith.divf %112, %115 : vector<2x1x16xf32>
    %117 = arith.truncf %116 : vector<2x1x16xf32> to vector<2x1x16xbf16>
    "tpu.trace_start"() <{level = 10 : i32, message = "bqs,bsh->bqh"}> : () -> ()
    %cst_42 = arith.constant dense<0.000000e+00> : vector<2x1x32xf32>
    %118 = tpu.matmul %117, %11, %cst_42 {dimension_numbers = #tpu.dot_dimension_numbers<[2], [1], [1], [2], [0, 0, 0, 1, 1, 2], [0], [0]>} : vector<2x1x16xbf16>, vector<2x16x32xbf16>, vector<2x1x32xf32> -> vector<2x1x32xf32>
    "tpu.trace_stop"() : () -> ()
    %119 = vector.shape_cast %118 : vector<2x1x32xf32> to vector<2x32xf32>
    %120 = tpu.concatenate %104, %119 in 1 : vector<2x32xf32>, vector<2x32xf32> -> vector<2x64xf32>
    %121 = arith.truncf %120 : vector<2x64xf32> to vector<2x64xbf16>
    %cst_43 = arith.constant dense<0.000000e+00> : vector<2x32xf32>
    %122 = tpu.matmul %121, %7, %cst_43 {dimension_numbers = #tpu.dot_dimension_numbers<[1], [0], [0], [1], [0, 0, 1, 1], [], []>} : vector<2x64xbf16>, vector<64x32xbf16>, vector<2x32xf32> -> vector<2x32xf32>
    %123 = arith.addf %122, %10 : vector<2x32xf32>
    %124 = math.tanh %123 : vector<2x32xf32>
    %c0_44 = arith.constant 0 : index
    %c1_45 = arith.constant 1 : index
    %c0_46 = arith.constant 0 : index
    %125 = vector.load %arg13[%c0_44, %c1_45, %c0_46] : memref<2x8x32xf32, #tpu.memory_space<vmem>>, vector<2x1x32xf32>
    %126 = vector.shape_cast %125 : vector<2x1x32xf32> to vector<2x32xf32>
    %127 = vector.shape_cast %124 : vector<2x32xf32> to vector<2x1x32xf32>
    tpu.vector_store %arg13[%c0_44, %c1_45, %c0_46], %127 {strides = array<i32>} : memref<2x8x32xf32, #tpu.memory_space<vmem>>, vector<2x1x32xf32>,
    %128 = vector.shape_cast %116 : vector<2x1x16xf32> to vector<2x16xf32>
    %c0_47 = arith.constant 0 : index
    %c1_48 = arith.constant 1 : index
    %c0_49 = arith.constant 0 : index
    %129 = vector.load %arg14[%c0_47, %c1_48, %c0_49] : memref<2x8x16xf32, #tpu.memory_space<vmem>>, vector<2x1x16xf32>
    %130 = vector.shape_cast %129 : vector<2x1x16xf32> to vector<2x16xf32>
    %131 = vector.shape_cast %128 : vector<2x16xf32> to vector<2x1x16xf32>
    tpu.vector_store %arg14[%c0_47, %c1_48, %c0_49], %131 {strides = array<i32>} : memref<2x8x16xf32, #tpu.memory_space<vmem>>, vector<2x1x16xf32>,
    %132 = arith.truncf %104 : vector<2x32xf32> to vector<2x32xbf16>
    %cst_50 = arith.constant dense<0.000000e+00> : vector<2x384xf32>
    %133 = tpu.matmul %132, %3, %cst_50 {dimension_numbers = #tpu.dot_dimension_numbers<[1], [0], [0], [1], [0, 0, 1, 1], [], []>} : vector<2x32xbf16>, vector<32x384xbf16>, vector<2x384xf32> -> vector<2x384xf32>
    %134 = arith.addf %133, %6 : vector<2x384xf32>
    %c2 = arith.constant 2 : index
    %c0_51 = arith.constant 0 : index
    %c0_52 = arith.constant 0 : index
    %135 = vector.load %arg2[%c2, %c0_51, %c0_52] : memref<8x2x384xbf16, #tpu.memory_space<vmem>>, vector<1x2x384xbf16>
    %136 = vector.shape_cast %135 : vector<1x2x384xbf16> to vector<2x384xbf16>
    %137 = arith.extf %136 : vector<2x384xbf16> to vector<2x384xf32>
    %138 = vector.extract_strided_slice %137 {offsets = [0, 0], sizes = [2, 32], strides = [1, 1]} : vector<2x384xf32> to vector<2x32xf32>
    %139 = vector.extract_strided_slice %134 {offsets = [0, 0], sizes = [2, 32], strides = [1, 1]} : vector<2x384xf32> to vector<2x32xf32>
    %140 = arith.addf %138, %139 : vector<2x32xf32>
    %141 = arith.negf %140 : vector<2x32xf32>
    %142 = math.exp %141 : vector<2x32xf32>
    %cst_53 = arith.constant 1.000000e+00 : f32
    %143 = vector.broadcast %cst_53 : f32 to vector<2x32xf32>
    %144 = arith.addf %143, %142 : vector<2x32xf32>
    %145 = arith.divf %143, %144 : vector<2x32xf32>
    %146 = vector.extract_strided_slice %137 {offsets = [0, 128], sizes = [2, 32], strides = [1, 1]} : vector<2x384xf32> to vector<2x32xf32>
    %147 = vector.extract_strided_slice %134 {offsets = [0, 128], sizes = [2, 32], strides = [1, 1]} : vector<2x384xf32> to vector<2x32xf32>
    %148 = arith.addf %146, %147 : vector<2x32xf32>
    %149 = arith.negf %148 : vector<2x32xf32>
    %150 = math.exp %149 : vector<2x32xf32>
    %cst_54 = arith.constant 1.000000e+00 : f32
    %151 = vector.broadcast %cst_54 : f32 to vector<2x32xf32>
    %152 = arith.addf %151, %150 : vector<2x32xf32>
    %153 = arith.divf %151, %152 : vector<2x32xf32>
    %154 = vector.extract_strided_slice %137 {offsets = [0, 256], sizes = [2, 32], strides = [1, 1]} : vector<2x384xf32> to vector<2x32xf32>
    %155 = vector.extract_strided_slice %134 {offsets = [0, 256], sizes = [2, 32], strides = [1, 1]} : vector<2x384xf32> to vector<2x32xf32>
    %156 = arith.mulf %145, %155 : vector<2x32xf32>
    %157 = arith.addf %154, %156 : vector<2x32xf32>
    %158 = math.tanh %157 : vector<2x32xf32>
    %cst_55 = arith.constant 1.000000e+00 : f32
    %159 = vector.broadcast %cst_55 : f32 to vector<2x32xf32>
    %160 = arith.subf %159, %153 : vector<2x32xf32>
    %161 = arith.mulf %160, %158 : vector<2x32xf32>
    %162 = arith.mulf %153, %104 : vector<2x32xf32>
    %163 = arith.addf %161, %162 : vector<2x32xf32>
    %164 = arith.truncf %163 : vector<2x32xf32> to vector<2x32xbf16>
    %165 = vector.shape_cast %164 : vector<2x32xbf16> to vector<2x1x32xbf16>
    "tpu.trace_start"() <{level = 10 : i32, message = "bqh,bhs->bqs"}> : () -> ()
    %cst_56 = arith.constant dense<0.000000e+00> : vector<2x1x16xf32>
    %166 = tpu.matmul %165, %12, %cst_56 {dimension_numbers = #tpu.dot_dimension_numbers<[2], [1], [1], [2], [0, 0, 0, 1, 1, 2], [0], [0]>} : vector<2x1x32xbf16>, vector<2x32x16xbf16>, vector<2x1x16xf32> -> vector<2x1x16xf32>
    "tpu.trace_stop"() : () -> ()
    %cst_57 = arith.constant dense<0xFF800000> : vector<2x1xf32>
    %167 = vector.multi_reduction <maximumf>, %166, %cst_57 [2] : vector<2x1x16xf32> to vector<2x1xf32>
    %168 = vector.shape_cast %167 : vector<2x1xf32> to vector<2x1x1xf32>
    %169 = vector.broadcast %168 : vector<2x1x1xf32> to vector<2x1x16xf32>
    %170 = arith.subf %166, %169 : vector<2x1x16xf32>
    %171 = math.exp %170 : vector<2x1x16xf32>
    %cst_58 = arith.constant dense<0.000000e+00> : vector<2x1xf32>
    %172 = vector.multi_reduction <add>, %171, %cst_58 [2] : vector<2x1x16xf32> to vector<2x1xf32>
    %173 = vector.shape_cast %172 : vector<2x1xf32> to vector<2x1x1xf32>
    %174 = vector.broadcast %173 : vector<2x1x1xf32> to vector<2x1x16xf32>
    %175 = arith.divf %171, %174 : vector<2x1x16xf32>
    %176 = arith.truncf %175 : vector<2x1x16xf32> to vector<2x1x16xbf16>
    "tpu.trace_start"() <{level = 10 : i32, message = "bqs,bsh->bqh"}> : () -> ()
    %cst_59 = arith.constant dense<0.000000e+00> : vector<2x1x32xf32>
    %177 = tpu.matmul %176, %11, %cst_59 {dimension_numbers = #tpu.dot_dimension_numbers<[2], [1], [1], [2], [0, 0, 0, 1, 1, 2], [0], [0]>} : vector<2x1x16xbf16>, vector<2x16x32xbf16>, vector<2x1x32xf32> -> vector<2x1x32xf32>
    "tpu.trace_stop"() : () -> ()
    %178 = vector.shape_cast %177 : vector<2x1x32xf32> to vector<2x32xf32>
    %179 = tpu.concatenate %163, %178 in 1 : vector<2x32xf32>, vector<2x32xf32> -> vector<2x64xf32>
    %180 = arith.truncf %179 : vector<2x64xf32> to vector<2x64xbf16>
    %cst_60 = arith.constant dense<0.000000e+00> : vector<2x32xf32>
    %181 = tpu.matmul %180, %7, %cst_60 {dimension_numbers = #tpu.dot_dimension_numbers<[1], [0], [0], [1], [0, 0, 1, 1], [], []>} : vector<2x64xbf16>, vector<64x32xbf16>, vector<2x32xf32> -> vector<2x32xf32>
    %182 = arith.addf %181, %10 : vector<2x32xf32>
    %183 = math.tanh %182 : vector<2x32xf32>
    %c0_61 = arith.constant 0 : index
    %c2_62 = arith.constant 2 : index
    %c0_63 = arith.constant 0 : index
    %184 = vector.load %arg13[%c0_61, %c2_62, %c0_63] : memref<2x8x32xf32, #tpu.memory_space<vmem>>, vector<2x1x32xf32>
    %185 = vector.shape_cast %184 : vector<2x1x32xf32> to vector<2x32xf32>
    %186 = vector.shape_cast %183 : vector<2x32xf32> to vector<2x1x32xf32>
    tpu.vector_store %arg13[%c0_61, %c2_62, %c0_63], %186 {strides = array<i32>} : memref<2x8x32xf32, #tpu.memory_space<vmem>>, vector<2x1x32xf32>,
    %187 = vector.shape_cast %175 : vector<2x1x16xf32> to vector<2x16xf32>
    %c0_64 = arith.constant 0 : index
    %c2_65 = arith.constant 2 : index
    %c0_66 = arith.constant 0 : index
    %188 = vector.load %arg14[%c0_64, %c2_65, %c0_66] : memref<2x8x16xf32, #tpu.memory_space<vmem>>, vector<2x1x16xf32>
    %189 = vector.shape_cast %188 : vector<2x1x16xf32> to vector<2x16xf32>
    %190 = vector.shape_cast %187 : vector<2x16xf32> to vector<2x1x16xf32>
    tpu.vector_store %arg14[%c0_64, %c2_65, %c0_66], %190 {strides = array<i32>} : memref<2x8x16xf32, #tpu.memory_space<vmem>>, vector<2x1x16xf32>,
    %191 = arith.truncf %163 : vector<2x32xf32> to vector<2x32xbf16>
    %cst_67 = arith.constant dense<0.000000e+00> : vector<2x384xf32>
    %192 = tpu.matmul %191, %3, %cst_67 {dimension_numbers = #tpu.dot_dimension_numbers<[1], [0], [0], [1], [0, 0, 1, 1], [], []>} : vector<2x32xbf16>, vector<32x384xbf16>, vector<2x384xf32> -> vector<2x384xf32>
    %193 = arith.addf %192, %6 : vector<2x384xf32>
    %c3 = arith.constant 3 : index
    %c0_68 = arith.constant 0 : index
    %c0_69 = arith.constant 0 : index
    %194 = vector.load %arg2[%c3, %c0_68, %c0_69] : memref<8x2x384xbf16, #tpu.memory_space<vmem>>, vector<1x2x384xbf16>
    %195 = vector.shape_cast %194 : vector<1x2x384xbf16> to vector<2x384xbf16>
    %196 = arith.extf %195 : vector<2x384xbf16> to vector<2x384xf32>
    %197 = vector.extract_strided_slice %196 {offsets = [0, 0], sizes = [2, 32], strides = [1, 1]} : vector<2x384xf32> to vector<2x32xf32>
    %198 = vector.extract_strided_slice %193 {offsets = [0, 0], sizes = [2, 32], strides = [1, 1]} : vector<2x384xf32> to vector<2x32xf32>
    %199 = arith.addf %197, %198 : vector<2x32xf32>
    %200 = arith.negf %199 : vector<2x32xf32>
    %201 = math.exp %200 : vector<2x32xf32>
    %cst_70 = arith.constant 1.000000e+00 : f32
    %202 = vector.broadcast %cst_70 : f32 to vector<2x32xf32>
    %203 = arith.addf %202, %201 : vector<2x32xf32>
    %204 = arith.divf %202, %203 : vector<2x32xf32>
    %205 = vector.extract_strided_slice %196 {offsets = [0, 128], sizes = [2, 32], strides = [1, 1]} : vector<2x384xf32> to vector<2x32xf32>
    %206 = vector.extract_strided_slice %193 {offsets = [0, 128], sizes = [2, 32], strides = [1, 1]} : vector<2x384xf32> to vector<2x32xf32>
    %207 = arith.addf %205, %206 : vector<2x32xf32>
    %208 = arith.negf %207 : vector<2x32xf32>
    %209 = math.exp %208 : vector<2x32xf32>
    %cst_71 = arith.constant 1.000000e+00 : f32
    %210 = vector.broadcast %cst_71 : f32 to vector<2x32xf32>
    %211 = arith.addf %210, %209 : vector<2x32xf32>
    %212 = arith.divf %210, %211 : vector<2x32xf32>
    %213 = vector.extract_strided_slice %196 {offsets = [0, 256], sizes = [2, 32], strides = [1, 1]} : vector<2x384xf32> to vector<2x32xf32>
    %214 = vector.extract_strided_slice %193 {offsets = [0, 256], sizes = [2, 32], strides = [1, 1]} : vector<2x384xf32> to vector<2x32xf32>
    %215 = arith.mulf %204, %214 : vector<2x32xf32>
    %216 = arith.addf %213, %215 : vector<2x32xf32>
    %217 = math.tanh %216 : vector<2x32xf32>
    %cst_72 = arith.constant 1.000000e+00 : f32
    %218 = vector.broadcast %cst_72 : f32 to vector<2x32xf32>
    %219 = arith.subf %218, %212 : vector<2x32xf32>
    %220 = arith.mulf %219, %217 : vector<2x32xf32>
    %221 = arith.mulf %212, %163 : vector<2x32xf32>
    %222 = arith.addf %220, %221 : vector<2x32xf32>
    %223 = arith.truncf %222 : vector<2x32xf32> to vector<2x32xbf16>
    %224 = vector.shape_cast %223 : vector<2x32xbf16> to vector<2x1x32xbf16>
    "tpu.trace_start"() <{level = 10 : i32, message = "bqh,bhs->bqs"}> : () -> ()
    %cst_73 = arith.constant dense<0.000000e+00> : vector<2x1x16xf32>
    %225 = tpu.matmul %224, %12, %cst_73 {dimension_numbers = #tpu.dot_dimension_numbers<[2], [1], [1], [2], [0, 0, 0, 1, 1, 2], [0], [0]>} : vector<2x1x32xbf16>, vector<2x32x16xbf16>, vector<2x1x16xf32> -> vector<2x1x16xf32>
    "tpu.trace_stop"() : () -> ()
    %cst_74 = arith.constant dense<0xFF800000> : vector<2x1xf32>
    %226 = vector.multi_reduction <maximumf>, %225, %cst_74 [2] : vector<2x1x16xf32> to vector<2x1xf32>
    %227 = vector.shape_cast %226 : vector<2x1xf32> to vector<2x1x1xf32>
    %228 = vector.broadcast %227 : vector<2x1x1xf32> to vector<2x1x16xf32>
    %229 = arith.subf %225, %228 : vector<2x1x16xf32>
    %230 = math.exp %229 : vector<2x1x16xf32>
    %cst_75 = arith.constant dense<0.000000e+00> : vector<2x1xf32>
    %231 = vector.multi_reduction <add>, %230, %cst_75 [2] : vector<2x1x16xf32> to vector<2x1xf32>
    %232 = vector.shape_cast %231 : vector<2x1xf32> to vector<2x1x1xf32>
    %233 = vector.broadcast %232 : vector<2x1x1xf32> to vector<2x1x16xf32>
    %234 = arith.divf %230, %233 : vector<2x1x16xf32>
    %235 = arith.truncf %234 : vector<2x1x16xf32> to vector<2x1x16xbf16>
    "tpu.trace_start"() <{level = 10 : i32, message = "bqs,bsh->bqh"}> : () -> ()
    %cst_76 = arith.constant dense<0.000000e+00> : vector<2x1x32xf32>
    %236 = tpu.matmul %235, %11, %cst_76 {dimension_numbers = #tpu.dot_dimension_numbers<[2], [1], [1], [2], [0, 0, 0, 1, 1, 2], [0], [0]>} : vector<2x1x16xbf16>, vector<2x16x32xbf16>, vector<2x1x32xf32> -> vector<2x1x32xf32>
    "tpu.trace_stop"() : () -> ()
    %237 = vector.shape_cast %236 : vector<2x1x32xf32> to vector<2x32xf32>
    %238 = tpu.concatenate %222, %237 in 1 : vector<2x32xf32>, vector<2x32xf32> -> vector<2x64xf32>
    %239 = arith.truncf %238 : vector<2x64xf32> to vector<2x64xbf16>
    %cst_77 = arith.constant dense<0.000000e+00> : vector<2x32xf32>
    %240 = tpu.matmul %239, %7, %cst_77 {dimension_numbers = #tpu.dot_dimension_numbers<[1], [0], [0], [1], [0, 0, 1, 1], [], []>} : vector<2x64xbf16>, vector<64x32xbf16>, vector<2x32xf32> -> vector<2x32xf32>
    %241 = arith.addf %240, %10 : vector<2x32xf32>
    %242 = math.tanh %241 : vector<2x32xf32>
    %c0_78 = arith.constant 0 : index
    %c3_79 = arith.constant 3 : index
    %c0_80 = arith.constant 0 : index
    %243 = vector.load %arg13[%c0_78, %c3_79, %c0_80] : memref<2x8x32xf32, #tpu.memory_space<vmem>>, vector<2x1x32xf32>
    %244 = vector.shape_cast %243 : vector<2x1x32xf32> to vector<2x32xf32>
    %245 = vector.shape_cast %242 : vector<2x32xf32> to vector<2x1x32xf32>
    tpu.vector_store %arg13[%c0_78, %c3_79, %c0_80], %245 {strides = array<i32>} : memref<2x8x32xf32, #tpu.memory_space<vmem>>, vector<2x1x32xf32>,
    %246 = vector.shape_cast %234 : vector<2x1x16xf32> to vector<2x16xf32>
    %c0_81 = arith.constant 0 : index
    %c3_82 = arith.constant 3 : index
    %c0_83 = arith.constant 0 : index
    %247 = vector.load %arg14[%c0_81, %c3_82, %c0_83] : memref<2x8x16xf32, #tpu.memory_space<vmem>>, vector<2x1x16xf32>
    %248 = vector.shape_cast %247 : vector<2x1x16xf32> to vector<2x16xf32>
    %249 = vector.shape_cast %246 : vector<2x16xf32> to vector<2x1x16xf32>
    tpu.vector_store %arg14[%c0_81, %c3_82, %c0_83], %249 {strides = array<i32>} : memref<2x8x16xf32, #tpu.memory_space<vmem>>, vector<2x1x16xf32>,
    %250 = arith.truncf %222 : vector<2x32xf32> to vector<2x32xbf16>
    %cst_84 = arith.constant dense<0.000000e+00> : vector<2x384xf32>
    %251 = tpu.matmul %250, %3, %cst_84 {dimension_numbers = #tpu.dot_dimension_numbers<[1], [0], [0], [1], [0, 0, 1, 1], [], []>} : vector<2x32xbf16>, vector<32x384xbf16>, vector<2x384xf32> -> vector<2x384xf32>
    %252 = arith.addf %251, %6 : vector<2x384xf32>
    %c4 = arith.constant 4 : index
    %c0_85 = arith.constant 0 : index
    %c0_86 = arith.constant 0 : index
    %253 = vector.load %arg2[%c4, %c0_85, %c0_86] : memref<8x2x384xbf16, #tpu.memory_space<vmem>>, vector<1x2x384xbf16>
    %254 = vector.shape_cast %253 : vector<1x2x384xbf16> to vector<2x384xbf16>
    %255 = arith.extf %254 : vector<2x384xbf16> to vector<2x384xf32>
    %256 = vector.extract_strided_slice %255 {offsets = [0, 0], sizes = [2, 32], strides = [1, 1]} : vector<2x384xf32> to vector<2x32xf32>
    %257 = vector.extract_strided_slice %252 {offsets = [0, 0], sizes = [2, 32], strides = [1, 1]} : vector<2x384xf32> to vector<2x32xf32>
    %258 = arith.addf %256, %257 : vector<2x32xf32>
    %259 = arith.negf %258 : vector<2x32xf32>
    %260 = math.exp %259 : vector<2x32xf32>
    %cst_87 = arith.constant 1.000000e+00 : f32
    %261 = vector.broadcast %cst_87 : f32 to vector<2x32xf32>
    %262 = arith.addf %261, %260 : vector<2x32xf32>
    %263 = arith.divf %261, %262 : vector<2x32xf32>
    %264 = vector.extract_strided_slice %255 {offsets = [0, 128], sizes = [2, 32], strides = [1, 1]} : vector<2x384xf32> to vector<2x32xf32>
    %265 = vector.extract_strided_slice %252 {offsets = [0, 128], sizes = [2, 32], strides = [1, 1]} : vector<2x384xf32> to vector<2x32xf32>
    %266 = arith.addf %264, %265 : vector<2x32xf32>
    %267 = arith.negf %266 : vector<2x32xf32>
    %268 = math.exp %267 : vector<2x32xf32>
    %cst_88 = arith.constant 1.000000e+00 : f32
    %269 = vector.broadcast %cst_88 : f32 to vector<2x32xf32>
    %270 = arith.addf %269, %268 : vector<2x32xf32>
    %271 = arith.divf %269, %270 : vector<2x32xf32>
    %272 = vector.extract_strided_slice %255 {offsets = [0, 256], sizes = [2, 32], strides = [1, 1]} : vector<2x384xf32> to vector<2x32xf32>
    %273 = vector.extract_strided_slice %252 {offsets = [0, 256], sizes = [2, 32], strides = [1, 1]} : vector<2x384xf32> to vector<2x32xf32>
    %274 = arith.mulf %263, %273 : vector<2x32xf32>
    %275 = arith.addf %272, %274 : vector<2x32xf32>
    %276 = math.tanh %275 : vector<2x32xf32>
    %cst_89 = arith.constant 1.000000e+00 : f32
    %277 = vector.broadcast %cst_89 : f32 to vector<2x32xf32>
    %278 = arith.subf %277, %271 : vector<2x32xf32>
    %279 = arith.mulf %278, %276 : vector<2x32xf32>
    %280 = arith.mulf %271, %222 : vector<2x32xf32>
    %281 = arith.addf %279, %280 : vector<2x32xf32>
    %282 = arith.truncf %281 : vector<2x32xf32> to vector<2x32xbf16>
    %283 = vector.shape_cast %282 : vector<2x32xbf16> to vector<2x1x32xbf16>
    "tpu.trace_start"() <{level = 10 : i32, message = "bqh,bhs->bqs"}> : () -> ()
    %cst_90 = arith.constant dense<0.000000e+00> : vector<2x1x16xf32>
    %284 = tpu.matmul %283, %12, %cst_90 {dimension_numbers = #tpu.dot_dimension_numbers<[2], [1], [1], [2], [0, 0, 0, 1, 1, 2], [0], [0]>} : vector<2x1x32xbf16>, vector<2x32x16xbf16>, vector<2x1x16xf32> -> vector<2x1x16xf32>
    "tpu.trace_stop"() : () -> ()
    %cst_91 = arith.constant dense<0xFF800000> : vector<2x1xf32>
    %285 = vector.multi_reduction <maximumf>, %284, %cst_91 [2] : vector<2x1x16xf32> to vector<2x1xf32>
    %286 = vector.shape_cast %285 : vector<2x1xf32> to vector<2x1x1xf32>
    %287 = vector.broadcast %286 : vector<2x1x1xf32> to vector<2x1x16xf32>
    %288 = arith.subf %284, %287 : vector<2x1x16xf32>
    %289 = math.exp %288 : vector<2x1x16xf32>
    %cst_92 = arith.constant dense<0.000000e+00> : vector<2x1xf32>
    %290 = vector.multi_reduction <add>, %289, %cst_92 [2] : vector<2x1x16xf32> to vector<2x1xf32>
    %291 = vector.shape_cast %290 : vector<2x1xf32> to vector<2x1x1xf32>
    %292 = vector.broadcast %291 : vector<2x1x1xf32> to vector<2x1x16xf32>
    %293 = arith.divf %289, %292 : vector<2x1x16xf32>
    %294 = arith.truncf %293 : vector<2x1x16xf32> to vector<2x1x16xbf16>
    "tpu.trace_start"() <{level = 10 : i32, message = "bqs,bsh->bqh"}> : () -> ()
    %cst_93 = arith.constant dense<0.000000e+00> : vector<2x1x32xf32>
    %295 = tpu.matmul %294, %11, %cst_93 {dimension_numbers = #tpu.dot_dimension_numbers<[2], [1], [1], [2], [0, 0, 0, 1, 1, 2], [0], [0]>} : vector<2x1x16xbf16>, vector<2x16x32xbf16>, vector<2x1x32xf32> -> vector<2x1x32xf32>
    "tpu.trace_stop"() : () -> ()
    %296 = vector.shape_cast %295 : vector<2x1x32xf32> to vector<2x32xf32>
    %297 = tpu.concatenate %281, %296 in 1 : vector<2x32xf32>, vector<2x32xf32> -> vector<2x64xf32>
    %298 = arith.truncf %297 : vector<2x64xf32> to vector<2x64xbf16>
    %cst_94 = arith.constant dense<0.000000e+00> : vector<2x32xf32>
    %299 = tpu.matmul %298, %7, %cst_94 {dimension_numbers = #tpu.dot_dimension_numbers<[1], [0], [0], [1], [0, 0, 1, 1], [], []>} : vector<2x64xbf16>, vector<64x32xbf16>, vector<2x32xf32> -> vector<2x32xf32>
    %300 = arith.addf %299, %10 : vector<2x32xf32>
    %301 = math.tanh %300 : vector<2x32xf32>
    %c0_95 = arith.constant 0 : index
    %c4_96 = arith.constant 4 : index
    %c0_97 = arith.constant 0 : index
    %302 = vector.load %arg13[%c0_95, %c4_96, %c0_97] : memref<2x8x32xf32, #tpu.memory_space<vmem>>, vector<2x1x32xf32>
    %303 = vector.shape_cast %302 : vector<2x1x32xf32> to vector<2x32xf32>
    %304 = vector.shape_cast %301 : vector<2x32xf32> to vector<2x1x32xf32>
    tpu.vector_store %arg13[%c0_95, %c4_96, %c0_97], %304 {strides = array<i32>} : memref<2x8x32xf32, #tpu.memory_space<vmem>>, vector<2x1x32xf32>,
    %305 = vector.shape_cast %293 : vector<2x1x16xf32> to vector<2x16xf32>
    %c0_98 = arith.constant 0 : index
    %c4_99 = arith.constant 4 : index
    %c0_100 = arith.constant 0 : index
    %306 = vector.load %arg14[%c0_98, %c4_99, %c0_100] : memref<2x8x16xf32, #tpu.memory_space<vmem>>, vector<2x1x16xf32>
    %307 = vector.shape_cast %306 : vector<2x1x16xf32> to vector<2x16xf32>
    %308 = vector.shape_cast %305 : vector<2x16xf32> to vector<2x1x16xf32>
    tpu.vector_store %arg14[%c0_98, %c4_99, %c0_100], %308 {strides = array<i32>} : memref<2x8x16xf32, #tpu.memory_space<vmem>>, vector<2x1x16xf32>,
    %309 = arith.truncf %281 : vector<2x32xf32> to vector<2x32xbf16>
    %cst_101 = arith.constant dense<0.000000e+00> : vector<2x384xf32>
    %310 = tpu.matmul %309, %3, %cst_101 {dimension_numbers = #tpu.dot_dimension_numbers<[1], [0], [0], [1], [0, 0, 1, 1], [], []>} : vector<2x32xbf16>, vector<32x384xbf16>, vector<2x384xf32> -> vector<2x384xf32>
    %311 = arith.addf %310, %6 : vector<2x384xf32>
    %c5 = arith.constant 5 : index
    %c0_102 = arith.constant 0 : index
    %c0_103 = arith.constant 0 : index
    %312 = vector.load %arg2[%c5, %c0_102, %c0_103] : memref<8x2x384xbf16, #tpu.memory_space<vmem>>, vector<1x2x384xbf16>
    %313 = vector.shape_cast %312 : vector<1x2x384xbf16> to vector<2x384xbf16>
    %314 = arith.extf %313 : vector<2x384xbf16> to vector<2x384xf32>
    %315 = vector.extract_strided_slice %314 {offsets = [0, 0], sizes = [2, 32], strides = [1, 1]} : vector<2x384xf32> to vector<2x32xf32>
    %316 = vector.extract_strided_slice %311 {offsets = [0, 0], sizes = [2, 32], strides = [1, 1]} : vector<2x384xf32> to vector<2x32xf32>
    %317 = arith.addf %315, %316 : vector<2x32xf32>
    %318 = arith.negf %317 : vector<2x32xf32>
    %319 = math.exp %318 : vector<2x32xf32>
    %cst_104 = arith.constant 1.000000e+00 : f32
    %320 = vector.broadcast %cst_104 : f32 to vector<2x32xf32>
    %321 = arith.addf %320, %319 : vector<2x32xf32>
    %322 = arith.divf %320, %321 : vector<2x32xf32>
    %323 = vector.extract_strided_slice %314 {offsets = [0, 128], sizes = [2, 32], strides = [1, 1]} : vector<2x384xf32> to vector<2x32xf32>
    %324 = vector.extract_strided_slice %311 {offsets = [0, 128], sizes = [2, 32], strides = [1, 1]} : vector<2x384xf32> to vector<2x32xf32>
    %325 = arith.addf %323, %324 : vector<2x32xf32>
    %326 = arith.negf %325 : vector<2x32xf32>
    %327 = math.exp %326 : vector<2x32xf32>
    %cst_105 = arith.constant 1.000000e+00 : f32
    %328 = vector.broadcast %cst_105 : f32 to vector<2x32xf32>
    %329 = arith.addf %328, %327 : vector<2x32xf32>
    %330 = arith.divf %328, %329 : vector<2x32xf32>
    %331 = vector.extract_strided_slice %314 {offsets = [0, 256], sizes = [2, 32], strides = [1, 1]} : vector<2x384xf32> to vector<2x32xf32>
    %332 = vector.extract_strided_slice %311 {offsets = [0, 256], sizes = [2, 32], strides = [1, 1]} : vector<2x384xf32> to vector<2x32xf32>
    %333 = arith.mulf %322, %332 : vector<2x32xf32>
    %334 = arith.addf %331, %333 : vector<2x32xf32>
    %335 = math.tanh %334 : vector<2x32xf32>
    %cst_106 = arith.constant 1.000000e+00 : f32
    %336 = vector.broadcast %cst_106 : f32 to vector<2x32xf32>
    %337 = arith.subf %336, %330 : vector<2x32xf32>
    %338 = arith.mulf %337, %335 : vector<2x32xf32>
    %339 = arith.mulf %330, %281 : vector<2x32xf32>
    %340 = arith.addf %338, %339 : vector<2x32xf32>
    %341 = arith.truncf %340 : vector<2x32xf32> to vector<2x32xbf16>
    %342 = vector.shape_cast %341 : vector<2x32xbf16> to vector<2x1x32xbf16>
    "tpu.trace_start"() <{level = 10 : i32, message = "bqh,bhs->bqs"}> : () -> ()
    %cst_107 = arith.constant dense<0.000000e+00> : vector<2x1x16xf32>
    %343 = tpu.matmul %342, %12, %cst_107 {dimension_numbers = #tpu.dot_dimension_numbers<[2], [1], [1], [2], [0, 0, 0, 1, 1, 2], [0], [0]>} : vector<2x1x32xbf16>, vector<2x32x16xbf16>, vector<2x1x16xf32> -> vector<2x1x16xf32>
    "tpu.trace_stop"() : () -> ()
    %cst_108 = arith.constant dense<0xFF800000> : vector<2x1xf32>
    %344 = vector.multi_reduction <maximumf>, %343, %cst_108 [2] : vector<2x1x16xf32> to vector<2x1xf32>
    %345 = vector.shape_cast %344 : vector<2x1xf32> to vector<2x1x1xf32>
    %346 = vector.broadcast %345 : vector<2x1x1xf32> to vector<2x1x16xf32>
    %347 = arith.subf %343, %346 : vector<2x1x16xf32>
    %348 = math.exp %347 : vector<2x1x16xf32>
    %cst_109 = arith.constant dense<0.000000e+00> : vector<2x1xf32>
    %349 = vector.multi_reduction <add>, %348, %cst_109 [2] : vector<2x1x16xf32> to vector<2x1xf32>
    %350 = vector.shape_cast %349 : vector<2x1xf32> to vector<2x1x1xf32>
    %351 = vector.broadcast %350 : vector<2x1x1xf32> to vector<2x1x16xf32>
    %352 = arith.divf %348, %351 : vector<2x1x16xf32>
    %353 = arith.truncf %352 : vector<2x1x16xf32> to vector<2x1x16xbf16>
    "tpu.trace_start"() <{level = 10 : i32, message = "bqs,bsh->bqh"}> : () -> ()
    %cst_110 = arith.constant dense<0.000000e+00> : vector<2x1x32xf32>
    %354 = tpu.matmul %353, %11, %cst_110 {dimension_numbers = #tpu.dot_dimension_numbers<[2], [1], [1], [2], [0, 0, 0, 1, 1, 2], [0], [0]>} : vector<2x1x16xbf16>, vector<2x16x32xbf16>, vector<2x1x32xf32> -> vector<2x1x32xf32>
    "tpu.trace_stop"() : () -> ()
    %355 = vector.shape_cast %354 : vector<2x1x32xf32> to vector<2x32xf32>
    %356 = tpu.concatenate %340, %355 in 1 : vector<2x32xf32>, vector<2x32xf32> -> vector<2x64xf32>
    %357 = arith.truncf %356 : vector<2x64xf32> to vector<2x64xbf16>
    %cst_111 = arith.constant dense<0.000000e+00> : vector<2x32xf32>
    %358 = tpu.matmul %357, %7, %cst_111 {dimension_numbers = #tpu.dot_dimension_numbers<[1], [0], [0], [1], [0, 0, 1, 1], [], []>} : vector<2x64xbf16>, vector<64x32xbf16>, vector<2x32xf32> -> vector<2x32xf32>
    %359 = arith.addf %358, %10 : vector<2x32xf32>
    %360 = math.tanh %359 : vector<2x32xf32>
    %c0_112 = arith.constant 0 : index
    %c5_113 = arith.constant 5 : index
    %c0_114 = arith.constant 0 : index
    %361 = vector.load %arg13[%c0_112, %c5_113, %c0_114] : memref<2x8x32xf32, #tpu.memory_space<vmem>>, vector<2x1x32xf32>
    %362 = vector.shape_cast %361 : vector<2x1x32xf32> to vector<2x32xf32>
    %363 = vector.shape_cast %360 : vector<2x32xf32> to vector<2x1x32xf32>
    tpu.vector_store %arg13[%c0_112, %c5_113, %c0_114], %363 {strides = array<i32>} : memref<2x8x32xf32, #tpu.memory_space<vmem>>, vector<2x1x32xf32>,
    %364 = vector.shape_cast %352 : vector<2x1x16xf32> to vector<2x16xf32>
    %c0_115 = arith.constant 0 : index
    %c5_116 = arith.constant 5 : index
    %c0_117 = arith.constant 0 : index
    %365 = vector.load %arg14[%c0_115, %c5_116, %c0_117] : memref<2x8x16xf32, #tpu.memory_space<vmem>>, vector<2x1x16xf32>
    %366 = vector.shape_cast %365 : vector<2x1x16xf32> to vector<2x16xf32>
    %367 = vector.shape_cast %364 : vector<2x16xf32> to vector<2x1x16xf32>
    tpu.vector_store %arg14[%c0_115, %c5_116, %c0_117], %367 {strides = array<i32>} : memref<2x8x16xf32, #tpu.memory_space<vmem>>, vector<2x1x16xf32>,
    %368 = arith.truncf %340 : vector<2x32xf32> to vector<2x32xbf16>
    %cst_118 = arith.constant dense<0.000000e+00> : vector<2x384xf32>
    %369 = tpu.matmul %368, %3, %cst_118 {dimension_numbers = #tpu.dot_dimension_numbers<[1], [0], [0], [1], [0, 0, 1, 1], [], []>} : vector<2x32xbf16>, vector<32x384xbf16>, vector<2x384xf32> -> vector<2x384xf32>
    %370 = arith.addf %369, %6 : vector<2x384xf32>
    %c6 = arith.constant 6 : index
    %c0_119 = arith.constant 0 : index
    %c0_120 = arith.constant 0 : index
    %371 = vector.load %arg2[%c6, %c0_119, %c0_120] : memref<8x2x384xbf16, #tpu.memory_space<vmem>>, vector<1x2x384xbf16>
    %372 = vector.shape_cast %371 : vector<1x2x384xbf16> to vector<2x384xbf16>
    %373 = arith.extf %372 : vector<2x384xbf16> to vector<2x384xf32>
    %374 = vector.extract_strided_slice %373 {offsets = [0, 0], sizes = [2, 32], strides = [1, 1]} : vector<2x384xf32> to vector<2x32xf32>
    %375 = vector.extract_strided_slice %370 {offsets = [0, 0], sizes = [2, 32], strides = [1, 1]} : vector<2x384xf32> to vector<2x32xf32>
    %376 = arith.addf %374, %375 : vector<2x32xf32>
    %377 = arith.negf %376 : vector<2x32xf32>
    %378 = math.exp %377 : vector<2x32xf32>
    %cst_121 = arith.constant 1.000000e+00 : f32
    %379 = vector.broadcast %cst_121 : f32 to vector<2x32xf32>
    %380 = arith.addf %379, %378 : vector<2x32xf32>
    %381 = arith.divf %379, %380 : vector<2x32xf32>
    %382 = vector.extract_strided_slice %373 {offsets = [0, 128], sizes = [2, 32], strides = [1, 1]} : vector<2x384xf32> to vector<2x32xf32>
    %383 = vector.extract_strided_slice %370 {offsets = [0, 128], sizes = [2, 32], strides = [1, 1]} : vector<2x384xf32> to vector<2x32xf32>
    %384 = arith.addf %382, %383 : vector<2x32xf32>
    %385 = arith.negf %384 : vector<2x32xf32>
    %386 = math.exp %385 : vector<2x32xf32>
    %cst_122 = arith.constant 1.000000e+00 : f32
    %387 = vector.broadcast %cst_122 : f32 to vector<2x32xf32>
    %388 = arith.addf %387, %386 : vector<2x32xf32>
    %389 = arith.divf %387, %388 : vector<2x32xf32>
    %390 = vector.extract_strided_slice %373 {offsets = [0, 256], sizes = [2, 32], strides = [1, 1]} : vector<2x384xf32> to vector<2x32xf32>
    %391 = vector.extract_strided_slice %370 {offsets = [0, 256], sizes = [2, 32], strides = [1, 1]} : vector<2x384xf32> to vector<2x32xf32>
    %392 = arith.mulf %381, %391 : vector<2x32xf32>
    %393 = arith.addf %390, %392 : vector<2x32xf32>
    %394 = math.tanh %393 : vector<2x32xf32>
    %cst_123 = arith.constant 1.000000e+00 : f32
    %395 = vector.broadcast %cst_123 : f32 to vector<2x32xf32>
    %396 = arith.subf %395, %389 : vector<2x32xf32>
    %397 = arith.mulf %396, %394 : vector<2x32xf32>
    %398 = arith.mulf %389, %340 : vector<2x32xf32>
    %399 = arith.addf %397, %398 : vector<2x32xf32>
    %400 = arith.truncf %399 : vector<2x32xf32> to vector<2x32xbf16>
    %401 = vector.shape_cast %400 : vector<2x32xbf16> to vector<2x1x32xbf16>
    "tpu.trace_start"() <{level = 10 : i32, message = "bqh,bhs->bqs"}> : () -> ()
    %cst_124 = arith.constant dense<0.000000e+00> : vector<2x1x16xf32>
    %402 = tpu.matmul %401, %12, %cst_124 {dimension_numbers = #tpu.dot_dimension_numbers<[2], [1], [1], [2], [0, 0, 0, 1, 1, 2], [0], [0]>} : vector<2x1x32xbf16>, vector<2x32x16xbf16>, vector<2x1x16xf32> -> vector<2x1x16xf32>
    "tpu.trace_stop"() : () -> ()
    %cst_125 = arith.constant dense<0xFF800000> : vector<2x1xf32>
    %403 = vector.multi_reduction <maximumf>, %402, %cst_125 [2] : vector<2x1x16xf32> to vector<2x1xf32>
    %404 = vector.shape_cast %403 : vector<2x1xf32> to vector<2x1x1xf32>
    %405 = vector.broadcast %404 : vector<2x1x1xf32> to vector<2x1x16xf32>
    %406 = arith.subf %402, %405 : vector<2x1x16xf32>
    %407 = math.exp %406 : vector<2x1x16xf32>
    %cst_126 = arith.constant dense<0.000000e+00> : vector<2x1xf32>
    %408 = vector.multi_reduction <add>, %407, %cst_126 [2] : vector<2x1x16xf32> to vector<2x1xf32>
    %409 = vector.shape_cast %408 : vector<2x1xf32> to vector<2x1x1xf32>
    %410 = vector.broadcast %409 : vector<2x1x1xf32> to vector<2x1x16xf32>
    %411 = arith.divf %407, %410 : vector<2x1x16xf32>
    %412 = arith.truncf %411 : vector<2x1x16xf32> to vector<2x1x16xbf16>
    "tpu.trace_start"() <{level = 10 : i32, message = "bqs,bsh->bqh"}> : () -> ()
    %cst_127 = arith.constant dense<0.000000e+00> : vector<2x1x32xf32>
    %413 = tpu.matmul %412, %11, %cst_127 {dimension_numbers = #tpu.dot_dimension_numbers<[2], [1], [1], [2], [0, 0, 0, 1, 1, 2], [0], [0]>} : vector<2x1x16xbf16>, vector<2x16x32xbf16>, vector<2x1x32xf32> -> vector<2x1x32xf32>
    "tpu.trace_stop"() : () -> ()
    %414 = vector.shape_cast %413 : vector<2x1x32xf32> to vector<2x32xf32>
    %415 = tpu.concatenate %399, %414 in 1 : vector<2x32xf32>, vector<2x32xf32> -> vector<2x64xf32>
    %416 = arith.truncf %415 : vector<2x64xf32> to vector<2x64xbf16>
    %cst_128 = arith.constant dense<0.000000e+00> : vector<2x32xf32>
    %417 = tpu.matmul %416, %7, %cst_128 {dimension_numbers = #tpu.dot_dimension_numbers<[1], [0], [0], [1], [0, 0, 1, 1], [], []>} : vector<2x64xbf16>, vector<64x32xbf16>, vector<2x32xf32> -> vector<2x32xf32>
    %418 = arith.addf %417, %10 : vector<2x32xf32>
    %419 = math.tanh %418 : vector<2x32xf32>
    %c0_129 = arith.constant 0 : index
    %c6_130 = arith.constant 6 : index
    %c0_131 = arith.constant 0 : index
    %420 = vector.load %arg13[%c0_129, %c6_130, %c0_131] : memref<2x8x32xf32, #tpu.memory_space<vmem>>, vector<2x1x32xf32>
    %421 = vector.shape_cast %420 : vector<2x1x32xf32> to vector<2x32xf32>
    %422 = vector.shape_cast %419 : vector<2x32xf32> to vector<2x1x32xf32>
    tpu.vector_store %arg13[%c0_129, %c6_130, %c0_131], %422 {strides = array<i32>} : memref<2x8x32xf32, #tpu.memory_space<vmem>>, vector<2x1x32xf32>,
    %423 = vector.shape_cast %411 : vector<2x1x16xf32> to vector<2x16xf32>
    %c0_132 = arith.constant 0 : index
    %c6_133 = arith.constant 6 : index
    %c0_134 = arith.constant 0 : index
    %424 = vector.load %arg14[%c0_132, %c6_133, %c0_134] : memref<2x8x16xf32, #tpu.memory_space<vmem>>, vector<2x1x16xf32>
    %425 = vector.shape_cast %424 : vector<2x1x16xf32> to vector<2x16xf32>
    %426 = vector.shape_cast %423 : vector<2x16xf32> to vector<2x1x16xf32>
    tpu.vector_store %arg14[%c0_132, %c6_133, %c0_134], %426 {strides = array<i32>} : memref<2x8x16xf32, #tpu.memory_space<vmem>>, vector<2x1x16xf32>,
    %427 = arith.truncf %399 : vector<2x32xf32> to vector<2x32xbf16>
    %cst_135 = arith.constant dense<0.000000e+00> : vector<2x384xf32>
    %428 = tpu.matmul %427, %3, %cst_135 {dimension_numbers = #tpu.dot_dimension_numbers<[1], [0], [0], [1], [0, 0, 1, 1], [], []>} : vector<2x32xbf16>, vector<32x384xbf16>, vector<2x384xf32> -> vector<2x384xf32>
    %429 = arith.addf %428, %6 : vector<2x384xf32>
    %c7 = arith.constant 7 : index
    %c0_136 = arith.constant 0 : index
    %c0_137 = arith.constant 0 : index
    %430 = vector.load %arg2[%c7, %c0_136, %c0_137] : memref<8x2x384xbf16, #tpu.memory_space<vmem>>, vector<1x2x384xbf16>
    %431 = vector.shape_cast %430 : vector<1x2x384xbf16> to vector<2x384xbf16>
    %432 = arith.extf %431 : vector<2x384xbf16> to vector<2x384xf32>
    %433 = vector.extract_strided_slice %432 {offsets = [0, 0], sizes = [2, 32], strides = [1, 1]} : vector<2x384xf32> to vector<2x32xf32>
    %434 = vector.extract_strided_slice %429 {offsets = [0, 0], sizes = [2, 32], strides = [1, 1]} : vector<2x384xf32> to vector<2x32xf32>
    %435 = arith.addf %433, %434 : vector<2x32xf32>
    %436 = arith.negf %435 : vector<2x32xf32>
    %437 = math.exp %436 : vector<2x32xf32>
    %cst_138 = arith.constant 1.000000e+00 : f32
    %438 = vector.broadcast %cst_138 : f32 to vector<2x32xf32>
    %439 = arith.addf %438, %437 : vector<2x32xf32>
    %440 = arith.divf %438, %439 : vector<2x32xf32>
    %441 = vector.extract_strided_slice %432 {offsets = [0, 128], sizes = [2, 32], strides = [1, 1]} : vector<2x384xf32> to vector<2x32xf32>
    %442 = vector.extract_strided_slice %429 {offsets = [0, 128], sizes = [2, 32], strides = [1, 1]} : vector<2x384xf32> to vector<2x32xf32>
    %443 = arith.addf %441, %442 : vector<2x32xf32>
    %444 = arith.negf %443 : vector<2x32xf32>
    %445 = math.exp %444 : vector<2x32xf32>
    %cst_139 = arith.constant 1.000000e+00 : f32
    %446 = vector.broadcast %cst_139 : f32 to vector<2x32xf32>
    %447 = arith.addf %446, %445 : vector<2x32xf32>
    %448 = arith.divf %446, %447 : vector<2x32xf32>
    %449 = vector.extract_strided_slice %432 {offsets = [0, 256], sizes = [2, 32], strides = [1, 1]} : vector<2x384xf32> to vector<2x32xf32>
    %450 = vector.extract_strided_slice %429 {offsets = [0, 256], sizes = [2, 32], strides = [1, 1]} : vector<2x384xf32> to vector<2x32xf32>
    %451 = arith.mulf %440, %450 : vector<2x32xf32>
    %452 = arith.addf %449, %451 : vector<2x32xf32>
    %453 = math.tanh %452 : vector<2x32xf32>
    %cst_140 = arith.constant 1.000000e+00 : f32
    %454 = vector.broadcast %cst_140 : f32 to vector<2x32xf32>
    %455 = arith.subf %454, %448 : vector<2x32xf32>
    %456 = arith.mulf %455, %453 : vector<2x32xf32>
    %457 = arith.mulf %448, %399 : vector<2x32xf32>
    %458 = arith.addf %456, %457 : vector<2x32xf32>
    %459 = arith.truncf %458 : vector<2x32xf32> to vector<2x32xbf16>
    %460 = vector.shape_cast %459 : vector<2x32xbf16> to vector<2x1x32xbf16>
    "tpu.trace_start"() <{level = 10 : i32, message = "bqh,bhs->bqs"}> : () -> ()
    %cst_141 = arith.constant dense<0.000000e+00> : vector<2x1x16xf32>
    %461 = tpu.matmul %460, %12, %cst_141 {dimension_numbers = #tpu.dot_dimension_numbers<[2], [1], [1], [2], [0, 0, 0, 1, 1, 2], [0], [0]>} : vector<2x1x32xbf16>, vector<2x32x16xbf16>, vector<2x1x16xf32> -> vector<2x1x16xf32>
    "tpu.trace_stop"() : () -> ()
    %cst_142 = arith.constant dense<0xFF800000> : vector<2x1xf32>
    %462 = vector.multi_reduction <maximumf>, %461, %cst_142 [2] : vector<2x1x16xf32> to vector<2x1xf32>
    %463 = vector.shape_cast %462 : vector<2x1xf32> to vector<2x1x1xf32>
    %464 = vector.broadcast %463 : vector<2x1x1xf32> to vector<2x1x16xf32>
    %465 = arith.subf %461, %464 : vector<2x1x16xf32>
    %466 = math.exp %465 : vector<2x1x16xf32>
    %cst_143 = arith.constant dense<0.000000e+00> : vector<2x1xf32>
    %467 = vector.multi_reduction <add>, %466, %cst_143 [2] : vector<2x1x16xf32> to vector<2x1xf32>
    %468 = vector.shape_cast %467 : vector<2x1xf32> to vector<2x1x1xf32>
    %469 = vector.broadcast %468 : vector<2x1x1xf32> to vector<2x1x16xf32>
    %470 = arith.divf %466, %469 : vector<2x1x16xf32>
    %471 = arith.truncf %470 : vector<2x1x16xf32> to vector<2x1x16xbf16>
    "tpu.trace_start"() <{level = 10 : i32, message = "bqs,bsh->bqh"}> : () -> ()
    %cst_144 = arith.constant dense<0.000000e+00> : vector<2x1x32xf32>
    %472 = tpu.matmul %471, %11, %cst_144 {dimension_numbers = #tpu.dot_dimension_numbers<[2], [1], [1], [2], [0, 0, 0, 1, 1, 2], [0], [0]>} : vector<2x1x16xbf16>, vector<2x16x32xbf16>, vector<2x1x32xf32> -> vector<2x1x32xf32>
    "tpu.trace_stop"() : () -> ()
    %473 = vector.shape_cast %472 : vector<2x1x32xf32> to vector<2x32xf32>
    %474 = tpu.concatenate %458, %473 in 1 : vector<2x32xf32>, vector<2x32xf32> -> vector<2x64xf32>
    %475 = arith.truncf %474 : vector<2x64xf32> to vector<2x64xbf16>
    %cst_145 = arith.constant dense<0.000000e+00> : vector<2x32xf32>
    %476 = tpu.matmul %475, %7, %cst_145 {dimension_numbers = #tpu.dot_dimension_numbers<[1], [0], [0], [1], [0, 0, 1, 1], [], []>} : vector<2x64xbf16>, vector<64x32xbf16>, vector<2x32xf32> -> vector<2x32xf32>
    %477 = arith.addf %476, %10 : vector<2x32xf32>
    %478 = math.tanh %477 : vector<2x32xf32>
    %c0_146 = arith.constant 0 : index
    %c7_147 = arith.constant 7 : index
    %c0_148 = arith.constant 0 : index
    %479 = vector.load %arg13[%c0_146, %c7_147, %c0_148] : memref<2x8x32xf32, #tpu.memory_space<vmem>>, vector<2x1x32xf32>
    %480 = vector.shape_cast %479 : vector<2x1x32xf32> to vector<2x32xf32>
    %481 = vector.shape_cast %478 : vector<2x32xf32> to vector<2x1x32xf32>
    tpu.vector_store %arg13[%c0_146, %c7_147, %c0_148], %481 {strides = array<i32>} : memref<2x8x32xf32, #tpu.memory_space<vmem>>, vector<2x1x32xf32>,
    %482 = vector.shape_cast %470 : vector<2x1x16xf32> to vector<2x16xf32>
    %c0_149 = arith.constant 0 : index
    %c7_150 = arith.constant 7 : index
    %c0_151 = arith.constant 0 : index
    %483 = vector.load %arg14[%c0_149, %c7_150, %c0_151] : memref<2x8x16xf32, #tpu.memory_space<vmem>>, vector<2x1x16xf32>
    %484 = vector.shape_cast %483 : vector<2x1x16xf32> to vector<2x16xf32>
    %485 = vector.shape_cast %482 : vector<2x16xf32> to vector<2x1x16xf32>
    tpu.vector_store %arg14[%c0_149, %c7_150, %c0_151], %485 {strides = array<i32>} : memref<2x8x16xf32, #tpu.memory_space<vmem>>, vector<2x1x16xf32>,
    %c0_152 = arith.constant 0 : index
    %c0_153 = arith.constant 0 : index
    %486 = vector.load %arg12[%c0_152, %c0_153] : memref<2x32xf32, #tpu.memory_space<vmem>>, vector<2x32xf32>
    tpu.vector_store %arg12[%c0_152, %c0_153], %458 {strides = array<i32>} : memref<2x32xf32, #tpu.memory_space<vmem>>, vector<2x32xf32>,
    %c0_154 = arith.constant 0 : index
    %c0_155 = arith.constant 0 : index
    %c0_156 = arith.constant 0 : index
    %487 = vector.load %arg13[%c0_154, %c0_155, %c0_156] : memref<2x8x32xf32, #tpu.memory_space<vmem>>, vector<2x8x32xf32>
    %488 = arith.truncf %487 : vector<2x8x32xf32> to vector<2x8x32xbf16>
    %c0_157 = arith.constant 0 : index
    %c0_158 = arith.constant 0 : index
    %c0_159 = arith.constant 0 : index
    %489 = vector.load %arg10[%c0_157, %c0_158, %c0_159] : memref<2x8x32xbf16, #tpu.memory_space<vmem>>, vector<2x8x32xbf16>
    tpu.vector_store %arg10[%c0_157, %c0_158, %c0_159], %488 {strides = array<i32>} : memref<2x8x32xbf16, #tpu.memory_space<vmem>>, vector<2x8x32xbf16>,
    %c0_160 = arith.constant 0 : index
    %c0_161 = arith.constant 0 : index
    %c0_162 = arith.constant 0 : index
    %490 = vector.load %arg14[%c0_160, %c0_161, %c0_162] : memref<2x8x16xf32, #tpu.memory_space<vmem>>, vector<2x8x16xf32>
    %c0_163 = arith.constant 0 : index
    %c0_164 = arith.constant 0 : index
    %c0_165 = arith.constant 0 : index
    %491 = vector.load %arg11[%c0_163, %c0_164, %c0_165] : memref<2x8x16xf32, #tpu.memory_space<vmem>>, vector<2x8x16xf32>
    tpu.vector_store %arg11[%c0_163, %c0_164, %c0_165], %490 {strides = array<i32>} : memref<2x8x16xf32, #tpu.memory_space<vmem>>, vector<2x8x16xf32>,
    return
  }
  func.func @transform_0(%arg0: i32, %arg1: i32) -> (i32, i32, i32) {
    %c0_i32 = arith.constant 0 : i32
    %c0_i32_0 = arith.constant 0 : i32
    return %arg1, %arg0, %c0_i32 : i32, i32, i32
  }
  func.func @transform_1(%arg0: i32, %arg1: i32) -> (i32, i32) {
    %c0_i32 = arith.constant 0 : i32
    %c0_i32_0 = arith.constant 0 : i32
    return %arg0, %c0_i32 : i32, i32
  }
  func.func @transform_2(%arg0: i32, %arg1: i32) -> (i32, i32, i32) {
    %c0_i32 = arith.constant 0 : i32
    %c0_i32_0 = arith.constant 0 : i32
    %c0_i32_1 = arith.constant 0 : i32
    return %arg0, %c0_i32, %c0_i32_0 : i32, i32, i32
  }
  func.func @transform_3(%arg0: i32, %arg1: i32) -> (i32, i32, i32) {
    %c0_i32 = arith.constant 0 : i32
    %c0_i32_0 = arith.constant 0 : i32
    %c0_i32_1 = arith.constant 0 : i32
    return %arg0, %c0_i32, %c0_i32_0 : i32, i32, i32
  }
  func.func @transform_4(%arg0: i32, %arg1: i32) -> (i32, i32) {
    %c0_i32 = arith.constant 0 : i32
    %c0_i32_0 = arith.constant 0 : i32
    %c0_i32_1 = arith.constant 0 : i32
    return %c0_i32, %c0_i32_0 : i32, i32
  }
  func.func @transform_5(%arg0: i32, %arg1: i32) -> (i32, i32) {
    %c0_i32 = arith.constant 0 : i32
    %c0_i32_0 = arith.constant 0 : i32
    %c0_i32_1 = arith.constant 0 : i32
    return %c0_i32, %c0_i32_0 : i32, i32
  }
  func.func @transform_6(%arg0: i32, %arg1: i32) -> (i32, i32) {
    %c0_i32 = arith.constant 0 : i32
    %c0_i32_0 = arith.constant 0 : i32
    %c0_i32_1 = arith.constant 0 : i32
    return %c0_i32, %c0_i32_0 : i32, i32
  }
  func.func @transform_7(%arg0: i32, %arg1: i32) -> (i32, i32) {
    %c0_i32 = arith.constant 0 : i32
    %c0_i32_0 = arith.constant 0 : i32
    %c0_i32_1 = arith.constant 0 : i32
    return %c0_i32, %c0_i32_0 : i32, i32
  }
  func.func @transform_8(%arg0: i32, %arg1: i32) -> (i32, i32, i32) {
    %c0_i32 = arith.constant 0 : i32
    %c0_i32_0 = arith.constant 0 : i32
    return %arg0, %arg1, %c0_i32 : i32, i32, i32
  }
  func.func @transform_9(%arg0: i32, %arg1: i32) -> (i32, i32, i32) {
    %c0_i32 = arith.constant 0 : i32
    %c0_i32_0 = arith.constant 0 : i32
    return %arg0, %arg1, %c0_i32 : i32, i32, i32
  }
}

</mosaic_0001>

<bundles_post_ra>
// kernel: seq2seq_with_attention_forward.5
= control target key start
LH: loop header
LB: loop body
LE: loop exit
PB: predicated region body
PF: predicated region fallthrough
CT: control target
= control target key end

     0   :  { %vm52_vm0 = vcmask 261120   ;;  %s246_s1 = inlined_call_operand.vmem [shape: bf16[32,128], index: 1, kind: input, shape index: {}]   ;;  %s247_s0 = inlined_call_operand.vmem [shape: bf16[32,32], index: 0, kind: input, shape index: {}]   ;;  %s248_s2 = inlined_call_operand.vmem [shape: f32[1,128], index: 2, kind: input, shape index: {}]   ;;  %s249_s3 = inlined_call_operand.vmem [shape: f32[32,128], index: 3, kind: output, shape index: {}]  }
   0x1   :  { %v179_v0 = vld [vmem:[%s246_s1] sm:$0xff]   ;;  %v180_v1 = vld [vmem:[%s246_s1 + $0x8] sm:$0xff]  }
   0x2   :  { %171 = vmatprep.subr.bf16.mxu0 %v179_v0  ;;  %v181_v2 = vld [vmem:[%s247_s0] sm:$0xff]   ;;  %v182_v3 = vld [vmem:[%s247_s0 + $0x8] sm:$0xff]  }
   0x3   :  { %172 = vmatpush3.bf16.msra.mxu0 %v179_v0  ;;  %175 = vmatprep.mubr.msk.bf16.mxu0 %vm52_vm0, %v181_v2  ;;  %v160_v4 = vld [vmem:[%s248_s2] ss:$0 sm:$0xff] }
   0x4   :  { %173 = vmatprep.subr.bf16.mxu0 %v180_v1 }
   0x7   :  { %174 = vmatpush3.bf16.msra.mxu0 %v180_v1 }
   0xa   :  { %176 = vmatmul.mubr.msk.bf16.vlgmr.msra.gmra.mrb[0].mxu0 %vm52_vm0, %v182_v3 }
  0xdd   :  { %v177_v5 = vpop.f32.mrb[0].mxu0 }
  0xde   :  { %v102_v6 = vadd.f32 %v177_v5, %v160_v4  ;;  %v93_v7 = vpop.f32.mrb[1].mxu0 }
  0xdf   :  { %v94_v8 = vadd.f32 %v160_v4, %v93_v7  ;;  %v178_v9 = vpop.f32.mrb[2].mxu0 }
  0xe0   :  { %112 = vmax.xlane.f32.xlu1 %v102_v6  ;;  %v96_v10 = vpop.f32.mrb[3].mxu0  ;;  %v105_v11 = vadd.f32 %v178_v9, %v160_v4 }
  0xe1   :  { %108 = vmax.xlane.f32.xlu0 %v94_v8  ;;  %v97_v12 = vadd.f32 %v160_v4, %v96_v10 }
  0xe4   :  { %114 = vmax.xlane.f32.xlu1 %v105_v11 }
  0xe5   :  { %110 = vmax.xlane.f32.xlu0 %v97_v12 }
 0x16d   :  { %v113_v13 = vpop.xlane.xlu1 %112 }
 0x16e   :  { %v118_v14 = vsub.f32 %v102_v6, %v113_v13  ;;  %v109_v15 = vpop.xlane.xlu0 %108 }
 0x16f   :  { %v116_v16 = vsub.f32 %v94_v8, %v109_v15 }
 0x170   :  { %v124_v19 = vmul.f32 1.442695, %v118_v14 }
 0x171   :  { %v120_v17 = vmul.f32 1.442695, %v116_v16  ;;  %v115_v18 = vpop.xlane.xlu1 %114 }
 0x172   :  { %v111_v20 = vpop.xlane.xlu0 %110  ;;  %v119_v21 = vsub.f32 %v105_v11, %v115_v18 }
 0x173   :  { %183 = vpow2.f32 %v120_v17  ;;  %v117_v22 = vsub.f32 %v97_v12, %v111_v20 }
 0x174   :  { %185 = vpow2.f32 %v124_v19  ;;  %v126_v24 = vmul.f32 1.442695, %v119_v21 }
 0x175   :  { %v122_v23 = vmul.f32 1.442695, %v117_v22 }
 0x177   :  { %187 = vpow2.f32 %v122_v23 }
 0x178   :  { %189 = vpow2.f32 %v126_v24 }
 0x17d   :  { %v184_v25 = vpop.eup %183 }
 0x17e   :  { %128 = vadd.xlane.f32.xlu0 %v184_v25  ;;  %v186_v26 = vpop.eup %185 }
 0x181   :  { %v188_v27 = vpop.eup %187 }
 0x182   :  { %132 = vadd.xlane.f32.xlu0 %v186_v26  ;;  %130 = vadd.xlane.f32.xlu1 %v188_v27  ;;  %v190_v28 = vpop.eup %189 }
 0x186   :  { %134 = vadd.xlane.f32.xlu1 %v190_v28 }
 0x20b   :  { %v129_v29 = vpop.xlane.xlu0 %128 }
 0x20c   :  { %191 = vlog2.f32 %v129_v29 }
 0x20f   :  { %v131_v30 = vpop.xlane.xlu1 %130  ;;  %v133_v31 = vpop.xlane.xlu0 %132 }
 0x210   :  { %193 = vlog2.f32 %v131_v30 }
 0x211   :  { %195 = vlog2.f32 %v133_v31 }
 0x213   :  { %v135_v32 = vpop.xlane.xlu1 %134 }
 0x214   :  { %197 = vlog2.f32 %v135_v32 }
 0x216   :  { %v192_v33 = vpop.eup %191 }
 0x217   :  { %v137_v34 = vmul.f32 0.6931472, %v192_v33 }
 0x219   :  { %v144_v35 = vadd.f32 %v137_v34, %v109_v15 }
 0x21a   :  { %v194_v36 = vpop.eup %193 }
 0x21b   :  { %v196_v37 = vpop.eup %195  ;;  %v148_v38 = vsub.f32 %v94_v8, %v144_v35  ;;  %v139_v39 = vmul.f32 0.6931472, %v194_v36 }
 0x21c   :  { %v141_v40 = vmul.f32 0.6931472, %v196_v37 }
 0x21d   :  { %152 = vst [vmem:[%s249_s3] sm:$0xff] %v148_v38  ;;  %v145_v41 = vadd.f32 %v139_v39, %v111_v20 }
 0x21e   :  { %v198_v42 = vpop.eup %197  ;;  %v146_v43 = vadd.f32 %v141_v40, %v113_v13 }
 0x21f   :  { %v149_v44 = vsub.f32 %v97_v12, %v145_v41  ;;  %v143_v45 = vmul.f32 0.6931472, %v198_v42 }
 0x220   :  { %v150_v46 = vsub.f32 %v102_v6, %v146_v43 }
 0x221   :  { %153 = vst [vmem:[%s249_s3 + $0x8] sm:$0xff] %v149_v44  ;;  %v147_v47 = vadd.f32 %v143_v45, %v115_v18 }
 0x222   :  { %154 = vst [vmem:[%s249_s3 + $0x10] sm:$0xff] %v150_v46 }
 0x223   :  { %v151_v48 = vsub.f32 %v105_v11, %v147_v47 }
 0x225   :  { %155 = vst [vmem:[%s249_s3 + $0x18] sm:$0xff] %v151_v48 }

// kernel: seq2seq_with_attention_forward.3
= control target key start
LH: loop header
LB: loop body
LE: loop exit
PB: predicated region body
PF: predicated region fallthrough
CT: control target
= control target key end

     0   :  { %s1826_s15 = smov 0   ;;  %s1828_s16 = smov 0   ;;  %s2109_s0 = inlined_call_operand.vmem [shape: bf16[16,2,384], index: 0, kind: input, shape index: {}]   ;;  %s2110_s1 = inlined_call_operand.vmem [shape: bf16[32,384], index: 1, kind: input, shape index: {}]   ;;  %s2111_s2 = inlined_call_operand.vmem [shape: f32[1,384], index: 2, kind: input, shape index: {}]   ;;  %s2112_s3 = inlined_call_operand.vmem [shape: bf16[2,16,32], index: 3, kind: output, shape index: {0}]   ;;  %s2113_s4 = inlined_call_operand.vmem [shape: f32[2,32], index: 4, kind: output, shape index: {1}]  }
   0x1   :  { %s1830_s17 = smov 0   ;;  %s1832_s18 = smov 0  }
   0x2   :  { %s1834_s19 = smov 0  }
   0x3 LB: > { %s1476_s20 = sadd.s32 4294967295, %s1794_s19   ;;  %s24_s21 = sadd.s32 1, %s1790_s18  ;;  %s1794_s19 = sphi %s1834_s19, %s15_s19   ;;  %s1790_s18 = sphi %s1832_s18, %s2118_s18   ;;  %s1786_s17 = sphi %s1830_s17, %s2117_s17   ;;  %s1782_s16 = sphi %s1828_s16, %s2116_s16   ;;  %s1778_s15 = sphi %s1826_s15, %s2115_s15  }
   0x4   : > { %p25_p0 = scmp.ge.s32.totalorder %s24_s21, 2  ;;  %s106_s22 = sadd.s32 1, %s1782_s16 }
   0x5   : > { %p116_p1 = scmp.ne.s32.totalorder %s1782_s16, %s1778_s15  ;;  %p117_p2 = scmp.eq.s32.totalorder %s1476_s20, 1 }
   0x6   : > { %s2120_s21 = smov (%p25_p0, %s24_s21), 0  ;;  %p1480_p4 = scmp.ge.s32.totalorder %s1794_s19, 1 }
   0x7   : > { %p1855_p3 = por %p117_p2, %p116_p1  ;;  %s102_s24 = ssub.s32 %s1790_s18, %s2120_s21 }
   0x8   : > { %p186_p5 = scmp.lt.s32.totalorder %s1794_s19, 3  ;;  %p104_p6 = scmp.eq.s32.totalorder %s102_s24, 0 }
   0xa   : > { %p187_p7 = pnand %p1480_p4, %p186_p5 }
   0xb   : > { %s1864_s25 = scalar_select %p104_p6, %s1782_s16, %s106_s22  }
   0xc   : > { %190 = sbr.rel (%p187_p7) target bundleno = 2160 (0x870), region = 32  ;;  %s210_s26 = sand.u32 (!%p187_p7), 1, %s1778_s15  }
   0xd   : > { %s1482_s27 = sshll.u32 (!%p187_p7), %s1786_s17, 3  ;;  %s1481_s28 = sshll.u32 (!%p187_p7), %s210_s26, 3 }
   0xe   : > { %p220_p8 = scmp.lt.s32.totalorder (!%p187_p7), %s1482_s27, 15  ;;  %s1872_s7 = scalar_lea.vmem (!%p187_p7), [#allocation4], %s1481_s28 }
   0xf   : > { %p1483_p9 = scmp.ne.s32.totalorder (!%p187_p7), %s1786_s17, 0 }
  0x13   : > { %s2122_s27 = smov (!%p220_p8, %s1482_s27), 15  ;;  %238 = sbr.rel (%p1483_p9) target bundleno = 26 (0x1a), region = 36 }
  0x14   : > { %s1622_s29 = smul.u32 3, %s2122_s27  ;;  %vm239_vm0 = vcmask (!%p1483_p9), 254976   ;;  %v1796_v0 = vmov (!%p1483_p9), 0.0  }
  0x15   : > { %240 = vst.msk [vmem:[#allocation2] sm:$0x3] (!%p1483_p9), %vm239_vm0, %v1796_v0 }
  0x16   : > { %s1870_s6 = scalar_lea.vmem %s2109_s0, %s1622_s29 }
  0x1a PF: > { %v1878_v1 = vld [vmem:[%s2110_s1 + $0x4] ss:$12 sps:$4 sm:$0xff]   ;;  %v1883_v2 = vld [vmem:[%s2110_s1] ss:$12 sps:$4 sm:$0xff]   ;;  %v1797_v3 = vmov 0   ;;  %v1798_v7 = vmov 0.0   ;;  %v251_v11 = vlaneseq }
  0x1b   : > { %336 = vmatprep.mubr.bf16.mxu0 %v1797_v3  ;;  %304 = vmatprep.subr.bf16.mxu0 %v1878_v1  ;;  %v1890_v4 = vld [vmem:[%s2110_s1 + $0x1c] ss:$12 sps:$4 sm:$0xff]   ;;  %v1895_v5 = vld [vmem:[%s2110_s1 + $0x18] ss:$12 sps:$4 sm:$0xff]   ;;  %vm1799_vm1 = vmmov 0   ;;  %vm300_vm2 = vcmask 261120  }
  0x1c   : > { %v1897_v6 = vld [vmem:[#allocation2] sm:$0x3]  ;;  %1558 = vmatprep.subr.bf16.mxu1 %v1798_v7  ;;  %305 = vmatpush1.bf16.msra.mxu0 %v1883_v2  ;;  %v1904_v8 = vld [vmem:[%s2110_s1 + $0x8] ss:$12 sps:$4 sm:$0xff]   ;;  %v252_v12 = vshrl.u32 %v251_v11, 7  ;;  %vm424_vm3 = vcmask 253952  }
  0x1d   : > { %1562 = vmatprep.mubr.msk.bf16.mxu1 %vm1799_vm1, %v1798_v7  ;;  %306 = vmatprep.subr.bf16.mxu0 %v1890_v4  ;;  %v1913_v9 = vld [vmem:[%s2110_s1 + $0x20] ss:$12 sps:$4 sm:$0xff]   ;;  %v267_v10 = vpack.c.bf16 %v1897_v6, %v1897_v6  ;;  %v1800_v46 = vmov 1966171168   ;;  %vm1316_vm4 = vcmask 254976   ;;  %vm1322_vm5 = vcmask 257024  }
  0x1e   : > { %1559 = vmatpush3.bf16.msra.mxu1 %v1904_v8  ;;  %v253_v13 = vsub.s32 0, %v252_v12  ;;  %v249_v14 = vld [vmem:[%s2111_s2] sm:$0x7]  ;;  %v257_v15 = vsub.s32 1, %v252_v12  ;;  %v261_v37 = vsub.s32 2, %v252_v12  ;;  %v415_v47 = vunpack.c.l.s4 %v1800_v46  ;;  %s1530_s5 = sshll.u32 (%p1855_p3), %s1786_s17, 2 }
  0x1f   : > { %1560 = vmatprep.subr.bf16.mxu1 %v1798_v7  ;;  %v385_v16 = vld [vmem:[%s1870_s6] sm:$0x7]  ;;  %v1496_v59 = vld [vmem:[%s1870_s6 + $0x3] sm:$0x7]  ;;  %s1341_s9 = scalar_lea.vmem (%p1855_p3), %s2112_s3, %s1530_s5 }
  0x20   : > { %307 = vmatpush1.bf16.msra.mxu0 %v1895_v5  ;;  %v1939_v17 = vrot.slane %v249_v14, %v253_v13  ;;  %v386_v18 = vunpack.c.l.bf16 %v385_v16  ;;  %v1941_v19 = vrot.slane %v249_v14, %v257_v15  ;;  %v1945_v38 = vrot.slane %v249_v14, %v261_v37 }
  0x21   : > { %431 = vmatprep.subr.bf16.mxu0 %v1878_v1  ;;  %v416_v49 = vunpack.c.0.s8 %v415_v47  ;;  %v514_v60 = vunpack.c.l.bf16 %v1496_v59 }
  0x22   : > { %1561 = vmatpush3.bf16.msra.mxu1 %v1913_v9  ;;  %v395_v24 = vrot.slane %v386_v18, 2  ;;  %v405_v42 = vrot.slane %v386_v18, 4 }
  0x23   : > { %1490 = vmatmul.mubr.msk.bf16.vlgmr.msra.gmra.mrb[0].mxu0 %vm300_vm2, %v267_v10  ;;  %1566 = vmatprep.subr.bf16.mxu1 %v1798_v7  ;;  %v1948_v52 = vsub.s32 %v416_v49, %v252_v12  ;;  %v523_v11 = vrot.slane %v514_v60, 2 }
  0x24   : > { %432 = vmatpush1.bf16.msra.mxu0 %v1883_v2  ;;  %463 = vmatprep.mubr.bf16.mxu0 %v1797_v3 }
  0x25   : > { %1563 = vmatmul.mubr.msk.bf16.vlgmr.msra.gmra.mrb[0].mxu1 %vm300_vm2, %v267_v10  ;;  %433 = vmatprep.subr.bf16.mxu0 %v1890_v4 }
  0x26   : > { %1567 = vmatpush3.bf16.msra.mxu1 %v1904_v8  ;;  %1570 = vmatprep.mubr.msk.bf16.mxu1 %vm1799_vm1, %v1798_v7 }
  0x27   : > { %1568 = vmatprep.subr.bf16.mxu1 %v1798_v7 }
  0x28   : > { %434 = vmatpush1.bf16.msra.mxu0 %v1895_v5 }
  0x29   : > { %558 = vmatprep.subr.bf16.mxu0 %v1878_v1 }
  0x2a   : > { %1569 = vmatpush3.bf16.msra.mxu1 %v1913_v9 }
  0x2b   : > { %1574 = vmatprep.subr.bf16.mxu1 %v1798_v7 }
  0xf6   : > { %v338_v20 = vpop.f32.mrb[0].mxu0 }
  0xf7   : > { %v339_v21 = vadd.f32 %v338_v20, %v1939_v17  ;;  %v340_v22 = vpop.f32.mrb[1].mxu0 }
  0xf8   : > { %v341_v23 = vadd.f32 %v340_v22, %v1941_v19  ;;  %v342_v25 = vpop.f32.mrb[2].mxu0  ;;  %v379_v26 = vpop.f32.mrb[0].mxu1 }
  0xf9   : > { %v387_v27 = vadd.f32 %v386_v18, %v339_v21  ;;  %v343_v28 = vpop.f32.mrb[3].mxu0  ;;  %v1564_v29 = vpop.f32.mrb[1].mxu1  ;;  %v380_v41 = vadd.f32 %v379_v26, %v1945_v38 }
  0xfa   : > { %v382_v30 = vpop.f32.mrb[2].mxu1  ;;  %v397_v33 = vadd.f32 %v395_v24, %v341_v23 }
  0xfb   : > { %v1492_v31 = vmul.f32 -1.442695, %v387_v27  ;;  %v1565_v32 = vpop.f32.mrb[3].mxu1  ;;  %v533_v27 = vrot.slane %v514_v60, 4 }
  0xfc   : > { %v1493_v34 = vmul.f32 -1.442695, %v397_v33 }
  0xfd   : > { %1676 = vpow2.f32 %v1492_v31 }
  0xfe   : > { %1678 = vpow2.f32 %v1493_v34 }
 0x107   : > { %v1677_v35 = vpop.eup %1676 }
 0x108   : > { %v391_v36 = vadd.f32 1.0, %v1677_v35  ;;  %v1679_v39 = vpop.eup %1678 }
 0x109   : > { %v401_v40 = vadd.f32 1.0, %v1679_v39 }
 0x10a   : > { %1680 = vrcp.f32 %v391_v36 }
 0x10b   : > { %1682 = vrcp.f32 %v401_v40 }
 0x114   : > { %v1681_v43 = vpop.eup %1680 }
 0x115   : > { %v404_v44 = vmul.f32 %v1681_v43, %v380_v41  ;;  %v1683_v48 = vpop.eup %1682  ;;  %v1501_v41 = vld [vmem:[%s1870_s6 + $0x6] sm:$0x7] }
 0x116   : > { %v409_v50 = vsub.f32 1.0, %v1683_v48  ;;  %v411_v53 = vmul.f32 %v1683_v48, %v1897_v6 }
 0x117   : > { %v407_v45 = vadd.f32 %v405_v42, %v404_v44  ;;  %v641_v42 = vunpack.c.l.bf16 %v1501_v41 }
 0x119   : > { %1684 = vtanh.f32 %v407_v45  ;;  %v650_v49 = vrot.slane %v641_v42, 2 }
 0x123   : > { %v1685_v51 = vpop.eup %1684 }
 0x124   : > { %v410_v54 = vmul.f32 %v1685_v51, %v409_v50 }
 0x126   : > { %v412_v55 = vadd.f32 %v411_v53, %v410_v54 }
 0x128   : > { %v420_v56 = vrot.slane %v412_v55, %v1948_v52  ;;  %v427_v57 = vpack.c.bf16 %v412_v55, %v412_v55 }
 0x12a   : > { %v421_v58 = vcombine.high %v420_v56, %v420_v56  ;;  %425 = vst.msk [vmem:[#allocation3] sm:$0x1] %vm424_vm3, %v420_v56  ;;  %1494 = vmatmul.mubr.msk.bf16.vlgmr.msra.gmra.mrb[4].mxu0 %vm300_vm2, %v427_v57  ;;  %1571 = vmatmul.mubr.msk.bf16.vlgmr.msra.gmra.mrb[4].mxu1 %vm300_vm2, %v427_v57 }
 0x12b   : > { %559 = vmatpush1.bf16.msra.mxu0 %v1883_v2  ;;  %1575 = vmatpush3.bf16.msra.mxu1 %v1904_v8 }
 0x12c   : > { %426 = vst.msk [vmem:[#allocation3 + $0x8] sm:$0x1] %vm424_vm3, %v421_v58  ;;  %560 = vmatprep.subr.bf16.mxu0 %v1890_v4  ;;  %1576 = vmatprep.subr.bf16.mxu1 %v1798_v7 }
 0x12d   : > { %590 = vmatprep.mubr.bf16.mxu0 %v1797_v3  ;;  %1578 = vmatprep.mubr.msk.bf16.mxu1 %vm1799_vm1, %v1798_v7 }
 0x12f   : > { %561 = vmatpush1.bf16.msra.mxu0 %v1895_v5  ;;  %1577 = vmatpush3.bf16.msra.mxu1 %v1913_v9 }
 0x130   : > { %685 = vmatprep.subr.bf16.mxu0 %v1878_v1  ;;  %1582 = vmatprep.subr.bf16.mxu1 %v1798_v7 }
 0x1fd   : > { %v465_v61 = vpop.f32.mrb[4].mxu0  ;;  %v506_v62 = vpop.f32.mrb[4].mxu1 }
 0x1fe   : > { %v466_v63 = vadd.f32 %v465_v61, %v1939_v17  ;;  %v467_v0 = vpop.f32.mrb[5].mxu0  ;;  %v1572_v6 = vpop.f32.mrb[5].mxu1  ;;  %v507_v26 = vadd.f32 %v506_v62, %v1945_v38 }
 0x1ff   : > { %v468_v10 = vadd.f32 %v467_v0, %v1941_v19  ;;  %v469_v12 = vpop.f32.mrb[6].mxu0  ;;  %v509_v13 = vpop.f32.mrb[6].mxu1  ;;  %v660_v0 = vrot.slane %v641_v42, 4 }
 0x200   : > { %v515_v14 = vadd.f32 %v514_v60, %v466_v63  ;;  %v470_v15 = vpop.f32.mrb[7].mxu0  ;;  %v1573_v16 = vpop.f32.mrb[7].mxu1 }
 0x201   : > { %v525_v20 = vadd.f32 %v523_v11, %v468_v10 }
 0x202   : > { %v1497_v18 = vmul.f32 -1.442695, %v515_v14 }
 0x203   : > { %v1498_v21 = vmul.f32 -1.442695, %v525_v20 }
 0x204   : > { %1686 = vpow2.f32 %v1497_v18 }
 0x205   : > { %1688 = vpow2.f32 %v1498_v21 }
 0x20e   : > { %v1687_v22 = vpop.eup %1686 }
 0x20f   : > { %v519_v23 = vadd.f32 1.0, %v1687_v22  ;;  %v1689_v24 = vpop.eup %1688 }
 0x210   : > { %v529_v25 = vadd.f32 1.0, %v1689_v24 }
 0x211   : > { %1690 = vrcp.f32 %v519_v23  ;;  %v1506_v23 = vld [vmem:[%s1870_s6 + $0x9] sm:$0x7] }
 0x212   : > { %1692 = vrcp.f32 %v529_v25  ;;  %v768_v24 = vunpack.c.l.bf16 %v1506_v23 }
 0x21b   : > { %v1691_v28 = vpop.eup %1690 }
 0x21c   : > { %v532_v29 = vmul.f32 %v1691_v28, %v507_v26  ;;  %v1693_v31 = vpop.eup %1692 }
 0x21d   : > { %v537_v32 = vsub.f32 1.0, %v1693_v31  ;;  %v539_v34 = vmul.f32 %v1693_v31, %v412_v55  ;;  %v777_v31 = vrot.slane %v768_v24, 2 }
 0x21e   : > { %v535_v30 = vadd.f32 %v533_v27, %v532_v29 }
 0x220   : > { %1694 = vtanh.f32 %v535_v30 }
 0x22a   : > { %v1695_v33 = vpop.eup %1694 }
 0x22b   : > { %v538_v35 = vmul.f32 %v1695_v33, %v537_v32 }
 0x22d   : > { %v540_v36 = vadd.f32 %v539_v34, %v538_v35 }
 0x22f   : > { %v548_v37 = vrot.slane %v540_v36, %v1948_v52  ;;  %v554_v39 = vpack.c.bf16 %v540_v36, %v540_v36 }
 0x231   : > { %v549_v40 = vcombine.high %v548_v37, %v548_v37  ;;  %552 = vst.msk [vmem:[#allocation3 + $0x1] sm:$0x1] %vm424_vm3, %v548_v37  ;;  %1499 = vmatmul.mubr.msk.bf16.vlgmr.msra.gmra.mrb[8].mxu0 %vm300_vm2, %v554_v39  ;;  %1579 = vmatmul.mubr.msk.bf16.vlgmr.msra.gmra.mrb[8].mxu1 %vm300_vm2, %v554_v39 }
 0x232   : > { %686 = vmatpush1.bf16.msra.mxu0 %v1883_v2  ;;  %1583 = vmatpush3.bf16.msra.mxu1 %v1904_v8 }
 0x233   : > { %553 = vst.msk [vmem:[#allocation3 + $0x9] sm:$0x1] %vm424_vm3, %v549_v40  ;;  %687 = vmatprep.subr.bf16.mxu0 %v1890_v4  ;;  %1584 = vmatprep.subr.bf16.mxu1 %v1798_v7 }
 0x234   : > { %717 = vmatprep.mubr.bf16.mxu0 %v1797_v3  ;;  %1586 = vmatprep.mubr.msk.bf16.mxu1 %vm1799_vm1, %v1798_v7 }
 0x236   : > { %688 = vmatpush1.bf16.msra.mxu0 %v1895_v5  ;;  %1585 = vmatpush3.bf16.msra.mxu1 %v1913_v9 }
 0x237   : > { %812 = vmatprep.subr.bf16.mxu0 %v1878_v1  ;;  %1590 = vmatprep.subr.bf16.mxu1 %v1798_v7 }
 0x304   : > { %v592_v43 = vpop.f32.mrb[8].mxu0  ;;  %v633_v44 = vpop.f32.mrb[8].mxu1 }
 0x305   : > { %v593_v45 = vadd.f32 %v592_v43, %v1939_v17  ;;  %v594_v46 = vpop.f32.mrb[9].mxu0  ;;  %v1580_v47 = vpop.f32.mrb[9].mxu1  ;;  %v634_v63 = vadd.f32 %v633_v44, %v1945_v38 }
 0x306   : > { %v595_v48 = vadd.f32 %v594_v46, %v1941_v19  ;;  %v596_v50 = vpop.f32.mrb[10].mxu0  ;;  %v636_v51 = vpop.f32.mrb[10].mxu1  ;;  %v787_v46 = vrot.slane %v768_v24, 4 }
 0x307   : > { %v642_v53 = vadd.f32 %v641_v42, %v593_v45  ;;  %v597_v54 = vpop.f32.mrb[11].mxu0  ;;  %v1581_v55 = vpop.f32.mrb[11].mxu1 }
 0x308   : > { %v652_v57 = vadd.f32 %v650_v49, %v595_v48 }
 0x309   : > { %v1502_v56 = vmul.f32 -1.442695, %v642_v53 }
 0x30a   : > { %v1503_v58 = vmul.f32 -1.442695, %v652_v57 }
 0x30b   : > { %1696 = vpow2.f32 %v1502_v56 }
 0x30c   : > { %1698 = vpow2.f32 %v1503_v58 }
 0x315   : > { %v1697_v59 = vpop.eup %1696 }
 0x316   : > { %v646_v60 = vadd.f32 1.0, %v1697_v59  ;;  %v1699_v61 = vpop.eup %1698 }
 0x317   : > { %v656_v62 = vadd.f32 1.0, %v1699_v61 }
 0x318   : > { %1700 = vrcp.f32 %v646_v60  ;;  %v1511_v60 = vld [vmem:[%s1870_s6 + $0xc] sm:$0x7] }
 0x319   : > { %1702 = vrcp.f32 %v656_v62  ;;  %v895_v61 = vunpack.c.l.bf16 %v1511_v60 }
 0x322   : > { %v1701_v6 = vpop.eup %1700 }
 0x323   : > { %v659_v10 = vmul.f32 %v1701_v6, %v634_v63  ;;  %v1703_v12 = vpop.eup %1702 }
 0x324   : > { %v664_v13 = vsub.f32 1.0, %v1703_v12  ;;  %v666_v15 = vmul.f32 %v1703_v12, %v540_v36  ;;  %v904_v12 = vrot.slane %v895_v61, 2 }
 0x325   : > { %v662_v11 = vadd.f32 %v660_v0, %v659_v10 }
 0x327   : > { %1704 = vtanh.f32 %v662_v11 }
 0x331   : > { %v1705_v14 = vpop.eup %1704 }
 0x332   : > { %v665_v16 = vmul.f32 %v1705_v14, %v664_v13 }
 0x334   : > { %v667_v18 = vadd.f32 %v666_v15, %v665_v16 }
 0x336   : > { %v675_v20 = vrot.slane %v667_v18, %v1948_v52  ;;  %v681_v21 = vpack.c.bf16 %v667_v18, %v667_v18 }
 0x338   : > { %v676_v22 = vcombine.high %v675_v20, %v675_v20  ;;  %679 = vst.msk [vmem:[#allocation3 + $0x2] sm:$0x1] %vm424_vm3, %v675_v20  ;;  %1504 = vmatmul.mubr.msk.bf16.vlgmr.msra.gmra.mrb[12].mxu0 %vm300_vm2, %v681_v21  ;;  %1587 = vmatmul.mubr.msk.bf16.vlgmr.msra.gmra.mrb[12].mxu1 %vm300_vm2, %v681_v21 }
 0x339   : > { %813 = vmatpush1.bf16.msra.mxu0 %v1883_v2  ;;  %1591 = vmatpush3.bf16.msra.mxu1 %v1904_v8 }
 0x33a   : > { %680 = vst.msk [vmem:[#allocation3 + $0xa] sm:$0x1] %vm424_vm3, %v676_v22  ;;  %814 = vmatprep.subr.bf16.mxu0 %v1890_v4  ;;  %1592 = vmatprep.subr.bf16.mxu1 %v1798_v7 }
 0x33b   : > { %844 = vmatprep.mubr.bf16.mxu0 %v1797_v3  ;;  %1594 = vmatprep.mubr.msk.bf16.mxu1 %vm1799_vm1, %v1798_v7 }
 0x33d   : > { %815 = vmatpush1.bf16.msra.mxu0 %v1895_v5  ;;  %1593 = vmatpush3.bf16.msra.mxu1 %v1913_v9 }
 0x33e   : > { %939 = vmatprep.subr.bf16.mxu0 %v1878_v1  ;;  %1598 = vmatprep.subr.bf16.mxu1 %v1798_v7 }
 0x40b   : > { %v719_v25 = vpop.f32.mrb[12].mxu0  ;;  %v760_v26 = vpop.f32.mrb[12].mxu1 }
 0x40c   : > { %v720_v27 = vadd.f32 %v719_v25, %v1939_v17  ;;  %v721_v28 = vpop.f32.mrb[13].mxu0  ;;  %v1588_v29 = vpop.f32.mrb[13].mxu1  ;;  %v761_v45 = vadd.f32 %v760_v26, %v1945_v38 }
 0x40d   : > { %v722_v30 = vadd.f32 %v721_v28, %v1941_v19  ;;  %v723_v32 = vpop.f32.mrb[14].mxu0  ;;  %v763_v33 = vpop.f32.mrb[14].mxu1  ;;  %v914_v28 = vrot.slane %v895_v61, 4 }
 0x40e   : > { %v769_v34 = vadd.f32 %v768_v24, %v720_v27  ;;  %v724_v35 = vpop.f32.mrb[15].mxu0  ;;  %v1589_v36 = vpop.f32.mrb[15].mxu1 }
 0x40f   : > { %v779_v39 = vadd.f32 %v777_v31, %v722_v30 }
 0x410   : > { %v1507_v37 = vmul.f32 -1.442695, %v769_v34 }
 0x411   : > { %v1508_v40 = vmul.f32 -1.442695, %v779_v39 }
 0x412   : > { %1706 = vpow2.f32 %v1507_v37 }
 0x413   : > { %1708 = vpow2.f32 %v1508_v40 }
 0x41c   : > { %v1707_v41 = vpop.eup %1706 }
 0x41d   : > { %v773_v42 = vadd.f32 1.0, %v1707_v41  ;;  %v1709_v43 = vpop.eup %1708 }
 0x41e   : > { %v783_v44 = vadd.f32 1.0, %v1709_v43 }
 0x41f   : > { %1710 = vrcp.f32 %v773_v42  ;;  %v1516_v42 = vld [vmem:[%s1870_s6 + $0xf] sm:$0x7] }
 0x420   : > { %1712 = vrcp.f32 %v783_v44  ;;  %v1022_v43 = vunpack.c.l.bf16 %v1516_v42 }
 0x429   : > { %v1711_v47 = vpop.eup %1710 }
 0x42a   : > { %v786_v48 = vmul.f32 %v1711_v47, %v761_v45  ;;  %v1713_v50 = vpop.eup %1712 }
 0x42b   : > { %v791_v51 = vsub.f32 1.0, %v1713_v50  ;;  %v793_v54 = vmul.f32 %v1713_v50, %v667_v18  ;;  %v1031_v50 = vrot.slane %v1022_v43, 2 }
 0x42c   : > { %v789_v49 = vadd.f32 %v787_v46, %v786_v48 }
 0x42e   : > { %1714 = vtanh.f32 %v789_v49 }
 0x438   : > { %v1715_v53 = vpop.eup %1714 }
 0x439   : > { %v792_v55 = vmul.f32 %v1715_v53, %v791_v51 }
 0x43b   : > { %v794_v56 = vadd.f32 %v793_v54, %v792_v55 }
 0x43d   : > { %v802_v57 = vrot.slane %v794_v56, %v1948_v52  ;;  %v808_v58 = vpack.c.bf16 %v794_v56, %v794_v56 }
 0x43f   : > { %v803_v59 = vcombine.high %v802_v57, %v802_v57  ;;  %806 = vst.msk [vmem:[#allocation3 + $0x3] sm:$0x1] %vm424_vm3, %v802_v57  ;;  %1509 = vmatmul.mubr.msk.bf16.vlgmr.msra.gmra.mrb[16].mxu0 %vm300_vm2, %v808_v58  ;;  %1595 = vmatmul.mubr.msk.bf16.vlgmr.msra.gmra.mrb[16].mxu1 %vm300_vm2, %v808_v58 }
 0x440   : > { %940 = vmatpush1.bf16.msra.mxu0 %v1883_v2  ;;  %1599 = vmatpush3.bf16.msra.mxu1 %v1904_v8 }
 0x441   : > { %807 = vst.msk [vmem:[#allocation3 + $0xb] sm:$0x1] %vm424_vm3, %v803_v59  ;;  %941 = vmatprep.subr.bf16.mxu0 %v1890_v4  ;;  %1600 = vmatprep.subr.bf16.mxu1 %v1798_v7 }
 0x442   : > { %971 = vmatprep.mubr.bf16.mxu0 %v1797_v3  ;;  %1602 = vmatprep.mubr.msk.bf16.mxu1 %vm1799_vm1, %v1798_v7 }
 0x444   : > { %942 = vmatpush1.bf16.msra.mxu0 %v1895_v5  ;;  %1601 = vmatpush3.bf16.msra.mxu1 %v1913_v9 }
 0x445   : > { %1066 = vmatprep.subr.bf16.mxu0 %v1878_v1  ;;  %1606 = vmatprep.subr.bf16.mxu1 %v1798_v7 }
 0x512   : > { %v846_v62 = vpop.f32.mrb[16].mxu0  ;;  %v887_v63 = vpop.f32.mrb[16].mxu1 }
 0x513   : > { %v847_v0 = vadd.f32 %v846_v62, %v1939_v17  ;;  %v848_v6 = vpop.f32.mrb[17].mxu0  ;;  %v1596_v10 = vpop.f32.mrb[17].mxu1  ;;  %v888_v27 = vadd.f32 %v887_v63, %v1945_v38 }
 0x514   : > { %v849_v11 = vadd.f32 %v848_v6, %v1941_v19  ;;  %v850_v13 = vpop.f32.mrb[18].mxu0  ;;  %v890_v14 = vpop.f32.mrb[18].mxu1 }
 0x515   : > { %v896_v15 = vadd.f32 %v895_v61, %v847_v0  ;;  %v851_v16 = vpop.f32.mrb[19].mxu0  ;;  %v1597_v18 = vpop.f32.mrb[19].mxu1  ;;  %v1041_v0 = vrot.slane %v1022_v43, 4 }
 0x516   : > { %v906_v21 = vadd.f32 %v904_v12, %v849_v11 }
 0x517   : > { %v1512_v20 = vmul.f32 -1.442695, %v896_v15 }
 0x518   : > { %v1513_v22 = vmul.f32 -1.442695, %v906_v21 }
 0x519   : > { %1716 = vpow2.f32 %v1512_v20 }
 0x51a   : > { %1718 = vpow2.f32 %v1513_v22 }
 0x523   : > { %v1717_v23 = vpop.eup %1716 }
 0x524   : > { %v900_v24 = vadd.f32 1.0, %v1717_v23  ;;  %v1719_v25 = vpop.eup %1718  ;;  %v1521_v23 = vld [vmem:[%s1870_s6 + $0x12] sm:$0x7] }
 0x525   : > { %v910_v26 = vadd.f32 1.0, %v1719_v25 }
 0x526   : > { %1720 = vrcp.f32 %v900_v24  ;;  %v1149_v24 = vunpack.c.l.bf16 %v1521_v23 }
 0x527   : > { %1722 = vrcp.f32 %v910_v26 }
 0x530   : > { %v1721_v29 = vpop.eup %1720 }
 0x531   : > { %v913_v30 = vmul.f32 %v1721_v29, %v888_v27  ;;  %v1723_v32 = vpop.eup %1722 }
 0x532   : > { %v918_v33 = vsub.f32 1.0, %v1723_v32  ;;  %v920_v35 = vmul.f32 %v1723_v32, %v794_v56 }
 0x533   : > { %v916_v31 = vadd.f32 %v914_v28, %v913_v30  ;;  %v1158_v28 = vrot.slane %v1149_v24, 2 }
 0x535   : > { %1724 = vtanh.f32 %v916_v31 }
 0x53f   : > { %v1725_v34 = vpop.eup %1724 }
 0x540   : > { %v919_v36 = vmul.f32 %v1725_v34, %v918_v33 }
 0x542   : > { %v921_v37 = vadd.f32 %v920_v35, %v919_v36 }
 0x544   : > { %v929_v39 = vrot.slane %v921_v37, %v1948_v52  ;;  %v935_v40 = vpack.c.bf16 %v921_v37, %v921_v37 }
 0x546   : > { %v930_v41 = vcombine.high %v929_v39, %v929_v39  ;;  %933 = vst.msk [vmem:[#allocation3 + $0x4] sm:$0x1] %vm424_vm3, %v929_v39  ;;  %1514 = vmatmul.mubr.msk.bf16.vlgmr.msra.gmra.mrb[20].mxu0 %vm300_vm2, %v935_v40  ;;  %1603 = vmatmul.mubr.msk.bf16.vlgmr.msra.gmra.mrb[20].mxu1 %vm300_vm2, %v935_v40  ;;  %v1168_v39 = vrot.slane %v1149_v24, 4 }
 0x547   : > { %1067 = vmatpush1.bf16.msra.mxu0 %v1883_v2  ;;  %1607 = vmatpush3.bf16.msra.mxu1 %v1904_v8 }
 0x548   : > { %934 = vst.msk [vmem:[#allocation3 + $0xc] sm:$0x1] %vm424_vm3, %v930_v41  ;;  %1068 = vmatprep.subr.bf16.mxu0 %v1890_v4  ;;  %1608 = vmatprep.subr.bf16.mxu1 %v1798_v7 }
 0x549   : > { %1098 = vmatprep.mubr.bf16.mxu0 %v1797_v3  ;;  %1610 = vmatprep.mubr.msk.bf16.mxu1 %vm1799_vm1, %v1798_v7 }
 0x54b   : > { %1069 = vmatpush1.bf16.msra.mxu0 %v1895_v5  ;;  %1609 = vmatpush3.bf16.msra.mxu1 %v1913_v9 }
 0x54c   : > { %1193 = vmatprep.subr.bf16.mxu0 %v1878_v1  ;;  %1614 = vmatprep.subr.bf16.mxu1 %v1798_v7 }
 0x619   : > { %v973_v44 = vpop.f32.mrb[20].mxu0  ;;  %v1014_v45 = vpop.f32.mrb[20].mxu1 }
 0x61a   : > { %v974_v46 = vadd.f32 %v973_v44, %v1939_v17  ;;  %v975_v47 = vpop.f32.mrb[21].mxu0  ;;  %v1604_v48 = vpop.f32.mrb[21].mxu1  ;;  %v1015_v63 = vadd.f32 %v1014_v45, %v1945_v38 }
 0x61b   : > { %v976_v49 = vadd.f32 %v975_v47, %v1941_v19  ;;  %v977_v51 = vpop.f32.mrb[22].mxu0  ;;  %v1017_v53 = vpop.f32.mrb[22].mxu1 }
 0x61c   : > { %v1023_v54 = vadd.f32 %v1022_v43, %v974_v46  ;;  %v978_v55 = vpop.f32.mrb[23].mxu0  ;;  %v1605_v56 = vpop.f32.mrb[23].mxu1  ;;  %v1526_v53 = vld [vmem:[%s1870_s6 + $0x15] sm:$0x7] }
 0x61d   : > { %v1033_v1 = vadd.f32 %v1031_v50, %v976_v49 }
 0x61e   : > { %v1517_v57 = vmul.f32 -1.442695, %v1023_v54  ;;  %v1276_v54 = vunpack.c.l.bf16 %v1526_v53 }
 0x61f   : > { %v1518_v58 = vmul.f32 -1.442695, %v1033_v1 }
 0x620   : > { %1726 = vpow2.f32 %v1517_v57 }
 0x621   : > { %1728 = vpow2.f32 %v1518_v58 }
 0x62a   : > { %v1727_v59 = vpop.eup %1726 }
 0x62b   : > { %v1027_v60 = vadd.f32 1.0, %v1727_v59  ;;  %v1729_v61 = vpop.eup %1728 }
 0x62c   : > { %v1037_v62 = vadd.f32 1.0, %v1729_v61 }
 0x62d   : > { %1730 = vrcp.f32 %v1027_v60  ;;  %v1285_v60 = vrot.slane %v1276_v54, 2 }
 0x62e   : > { %1732 = vrcp.f32 %v1037_v62 }
 0x637   : > { %v1731_v6 = vpop.eup %1730 }
 0x638   : > { %v1040_v10 = vmul.f32 %v1731_v6, %v1015_v63  ;;  %v1733_v12 = vpop.eup %1732 }
 0x639   : > { %v1045_v13 = vsub.f32 1.0, %v1733_v12  ;;  %v1047_v15 = vmul.f32 %v1733_v12, %v921_v37 }
 0x63a   : > { %v1043_v11 = vadd.f32 %v1041_v0, %v1040_v10 }
 0x63c   : > { %1734 = vtanh.f32 %v1043_v11 }
 0x646   : > { %v1735_v14 = vpop.eup %1734 }
 0x647   : > { %v1046_v16 = vmul.f32 %v1735_v14, %v1045_v13 }
 0x649   : > { %v1048_v18 = vadd.f32 %v1047_v15, %v1046_v16 }
 0x64b   : > { %v1056_v20 = vrot.slane %v1048_v18, %v1948_v52  ;;  %v1062_v21 = vpack.c.bf16 %v1048_v18, %v1048_v18 }
 0x64d   : > { %v1057_v22 = vcombine.high %v1056_v20, %v1056_v20  ;;  %1060 = vst.msk [vmem:[#allocation3 + $0x5] sm:$0x1] %vm424_vm3, %v1056_v20  ;;  %1519 = vmatmul.mubr.msk.bf16.vlgmr.msra.gmra.mrb[24].mxu0 %vm300_vm2, %v1062_v21  ;;  %1611 = vmatmul.mubr.msk.bf16.vlgmr.msra.gmra.mrb[24].mxu1 %vm300_vm2, %v1062_v21 }
 0x64e   : > { %1194 = vmatpush1.bf16.msra.mxu0 %v1883_v2  ;;  %1615 = vmatpush3.bf16.msra.mxu1 %v1904_v8 }
 0x64f   : > { %1061 = vst.msk [vmem:[#allocation3 + $0xd] sm:$0x1] %vm424_vm3, %v1057_v22  ;;  %1195 = vmatprep.subr.bf16.mxu0 %v1890_v4  ;;  %1616 = vmatprep.subr.bf16.mxu1 %v1798_v7 }
 0x650   : > { %1225 = vmatprep.mubr.bf16.mxu0 %v1797_v3  ;;  %1618 = vmatprep.mubr.msk.bf16.mxu1 %vm1799_vm1, %v1798_v7 }
 0x652   : > { %1196 = vmatpush1.bf16.msra.mxu0 %v1895_v5  ;;  %1617 = vmatpush3.bf16.msra.mxu1 %v1913_v9 }
 0x720   : > { %v1100_v2 = vpop.f32.mrb[24].mxu0  ;;  %v1141_v25 = vpop.f32.mrb[24].mxu1 }
 0x721   : > { %v1101_v8 = vadd.f32 %v1100_v2, %v1939_v17  ;;  %v1102_v26 = vpop.f32.mrb[25].mxu0  ;;  %v1612_v27 = vpop.f32.mrb[25].mxu1  ;;  %v1142_v37 = vadd.f32 %v1141_v25, %v1945_v38 }
 0x722   : > { %v1103_v4 = vadd.f32 %v1102_v26, %v1941_v19  ;;  %v1104_v29 = vpop.f32.mrb[26].mxu0  ;;  %v1144_v3 = vpop.f32.mrb[26].mxu1 }
 0x723   : > { %v1150_v30 = vadd.f32 %v1149_v24, %v1101_v8  ;;  %v1105_v31 = vpop.f32.mrb[27].mxu0  ;;  %v1613_v7 = vpop.f32.mrb[27].mxu1 }
 0x724   : > { %v1160_v5 = vadd.f32 %v1158_v28, %v1103_v4 }
 0x725   : > { %v1522_v32 = vmul.f32 -1.442695, %v1150_v30 }
 0x726   : > { %v1523_v9 = vmul.f32 -1.442695, %v1160_v5 }
 0x727   : > { %1736 = vpow2.f32 %v1522_v32 }
 0x728   : > { %1738 = vpow2.f32 %v1523_v9 }
 0x731   : > { %v1737_v33 = vpop.eup %1736 }
 0x732   : > { %v1154_v34 = vadd.f32 1.0, %v1737_v33  ;;  %v1739_v35 = vpop.eup %1738 }
 0x733   : > { %v1164_v36 = vadd.f32 1.0, %v1739_v35 }
 0x734   : > { %1740 = vrcp.f32 %v1154_v34 }
 0x735   : > { %1742 = vrcp.f32 %v1164_v36 }
 0x73e   : > { %v1741_v40 = vpop.eup %1740 }
 0x73f   : > { %v1167_v41 = vmul.f32 %v1741_v40, %v1142_v37  ;;  %v1743_v43 = vpop.eup %1742 }
 0x740   : > { %v1172_v44 = vsub.f32 1.0, %v1743_v43  ;;  %v1174_v46 = vmul.f32 %v1743_v43, %v1048_v18  ;;  %v1295_v18 = vrot.slane %v1276_v54, 4 }
 0x741   : > { %v1170_v42 = vadd.f32 %v1168_v39, %v1167_v41 }
 0x743   : > { %1744 = vtanh.f32 %v1170_v42 }
 0x74d   : > { %v1745_v45 = vpop.eup %1744 }
 0x74e   : > { %v1173_v47 = vmul.f32 %v1745_v45, %v1172_v44 }
 0x750   : > { %v1175_v48 = vadd.f32 %v1174_v46, %v1173_v47 }
 0x752   : > { %v1183_v49 = vrot.slane %v1175_v48, %v1948_v52  ;;  %v1189_v50 = vpack.c.bf16 %v1175_v48, %v1175_v48 }
 0x754   : > { %v1184_v51 = vcombine.high %v1183_v49, %v1183_v49  ;;  %1187 = vst.msk [vmem:[#allocation3 + $0x6] sm:$0x1] %vm424_vm3, %v1183_v49  ;;  %1524 = vmatmul.mubr.msk.bf16.vlgmr.msra.gmra.mrb[28].mxu0 %vm300_vm2, %v1189_v50  ;;  %1619 = vmatmul.mubr.msk.bf16.vlgmr.msra.gmra.mrb[28].mxu1 %vm300_vm2, %v1189_v50 }
 0x756   : > { %1188 = vst.msk [vmem:[#allocation3 + $0xe] sm:$0x1] %vm424_vm3, %v1184_v51 }
 0x827   : > { %v1227_v55 = vpop.f32.mrb[28].mxu0  ;;  %v1268_v56 = vpop.f32.mrb[28].mxu1 }
 0x828   : > { %v1228_v57 = vadd.f32 %v1227_v55, %v1939_v17  ;;  %v1229_v1 = vpop.f32.mrb[29].mxu0  ;;  %v1620_v58 = vpop.f32.mrb[29].mxu1  ;;  %v1269_v16 = vadd.f32 %v1268_v56, %v1945_v38 }
 0x829   : > { %v1230_v59 = vadd.f32 %v1229_v1, %v1941_v19  ;;  %v1231_v61 = vpop.f32.mrb[30].mxu0  ;;  %v1271_v62 = vpop.f32.mrb[30].mxu1 }
 0x82a   : > { %v1277_v63 = vadd.f32 %v1276_v54, %v1228_v57  ;;  %v1232_v0 = vpop.f32.mrb[31].mxu0  ;;  %v1621_v6 = vpop.f32.mrb[31].mxu1 }
 0x82b   : > { %v1287_v11 = vadd.f32 %v1285_v60, %v1230_v59 }
 0x82c   : > { %v1527_v10 = vmul.f32 -1.442695, %v1277_v63 }
 0x82d   : > { %v1528_v12 = vmul.f32 -1.442695, %v1287_v11 }
 0x82e   : > { %1746 = vpow2.f32 %v1527_v10 }
 0x82f   : > { %1748 = vpow2.f32 %v1528_v12 }
 0x838   : > { %v1747_v13 = vpop.eup %1746 }
 0x839   : > { %v1281_v14 = vadd.f32 1.0, %v1747_v13  ;;  %v1749_v15 = vpop.eup %1748 }
 0x83a   : > { %v1291_v17 = vadd.f32 1.0, %v1749_v15 }
 0x83b   : > { %1750 = vrcp.f32 %v1281_v14 }
 0x83c   : > { %1752 = vrcp.f32 %v1291_v17 }
 0x845   : > { %v1751_v19 = vpop.eup %1750 }
 0x846   : > { %v1294_v20 = vmul.f32 %v1751_v19, %v1269_v16  ;;  %v1753_v22 = vpop.eup %1752 }
 0x847   : > { %v1299_v23 = vsub.f32 1.0, %v1753_v22  ;;  %v1301_v25 = vmul.f32 %v1753_v22, %v1175_v48 }
 0x848   : > { %v1297_v21 = vadd.f32 %v1295_v18, %v1294_v20 }
 0x84a   : > { %1754 = vtanh.f32 %v1297_v21 }
 0x854   : > { %v1755_v24 = vpop.eup %1754 }
 0x855   : > { %v1300_v2 = vmul.f32 %v1755_v24, %v1299_v23 }
 0x857   : > { %v1302_v8 = vadd.f32 %v1301_v25, %v1300_v2 }
 0x859   : > { %v1310_v26 = vrot.slane %v1302_v8, %v1948_v52  ;;  %1317 = vst.msk [vmem:[#allocation2] sm:$0x3] %vm1316_vm4, %v1302_v8  ;;  %1325 = vst.msk [vmem:[%s2113_s4] sm:$0x3] %vm1316_vm4, %v1302_v8 }
 0x85b   : > { %v1311_v38 = vcombine.high %v1310_v26, %v1310_v26  ;;  %1314 = vst.msk [vmem:[#allocation3 + $0x7] sm:$0x1] %vm424_vm3, %v1310_v26 }
 0x85d   : > { %1315 = vst.msk [vmem:[#allocation3 + $0xf] sm:$0x1] %vm424_vm3, %v1311_v38 }
 0x861   : > { %1336 = sbr.rel (!%p1855_p3) target bundleno = 2160 (0x870), region = 40 }
 0x862   : > { %v1318_v27 = vld [vmem:[#allocation3] sm:$0xff] }
 0x863   : > { %v1320_v4 = vpack.c.bf16 %v1318_v27, %v1318_v27 }
 0x864   : > { %v1319_v28 = vld [vmem:[#allocation3 + $0x8] sm:$0xff] }
 0x865   : > { %v1321_v29 = vpack.c.bf16 %v1319_v28, %v1319_v28  ;;  %1323 = vst.msk [vmem:[%s1872_s7] sm:$0xf] %vm1322_vm5, %v1320_v4 }
 0x867   : > { %1324 = vst.msk [vmem:[%s1872_s7 + $0x4] sm:$0xf] %vm1322_vm5, %v1321_v29 }
 0x86c   : > { %v1357_v52 = vld [vmem:[%s1872_s7] sm:$0xf] }
 0x86d   : > { %1358 = vst [vmem:[%s1341_s9] sm:$0xf] %v1357_v52 }
 0x86e   : > { %v1359_v3 = vld [vmem:[%s1872_s7 + $0x4] sm:$0xf] }
 0x86f   : > { %1360 = vst [vmem:[%s1341_s9 + $0x8] sm:$0xf] %v1359_v3 }
 0x870 PF: > { %s15_s19 = sadd.s32 1, %s1794_s19   ;;  %s2115_s15 = smov %s1782_s16 }
 0x871   : > { %p12_p10 = scmp.ge.s32.totalorder %s15_s19, 4   ;;  %s2116_s16 = smov %s1864_s25 }
 0x872   : > { %s2117_s17 = smov %s1790_s18  ;;  %s2118_s18 = smov %s2120_s21 }
 0x873   :  { %14 = sbr.rel (!%p12_p10) target bundleno = 3 (0x3), region = 126 }

// kernel: seq2seq_with_attention_forward.4
= control target key start
LH: loop header
LB: loop body
LE: loop exit
PB: predicated region body
PF: predicated region fallthrough
CT: control target
= control target key end

     0   :  { %15 = vsyncpa [#allocation7], 0  ;;  %s6230_s0 = inlined_call_operand.vmem [shape: bf16[16,2,384], index: 0, kind: input, shape index: {}]   ;;  %s6231_s1 = inlined_call_operand.vmem [shape: f32[2,32], index: 1, kind: input, shape index: {}]   ;;  %s6232_s2 = inlined_call_operand.vmem [shape: bf16[2,16,32], index: 2, kind: input, shape index: {}]   ;;  %s6233_s3 = inlined_call_operand.vmem [shape: bf16[2,32,16], index: 3, kind: input, shape index: {}]   ;;  %s6234_s4 = inlined_call_operand.vmem [shape: bf16[32,384], index: 4, kind: input, shape index: {}]   ;;  %s6235_s5 = inlined_call_operand.vmem [shape: f32[1,384], index: 5, kind: input, shape index: {}]   ;;  %s6236_s6 = inlined_call_operand.vmem [shape: bf16[64,32], index: 6, kind: input, shape index: {}]   ;;  %s6237_s7 = inlined_call_operand.vmem [shape: f32[1,32], index: 7, kind: input, shape index: {}]   ;;  %s6238_s8 = inlined_call_operand.vmem [shape: bf16[2,16,32], index: 8, kind: output, shape index: {0}]   ;;  %s6239_s9 = inlined_call_operand.hbm [shape: f32[2,16,16], index: 9, kind: output, shape index: {1}]  }
   0x1   :  { %17 = vsyncpa [#allocation7 + $0x1], 0  ;;  %s5237_s30 = smov 0   ;;  %s5239_s10 = smov 0  }
   0x2   :  { %s5241_s11 = smov 0   ;;  %s5243_s12 = smov 0  }
   0x3   :  { %s5245_s13 = smov 0   ;;  %s5247_s14 = smov 0  }
   0x4 LB: > { %6242 = sst [smem:[#allocation9_spill]] %s5172_s13  ;;  %s4187_s15 = sadd.s32 4294967295, %s5176_s14   ;;  %s5176_s14 = sphi %s5247_s14, %s23_s14   ;;  %s5172_s13 = sphi %s5245_s13, %s6247_s13   ;;  %s5168_s12 = sphi %s5243_s12, %s6246_s12   ;;  %s5164_s11 = sphi %s5241_s11, %s6250_s11   ;;  %s5160_s10 = sphi %s5239_s10, %s6249_s10   ;;  %s5156_s30 = sphi %s5237_s30, %s6248_s30  }
   0x5   : > { %s4188_s16 = sadd.s32 4294967294, %s5176_s14   ;;  %s32_s17 = sadd.s32 1, %s5172_s13 }
   0x6   : > { %s234_s18 = sadd.s32 1, %s5164_s11  ;;  %p33_p0 = scmp.ge.s32.totalorder %s32_s17, 2 }
   0x7   : > { %p244_p1 = scmp.ne.s32.totalorder %s5164_s11, %s5160_s10  ;;  %p245_p2 = scmp.eq.s32.totalorder %s4187_s15, 1 }
   0x8   : > { %p278_p3 = scmp.ne.s32.totalorder %s5160_s10, %s5156_s30  ;;  %s6252_s17 = smov (%p33_p0, %s32_s17), 0 }
   0x9   : > { %6243 = sst [smem:[#allocation10_spill]] %s6252_s17  ;;  %p5277_p4 = por %p245_p2, %p244_p1 }
   0xa   : > { %p279_p5 = scmp.eq.s32.totalorder %s4188_s16, 1  ;;  %s230_s20 = ssub.s32 %s5172_s13, %s6252_s17 }
   0xb   : > { %p4194_p6 = scmp.ge.s32.totalorder %s5176_s14, 1  ;;  %p232_p7 = scmp.eq.s32.totalorder %s230_s20, 0 }
   0xc   : > { %p5284_p8 = por %p279_p5, %p278_p3  ;;  %p349_p9 = scmp.lt.s32.totalorder %s5176_s14, 3 }
   0xd   : > { %s5290_s22 = scalar_select %p232_p7, %s5164_s11, %s234_s18  }
   0xe   : > { %p350_p10 = pnand %p4194_p6, %p349_p9 }
   0xf   : > { %s5293_s23 = sand.u32 (!%p350_p10), 1, %s5160_s10   ;;  %s4197_s24 = sshll.u32 (!%p350_p10), %s5168_s12, 3 }
  0x10   : > { %353 = sbr.rel (%p350_p10) target bundleno = 7520 (0x1d60), region = 52  ;;  %s4195_s25 = sshll.u32 (!%p350_p10), %s5293_s23, 3 }
  0x11   : > { %s4196_s26 = sshll.u32 (!%p350_p10), %s5293_s23, 4  ;;  %p410_p11 = scmp.lt.s32.totalorder (!%p350_p10), %s4197_s24, 15 }
  0x12   : > { %s5303_s16 = scalar_lea.vmem (!%p350_p10), [#allocation5], %s4195_s25  ;;  %s5305_s18 = scalar_lea.vmem (!%p350_p10), [#allocation6], %s4196_s26 }
  0x13   : > { %p4198_p12 = scmp.ne.s32.totalorder (!%p350_p10), %s5168_s12, 0 }
  0x17   : > { %s6254_s24 = smov (!%p410_p11, %s4197_s24), 15  ;;  %443 = sbr.rel (%p4198_p12) target bundleno = 30 (0x1e), region = 56 }
  0x18   : > { %s4837_s27 = smul.u32 3, %s6254_s24  ;;  %v444_v0 = vld [vmem:[%s6231_s1] sm:$0x3] (!%p4198_p12)  ;;  %vm445_vm0 = vcmask (!%p4198_p12), 254976  }
  0x19   : > { %446 = vst.msk [vmem:[#allocation2] sm:$0x3] (!%p4198_p12), %vm445_vm0, %v444_v0 }
  0x1a   : > { %s5301_s15 = scalar_lea.vmem %s6230_s0, %s4837_s27 }
  0x1e PF: > { %v5314_v1 = vld [vmem:[%s6234_s4 + $0x4] ss:$12 sps:$4 sm:$0xff]   ;;  %v5319_v2 = vld [vmem:[%s6234_s4] ss:$12 sps:$4 sm:$0xff]   ;;  %v5178_v3 = vmov 0   ;;  %v5179_v6 = vmov 0.0   ;;  %v457_v15 = vlaneseq }
  0x1f   : > { %569 = vmatprep.mubr.bf16.mxu1 %v5178_v3  ;;  %537 = vmatprep.subr.bf16.mxu1 %v5314_v1  ;;  %v5326_v4 = vld [vmem:[%s6234_s4 + $0x1c] ss:$12 sps:$4 sm:$0xff]   ;;  %v5331_v5 = vld [vmem:[%s6234_s4 + $0x18] ss:$12 sps:$4 sm:$0xff]   ;;  %vm5180_vm1 = vmmov 0   ;;  %vm533_vm2 = vcmask 261120  }
  0x20   : > { %4461 = vmatprep.subr.bf16.mxu0 %v5179_v6  ;;  %538 = vmatpush1.bf16.msra.mxu1 %v5319_v2  ;;  %v5335_v7 = vld [vmem:[#allocation2] sm:$0x3]  ;;  %v5346_v9 = vld [vmem:[%s6234_s4 + $0x8] ss:$12 sps:$4 sm:$0xff]   ;;  %v5384_v14 = vld [vmem:[%s6233_s3 + $0x18] sm:$0xff]   ;;  %v458_v16 = vshrl.u32 %v457_v15, 7 }
  0x21   : > { %4465 = vmatprep.mubr.msk.bf16.mxu0 %vm5180_vm1, %v5179_v6  ;;  %539 = vmatprep.subr.bf16.mxu1 %v5326_v4  ;;  %v500_v8 = vpack.c.bf16 %v5335_v7, %v5335_v7  ;;  %v5352_v10 = vld [vmem:[%s6234_s4 + $0x20] ss:$12 sps:$4 sm:$0xff]   ;;  %v5372_v12 = vld [vmem:[%s6233_s3 + $0x10] sm:$0xff]   ;;  %v5181_v50 = vmov 1966171168   ;;  %vm784_vm3 = vcmask 122880  }
  0x22   : > { %v5367_v11 = vld [vmem:[%s6233_s3] sm:$0xff]   ;;  %v5379_v13 = vld [vmem:[%s6233_s3 + $0x8] sm:$0xff]   ;;  %v5392_v17 = vsub.s32 0, %v458_v16  ;;  %v463_v19 = vsub.s32 1, %v458_v16  ;;  %v467_v41 = vsub.s32 2, %v458_v16  ;;  %v649_v51 = vunpack.c.l.s4 %v5181_v50  ;;  %s5182_s29 = smov 32  }
  0x23   : > { %4462 = vmatpush3.bf16.msra.mxu0 %v5367_v11  ;;  %v455_v18 = vld [vmem:[%s6235_s5] sm:$0x7]  ;;  %vm815_vm4 = vcmask 130048   ;;  %vm911_vm5 = vcmask 1041409   ;;  %vm942_vm6 = vcmask 523264   ;;  %vm1012_vm7 = vcmask 253952  }
  0x24   : > { %540 = vmatpush1.bf16.msra.mxu1 %v5331_v5  ;;  %4463 = vmatprep.subr.bf16.mxu0 %v5179_v6  ;;  %v618_v20 = vld [vmem:[%s5301_s15] sm:$0x7]  ;;  %v5399_v21 = vrot.slane %v455_v18, %v5392_v17  ;;  %v5401_v23 = vrot.slane %v455_v18, %v463_v19  ;;  %v5405_v42 = vrot.slane %v455_v18, %v467_v41  ;;  %v650_v53 = vunpack.c.0.s8 %v649_v51  ;;  %v5482_v51 = vld [vmem:[%s6236_s6 + $0x8] sm:$0xff]   ;;  %s4305_s28 = sshll.u32 (%p5277_p4), %s5168_s12, 2 }
  0x25   : > { %4453 = vmatprep.subr.bf16.mxu1 %v5179_v6  ;;  %v619_v22 = vunpack.c.l.bf16 %v618_v20  ;;  %v5476_v50 = vld [vmem:[%s6236_s6] sm:$0xff]   ;;  %vm3950_vm8 = vcmask 254976   ;;  %vm3956_vm9 = vcmask 257024   ;;  %s3979_s24 = scalar_lea.vmem (%p5277_p4), %s6238_s8, %s4305_s28 }
  0x26   : > { %v5409_v58 = vsub.s32 %v650_v53, %v458_v16  ;;  %v5496_v53 = vld [vmem:[%s6236_s6 + $0x18] sm:$0xff]  }
  0x27   : > { %4206 = vmatmul.mubr.msk.bf16.vlgmr.msra.gmra.mrb[0].mxu1 %vm533_vm2, %v500_v8  ;;  %4464 = vmatpush3.bf16.msra.mxu0 %v5379_v13  ;;  %v628_v28 = vrot.slane %v619_v22, 2  ;;  %v638_v46 = vrot.slane %v619_v22, 4 }
  0x28   : > { %4454 = vmatpush3.bf16.msra.mxu1 %v5346_v9  ;;  %4457 = vmatprep.mubr.msk.bf16.mxu1 %vm5180_vm1, %v5179_v6 }
  0x29   : > { %4455 = vmatprep.subr.bf16.mxu1 %v5179_v6  ;;  %4477 = vmatprep.subr.bf16.mxu0 %v5179_v6 }
  0x2c   : > { %4456 = vmatpush3.bf16.msra.mxu1 %v5352_v10 }
  0x2d   : > { %4469 = vmatprep.subr.bf16.mxu1 %v5179_v6 }
  0x2f   : > { %4458 = vmatmul.mubr.msk.bf16.vlgmr.msra.gmra.mrb[4].mxu1 %vm533_vm2, %v500_v8 }
  0x30   : > { %4473 = vmatprep.mubr.msk.bf16.mxu1 %vm5180_vm1, %v5179_v6  ;;  %4470 = vmatpush3.bf16.msra.mxu1 %v5372_v12 }
  0x31   : > { %4471 = vmatprep.subr.bf16.mxu1 %v5179_v6 }
  0x34   : > { %4472 = vmatpush3.bf16.msra.mxu1 %v5384_v14 }
  0x35   : > { %4483 = vmatprep.subr.bf16.mxu1 %v5179_v6 }
  0xfa   : > { %v571_v24 = vpop.f32.mrb[0].mxu1 }
  0xfb   : > { %v572_v25 = vadd.f32 %v571_v24, %v5399_v21  ;;  %v573_v26 = vpop.f32.mrb[1].mxu1 }
  0xfc   : > { %v574_v27 = vadd.f32 %v573_v26, %v5401_v23  ;;  %v575_v29 = vpop.f32.mrb[2].mxu1 }
  0xfd   : > { %v620_v30 = vadd.f32 %v619_v22, %v572_v25  ;;  %v576_v31 = vpop.f32.mrb[3].mxu1 }
  0xfe   : > { %v630_v33 = vadd.f32 %v628_v28, %v574_v27 }
  0xff   : > { %v4208_v32 = vmul.f32 -1.442695, %v620_v30 }
 0x100   : > { %v4209_v36 = vmul.f32 -1.442695, %v630_v33 }
 0x101   : > { %4919 = vpow2.f32 %v4208_v32 }
 0x102   : > { %v612_v34 = vpop.f32.mrb[4].mxu1  ;;  %4921 = vpow2.f32 %v4209_v36 }
 0x103   : > { %v4459_v35 = vpop.f32.mrb[5].mxu1  ;;  %v613_v45 = vadd.f32 %v612_v34, %v5405_v42 }
 0x104   : > { %v615_v37 = vpop.f32.mrb[6].mxu1 }
 0x105   : > { %v4460_v38 = vpop.f32.mrb[7].mxu1 }
 0x10b   : > { %v4920_v39 = vpop.eup %4919 }
 0x10c   : > { %v624_v40 = vadd.f32 1.0, %v4920_v39  ;;  %v4922_v43 = vpop.eup %4921  ;;  %v5435_v39 = vld [vmem:[%s6232_s2 + $0x8] sm:$0xff]  }
 0x10d   : > { %v634_v44 = vadd.f32 1.0, %v4922_v43 }
 0x10e   : > { %4923 = vrcp.f32 %v624_v40  ;;  %v5442_v40 = vld [vmem:[%s6232_s2] sm:$0xff]  }
 0x10f   : > { %4925 = vrcp.f32 %v634_v44 }
 0x118   : > { %v4924_v47 = vpop.eup %4923 }
 0x119   : > { %v637_v48 = vmul.f32 %v4924_v47, %v613_v45  ;;  %v4926_v52 = vpop.eup %4925 }
 0x11a   : > { %v642_v54 = vsub.f32 1.0, %v4926_v52  ;;  %v644_v56 = vmul.f32 %v4926_v52, %v5335_v7  ;;  %v5489_v52 = vld [vmem:[%s6236_s6 + $0x10] sm:$0xff]  }
 0x11b   : > { %v640_v49 = vadd.f32 %v638_v46, %v637_v48 }
 0x11d   : > { %4927 = vtanh.f32 %v640_v49 }
 0x127   : > { %v4928_v55 = vpop.eup %4927 }
 0x128   : > { %v643_v57 = vmul.f32 %v4928_v55, %v642_v54 }
 0x12a   : > { %v5411_v59 = vadd.f32 %v644_v56, %v643_v57 }
 0x12c   : > { %v5415_v60 = vpack.c.bf16 %v5411_v59, %v5411_v59 }
 0x12e   : > { %v654_v61 = vrot.slane %v5415_v60, %v5409_v58 }
 0x130   : > { %v661_v62 = vrot.slane %v654_v61, %v5409_v58  ;;  %v4228_v61 = vld [vmem:[%s5301_s15 + $0x3] sm:$0x7] }
 0x132   : > { %v663_v63 = vunpack.i.h.s16 %v661_v62  ;;  %v4210_v0 = vpack.i.b16 %v661_v62, %v661_v62 }
 0x134   : > { %v668_v8 = vrot.slane %v4210_v0, %v5392_v17  ;;  %v724_v15 = vpack.i.b16 %v663_v63, %v663_v63 }
 0x136   : > { %4466 = vmatmul.mubr.msk.bf16.vlgmr.msra.gmra.mrb[0].mxu0 %vm533_vm2, %v668_v8  ;;  %v728_v7 = vrot.slane %v724_v15, %v5392_v17  ;;  %v1103_v15 = vunpack.c.l.bf16 %v4228_v61 }
 0x137   : > { %4479 = vmatprep.mubr.msk.bf16.mxu0 %vm5180_vm1, %v5179_v6  ;;  %4478 = vmatpush3.bf16.msra.mxu0 %v5442_v40 }
 0x138   : > { %4474 = vmatmul.mubr.msk.bf16.vlgmr.msra.gmra.mrb[8].mxu1 %vm533_vm2, %v728_v7  ;;  %4489 = vmatprep.subr.bf16.mxu0 %v5179_v6 }
 0x139   : > { %4485 = vmatprep.mubr.msk.bf16.mxu1 %vm5180_vm1, %v5179_v6  ;;  %4484 = vmatpush3.bf16.msra.mxu1 %v5435_v39 }
 0x13a   : > { %1020 = vmatprep.subr.bf16.mxu1 %v5314_v1 }
 0x209   : > { %v718_v16 = vpop.f32.mrb[0].mxu0 }
 0x20a   : > { %v4467_v18 = vpop.f32.mrb[1].mxu0  ;;  %v785_v28 = vsel %vm784_vm3, %v718_v16, -inf }
 0x20b   : > { %v721_v19 = vpop.f32.mrb[2].mxu0  ;;  %v778_v20 = vpop.f32.mrb[8].mxu1 }
 0x20c   : > { %v4468_v22 = vpop.f32.mrb[3].mxu0  ;;  %v4475_v24 = vpop.f32.mrb[9].mxu1  ;;  %v788_v25 = vsel %vm784_vm3, %v778_v20, -inf }
 0x20d   : > { %789 = vmax.xlane.f32.xlu0 %v788_v25  ;;  %v781_v26 = vpop.f32.mrb[10].mxu1  ;;  %v1112_v22 = vrot.slane %v1103_v15, 2 }
 0x20e   : > { %v4476_v27 = vpop.f32.mrb[11].mxu1 }
 0x211   : > { %786 = vmax.xlane.f32.xlu0 %v785_v28 }
 0x29a   : > { %v790_v29 = vpop.xlane.xlu0 %789 }
 0x29b   : > { %v792_v30 = vsub.f32 %v778_v20, %v790_v29 }
 0x29d   : > { %v795_v31 = vmul.f32 1.442695, %v792_v30 }
 0x29e   : > { %v787_v32 = vpop.xlane.xlu0 %786 }
 0x29f   : > { %4929 = vpow2.f32 %v795_v31  ;;  %v791_v33 = vsub.f32 %v718_v16, %v787_v32 }
 0x2a1   : > { %v793_v34 = vmul.f32 1.442695, %v791_v33 }
 0x2a3   : > { %4931 = vpow2.f32 %v793_v34 }
 0x2a9   : > { %v4930_v35 = vpop.eup %4929 }
 0x2aa   : > { %v800_v36 = vsel %vm784_vm3, %v4930_v35, 0.0 }
 0x2ab   : > { %801 = vadd.xlane.f32.xlu1 %v800_v36 }
 0x2ad   : > { %v4932_v37 = vpop.eup %4931 }
 0x2ae   : > { %v797_v38 = vsel %vm784_vm3, %v4932_v37, 0.0 }
 0x2af   : > { %798 = vadd.xlane.f32.xlu1 %v797_v38 }
 0x338   : > { %v802_v41 = vpop.xlane.xlu1 %801 }
 0x339   : > { %4933 = vrcp.f32 %v802_v41  ;;  %v1122_v41 = vrot.slane %v1103_v15, 4 }
 0x33c   : > { %v799_v43 = vpop.xlane.xlu1 %798 }
 0x33d   : > { %4935 = vrcp.f32 %v799_v43 }
 0x343   : > { %v4934_v44 = vpop.eup %4933 }
 0x344   : > { %v806_v45 = vmul.f32 %v4934_v44, %v4930_v35 }
 0x346   : > { %1016 = vst.msk [vmem:[#allocation4 + $0x8] sm:$0x1] %vm784_vm3, %v806_v45  ;;  %v808_v46 = vpack.c.bf16 %v806_v45, %v806_v45 }
 0x347   : > { %v4936_v47 = vpop.eup %4935 }
 0x348   : > { %v804_v48 = vmul.f32 %v4936_v47, %v4932_v37  ;;  %4486 = vmatmul.mubr.msk.bf16.vlgmr.msra.gmra.mrb[12].mxu1 %vm815_vm4, %v808_v46 }
 0x349   : > { %1021 = vmatpush1.bf16.msra.mxu1 %v5319_v2  ;;  %1052 = vmatprep.mubr.bf16.mxu1 %v5178_v3 }
 0x34a   : > { %1015 = vst.msk [vmem:[#allocation4] sm:$0x1] %vm784_vm3, %v804_v48  ;;  %v807_v49 = vpack.c.bf16 %v804_v48, %v804_v48  ;;  %1022 = vmatprep.subr.bf16.mxu1 %v5326_v4 }
 0x34c   : > { %4480 = vmatmul.mubr.msk.bf16.vlgmr.msra.gmra.mrb[4].mxu0 %vm815_vm4, %v807_v49 }
 0x34d   : > { %1023 = vmatpush1.bf16.msra.mxu1 %v5331_v5  ;;  %4497 = vmatprep.mubr.msk.bf16.mxu0 %vm5180_vm1, %v5179_v6 }
 0x34e   : > { %4501 = vmatprep.subr.bf16.mxu1 %v5179_v6  ;;  %4490 = vmatpush3.bf16.msra.mxu0 %v5476_v50 }
 0x34f   : > { %4491 = vmatprep.subr.bf16.mxu0 %v5179_v6 }
 0x350   : > { %4226 = vmatmul.mubr.msk.bf16.vlgmr.msra.gmra.mrb[16].mxu1 %vm533_vm2, %v5415_v60 }
 0x351   : > { %4502 = vmatpush3.bf16.msra.mxu1 %v5346_v9  ;;  %4505 = vmatprep.mubr.msk.bf16.mxu1 %vm5180_vm1, %v5179_v6 }
 0x352   : > { %4503 = vmatprep.subr.bf16.mxu1 %v5179_v6  ;;  %4492 = vmatpush3.bf16.msra.mxu0 %v5482_v51 }
 0x353   : > { %4493 = vmatprep.subr.bf16.mxu0 %v5179_v6 }
 0x355   : > { %4504 = vmatpush3.bf16.msra.mxu1 %v5352_v10 }
 0x356   : > { %4517 = vmatprep.subr.bf16.mxu1 %v5179_v6  ;;  %4494 = vmatpush3.bf16.msra.mxu0 %v5489_v52 }
 0x357   : > { %4495 = vmatprep.subr.bf16.mxu0 %v5179_v6 }
 0x358   : > { %4506 = vmatmul.mubr.msk.bf16.vlgmr.msra.gmra.mrb[20].mxu1 %vm533_vm2, %v5415_v60 }
 0x359   : > { %4518 = vmatpush3.bf16.msra.mxu1 %v5372_v12  ;;  %4521 = vmatprep.mubr.msk.bf16.mxu1 %vm5180_vm1, %v5179_v6 }
 0x35a   : > { %4519 = vmatprep.subr.bf16.mxu1 %v5179_v6  ;;  %4496 = vmatpush3.bf16.msra.mxu0 %v5496_v53 }
 0x35b   : > { %4509 = vmatprep.subr.bf16.mxu0 %v5179_v6 }
 0x35d   : > { %4520 = vmatpush3.bf16.msra.mxu1 %v5384_v14 }
 0x35e   : > { %4531 = vmatprep.subr.bf16.mxu1 %v5179_v6 }
 0x41b   : > { %v902_v54 = vpop.f32.mrb[12].mxu1 }
 0x41c   : > { %v4487_v55 = vpop.f32.mrb[13].mxu1  ;;  %v910_v57 = vrot.slane %v902_v54, 7 }
 0x41d   : > { %v905_v56 = vpop.f32.mrb[14].mxu1 }
 0x41e   : > { %v4488_v60 = vpop.f32.mrb[15].mxu1 }
 0x41f   : > { %v853_v62 = vpop.f32.mrb[4].mxu0 }
 0x420   : > { %v4481_v63 = vpop.f32.mrb[5].mxu0  ;;  %v912_v0 = vsel %vm911_vm5, %v910_v57, %v853_v62 }
 0x421   : > { %v856_v8 = vpop.f32.mrb[6].mxu0  ;;  %913 = vrot.lane.b32.xlu0 %v912_v0, %s5182_s29 }
 0x422   : > { %v4482_v7 = vpop.f32.mrb[7].mxu0 }
 0x423   : > { %v1054_v16 = vpop.f32.mrb[16].mxu1 }
 0x424   : > { %v1055_v18 = vadd.f32 %v1054_v16, %v5399_v21  ;;  %v1056_v19 = vpop.f32.mrb[17].mxu1 }
 0x425   : > { %v1057_v20 = vadd.f32 %v1056_v19, %v5401_v23  ;;  %v1058_v24 = vpop.f32.mrb[18].mxu1 }
 0x426   : > { %v1104_v25 = vadd.f32 %v1103_v15, %v1055_v18  ;;  %v1059_v26 = vpop.f32.mrb[19].mxu1  ;;  %v5542_v24 = vld [vmem:[%s6237_s7] ss:$0 sm:$0xff] }
 0x427   : > { %v1114_v28 = vadd.f32 %v1112_v22, %v1057_v20 }
 0x428   : > { %v4229_v27 = vmul.f32 -1.442695, %v1104_v25 }
 0x429   : > { %v4230_v31 = vmul.f32 -1.442695, %v1114_v28 }
 0x42a   : > { %4937 = vpow2.f32 %v4229_v27 }
 0x42b   : > { %v1095_v29 = vpop.f32.mrb[20].mxu1  ;;  %4939 = vpow2.f32 %v4230_v31 }
 0x42c   : > { %v4507_v30 = vpop.f32.mrb[21].mxu1  ;;  %v1096_v38 = vadd.f32 %v1095_v29, %v5405_v42 }
 0x42d   : > { %v1098_v32 = vpop.f32.mrb[22].mxu1 }
 0x42e   : > { %v4508_v33 = vpop.f32.mrb[23].mxu1 }
 0x434   : > { %v4938_v34 = vpop.eup %4937 }
 0x435   : > { %v1108_v35 = vadd.f32 1.0, %v4938_v34  ;;  %v4940_v36 = vpop.eup %4939 }
 0x436   : > { %v1118_v37 = vadd.f32 1.0, %v4940_v36 }
 0x437   : > { %4941 = vrcp.f32 %v1108_v35 }
 0x438   : > { %4943 = vrcp.f32 %v1118_v37 }
 0x441   : > { %v4942_v43 = vpop.eup %4941 }
 0x442   : > { %v1121_v44 = vmul.f32 %v4942_v43, %v1096_v38  ;;  %v4944_v46 = vpop.eup %4943 }
 0x443   : > { %v1126_v47 = vsub.f32 1.0, %v4944_v46  ;;  %v1128_v49 = vmul.f32 %v4944_v46, %v5411_v59 }
 0x444   : > { %v1124_v45 = vadd.f32 %v1122_v41, %v1121_v44 }
 0x446   : > { %4945 = vtanh.f32 %v1124_v45 }
 0x450   : > { %v4946_v48 = vpop.eup %4945 }
 0x451   : > { %v1127_v54 = vmul.f32 %v4946_v48, %v1126_v47 }
 0x453   : > { %v5508_v55 = vadd.f32 %v1128_v49, %v1127_v54 }
 0x455   : > { %v5512_v56 = vpack.c.bf16 %v5508_v55, %v5508_v55 }
 0x457   : > { %v1138_v57 = vrot.slane %v5512_v56, %v5409_v58 }
 0x459   : > { %v1145_v60 = vrot.slane %v1138_v57, %v5409_v58 }
 0x45b   : > { %v1147_v61 = vunpack.i.h.s16 %v1145_v60  ;;  %v4231_v7 = vpack.i.b16 %v1145_v60, %v1145_v60 }
 0x45d   : > { %v1196_v62 = vpack.i.b16 %v1147_v61, %v1147_v61  ;;  %v1152_v16 = vrot.slane %v4231_v7, %v5392_v17 }
 0x45f   : > { %v1200_v63 = vrot.slane %v1196_v62, %v5392_v17 }
 0x461   : > { %4522 = vmatmul.mubr.msk.bf16.vlgmr.msra.gmra.mrb[24].mxu1 %vm533_vm2, %v1200_v63 }
 0x462   : > { %4532 = vmatpush3.bf16.msra.mxu1 %v5435_v39  ;;  %4533 = vmatprep.mubr.msk.bf16.mxu1 %vm5180_vm1, %v5179_v6 }
 0x463   : > { %1439 = vmatprep.subr.bf16.mxu1 %v5314_v1 }
 0x493   : > { %v914_v0 = vpop.permute.xlu0 %913 }
 0x494   : > { %v916_v8 = vsel %vm533_vm2, %v5411_v59, %v914_v0 }
 0x495   : > { %v917_v15 = vpack.c.bf16 %v916_v8, %v916_v8 }
 0x497   : > { %4498 = vmatmul.mubr.msk.bf16.vlgmr.msra.gmra.mrb[8].mxu0 %vm942_vm6, %v917_v15 }
 0x498   : > { %4510 = vmatpush3.bf16.msra.mxu0 %v5367_v11  ;;  %4513 = vmatprep.mubr.msk.bf16.mxu0 %vm5180_vm1, %v5179_v6 }
 0x499   : > { %4511 = vmatprep.subr.bf16.mxu0 %v5179_v6 }
 0x49c   : > { %4512 = vmatpush3.bf16.msra.mxu0 %v5379_v13 }
 0x49d   : > { %4525 = vmatprep.subr.bf16.mxu0 %v5179_v6 }
 0x49f   : > { %4514 = vmatmul.mubr.msk.bf16.vlgmr.msra.gmra.mrb[12].mxu0 %vm533_vm2, %v1152_v16 }
 0x4a0   : > { %4526 = vmatpush3.bf16.msra.mxu0 %v5442_v40  ;;  %4527 = vmatprep.mubr.msk.bf16.mxu0 %vm5180_vm1, %v5179_v6 }
 0x4a1   : > { %4537 = vmatprep.subr.bf16.mxu0 %v5179_v6 }
 0x534   : > { %v1238_v59 = vpop.f32.mrb[24].mxu1 }
 0x535   : > { %v4523_v18 = vpop.f32.mrb[25].mxu1  ;;  %v1247_v19 = vsel %vm784_vm3, %v1238_v59, -inf }
 0x536   : > { %1248 = vmax.xlane.f32.xlu1 %v1247_v19  ;;  %v1241_v20 = vpop.f32.mrb[26].mxu1 }
 0x537   : > { %v4524_v22 = vpop.f32.mrb[27].mxu1  ;;  %v4239_v20 = vld [vmem:[%s5301_s15 + $0x6] sm:$0x7] }
 0x538   : > { %v1522_v22 = vunpack.c.l.bf16 %v4239_v20 }
 0x56a   : > { %v980_v25 = vpop.f32.mrb[8].mxu0 }
 0x56b   : > { %v981_v26 = vadd.f32 %v5542_v24, %v980_v25  ;;  %v4499_v27 = vpop.f32.mrb[9].mxu0 }
 0x56c   : > { %v983_v28 = vpop.f32.mrb[10].mxu0 }
 0x56d   : > { %4947 = vtanh.f32 %v981_v26  ;;  %v4500_v29 = vpop.f32.mrb[11].mxu0 }
 0x56e   : > { %v1531_v29 = vrot.slane %v1522_v22, 2 }
 0x572   : > { %v1190_v30 = vpop.f32.mrb[12].mxu0 }
 0x573   : > { %v4515_v31 = vpop.f32.mrb[13].mxu0  ;;  %v1244_v32 = vsel %vm784_vm3, %v1190_v30, -inf }
 0x574   : > { %v1193_v33 = vpop.f32.mrb[14].mxu0  ;;  %1245 = vmax.xlane.f32.xlu1 %v1244_v32 }
 0x575   : > { %v4516_v34 = vpop.f32.mrb[15].mxu0 }
 0x577   : > { %v4948_v35 = vpop.eup %4947 }
 0x578   : > { %v994_v36 = vrot.slane %v4948_v35, %v5409_v58 }
 0x57a   : > { %v995_v37 = vcombine.high %v994_v36, %v994_v36  ;;  %v1002_v38 = vrot.slane %v994_v36, %v5409_v58 }
 0x57c   : > { %v1009_v41 = vrot.slane %v995_v37, %v5409_v58  ;;  %1013 = vst.msk [vmem:[#allocation3] sm:$0x1] %vm1012_vm7, %v1002_v38 }
 0x57e   : > { %1014 = vst.msk [vmem:[#allocation3 + $0x8] sm:$0x1] %vm1012_vm7, %v1009_v41 }
 0x5c3   : > { %v1249_v43 = vpop.xlane.xlu1 %1248 }
 0x5c4   : > { %v1251_v44 = vsub.f32 %v1238_v59, %v1249_v43 }
 0x5c6   : > { %v1254_v45 = vmul.f32 1.442695, %v1251_v44 }
 0x5c8   : > { %4949 = vpow2.f32 %v1254_v45 }
 0x5d2   : > { %v4950_v46 = vpop.eup %4949 }
 0x5d3   : > { %v1259_v47 = vsel %vm784_vm3, %v4950_v46, 0.0 }
 0x5d4   : > { %1260 = vadd.xlane.f32.xlu1 %v1259_v47 }
 0x601   : > { %v1246_v48 = vpop.xlane.xlu1 %1245 }
 0x602   : > { %v1250_v49 = vsub.f32 %v1190_v30, %v1246_v48  ;;  %v1541_v48 = vrot.slane %v1522_v22, 4 }
 0x604   : > { %v1252_v54 = vmul.f32 1.442695, %v1250_v49 }
 0x606   : > { %4951 = vpow2.f32 %v1252_v54 }
 0x610   : > { %v4952_v57 = vpop.eup %4951 }
 0x611   : > { %v1256_v60 = vsel %vm784_vm3, %v4952_v57, 0.0 }
 0x612   : > { %1257 = vadd.xlane.f32.xlu1 %v1256_v60 }
 0x661   : > { %v1261_v61 = vpop.xlane.xlu1 %1260 }
 0x662   : > { %4953 = vrcp.f32 %v1261_v61 }
 0x66c   : > { %v4954_v62 = vpop.eup %4953 }
 0x66d   : > { %v1265_v63 = vmul.f32 %v4954_v62, %v4950_v46 }
 0x66f   : > { %1435 = vst.msk [vmem:[#allocation4 + $0x9] sm:$0x1] %vm784_vm3, %v1265_v63  ;;  %v1267_v0 = vpack.c.bf16 %v1265_v63, %v1265_v63 }
 0x671   : > { %4534 = vmatmul.mubr.msk.bf16.vlgmr.msra.gmra.mrb[28].mxu1 %vm815_vm4, %v1267_v0 }
 0x672   : > { %1440 = vmatpush1.bf16.msra.mxu1 %v5319_v2  ;;  %1471 = vmatprep.mubr.bf16.mxu1 %v5178_v3 }
 0x673   : > { %1441 = vmatprep.subr.bf16.mxu1 %v5326_v4 }
 0x676   : > { %1442 = vmatpush1.bf16.msra.mxu1 %v5331_v5 }
 0x677   : > { %4549 = vmatprep.subr.bf16.mxu1 %v5179_v6 }
 0x679   : > { %4237 = vmatmul.mubr.msk.bf16.vlgmr.msra.gmra.mrb[32].mxu1 %vm533_vm2, %v5512_v56 }
 0x67a   : > { %4550 = vmatpush3.bf16.msra.mxu1 %v5346_v9  ;;  %4553 = vmatprep.mubr.msk.bf16.mxu1 %vm5180_vm1, %v5179_v6 }
 0x67b   : > { %4551 = vmatprep.subr.bf16.mxu1 %v5179_v6 }
 0x67e   : > { %4552 = vmatpush3.bf16.msra.mxu1 %v5352_v10 }
 0x67f   : > { %4565 = vmatprep.subr.bf16.mxu1 %v5179_v6 }
 0x681   : > { %4554 = vmatmul.mubr.msk.bf16.vlgmr.msra.gmra.mrb[36].mxu1 %vm533_vm2, %v5512_v56 }
 0x682   : > { %4566 = vmatpush3.bf16.msra.mxu1 %v5372_v12  ;;  %4569 = vmatprep.mubr.msk.bf16.mxu1 %vm5180_vm1, %v5179_v6 }
 0x683   : > { %4567 = vmatprep.subr.bf16.mxu1 %v5179_v6 }
 0x686   : > { %4568 = vmatpush3.bf16.msra.mxu1 %v5384_v14 }
 0x687   : > { %4579 = vmatprep.subr.bf16.mxu1 %v5179_v6 }
 0x69f   : > { %v1258_v8 = vpop.xlane.xlu1 %1257 }
 0x6a0   : > { %4955 = vrcp.f32 %v1258_v8 }
 0x6aa   : > { %v4956_v15 = vpop.eup %4955 }
 0x6ab   : > { %v1263_v7 = vmul.f32 %v4956_v15, %v4952_v57 }
 0x6ad   : > { %1434 = vst.msk [vmem:[#allocation4 + $0x1] sm:$0x1] %vm784_vm3, %v1263_v7  ;;  %v1266_v16 = vpack.c.bf16 %v1263_v7, %v1263_v7 }
 0x6af   : > { %4528 = vmatmul.mubr.msk.bf16.vlgmr.msra.gmra.mrb[16].mxu0 %vm815_vm4, %v1266_v16 }
 0x6b0   : > { %4538 = vmatpush3.bf16.msra.mxu0 %v5476_v50  ;;  %4545 = vmatprep.mubr.msk.bf16.mxu0 %vm5180_vm1, %v5179_v6 }
 0x6b1   : > { %4539 = vmatprep.subr.bf16.mxu0 %v5179_v6 }
 0x6b4   : > { %4540 = vmatpush3.bf16.msra.mxu0 %v5482_v51 }
 0x6b5   : > { %4541 = vmatprep.subr.bf16.mxu0 %v5179_v6 }
 0x6b8   : > { %4542 = vmatpush3.bf16.msra.mxu0 %v5489_v52 }
 0x6b9   : > { %4543 = vmatprep.subr.bf16.mxu0 %v5179_v6 }
 0x6bc   : > { %4544 = vmatpush3.bf16.msra.mxu0 %v5496_v53 }
 0x6bd   : > { %4557 = vmatprep.subr.bf16.mxu0 %v5179_v6 }
 0x744   : > { %v1348_v56 = vpop.f32.mrb[28].mxu1 }
 0x745   : > { %v4535_v59 = vpop.f32.mrb[29].mxu1  ;;  %v1356_v16 = vrot.slane %v1348_v56, 7 }
 0x746   : > { %v1351_v18 = vpop.f32.mrb[30].mxu1 }
 0x747   : > { %v4536_v19 = vpop.f32.mrb[31].mxu1 }
 0x74c   : > { %v1473_v25 = vpop.f32.mrb[32].mxu1 }
 0x74d   : > { %v1474_v26 = vadd.f32 %v1473_v25, %v5399_v21  ;;  %v1475_v27 = vpop.f32.mrb[33].mxu1 }
 0x74e   : > { %v1476_v28 = vadd.f32 %v1475_v27, %v5401_v23  ;;  %v1477_v30 = vpop.f32.mrb[34].mxu1 }
 0x74f   : > { %v1523_v31 = vadd.f32 %v1522_v22, %v1474_v26  ;;  %v1478_v32 = vpop.f32.mrb[35].mxu1 }
 0x750   : > { %v1533_v34 = vadd.f32 %v1531_v29, %v1476_v28 }
 0x751   : > { %v4240_v33 = vmul.f32 -1.442695, %v1523_v31 }
 0x752   : > { %v4241_v37 = vmul.f32 -1.442695, %v1533_v34 }
 0x753   : > { %4957 = vpow2.f32 %v4240_v33 }
 0x754   : > { %v1514_v35 = vpop.f32.mrb[36].mxu1  ;;  %4959 = vpow2.f32 %v4241_v37 }
 0x755   : > { %v4555_v36 = vpop.f32.mrb[37].mxu1  ;;  %v1515_v47 = vadd.f32 %v1514_v35, %v5405_v42 }
 0x756   : > { %v1517_v38 = vpop.f32.mrb[38].mxu1 }
 0x757   : > { %v4556_v41 = vpop.f32.mrb[39].mxu1 }
 0x75d   : > { %v4958_v43 = vpop.eup %4957 }
 0x75e   : > { %v1527_v44 = vadd.f32 1.0, %v4958_v43  ;;  %v4960_v45 = vpop.eup %4959 }
 0x75f   : > { %v1537_v46 = vadd.f32 1.0, %v4960_v45 }
 0x760   : > { %4961 = vrcp.f32 %v1527_v44 }
 0x761   : > { %4963 = vrcp.f32 %v1537_v46 }
 0x76a   : > { %v4962_v49 = vpop.eup %4961 }
 0x76b   : > { %v1540_v54 = vmul.f32 %v4962_v49, %v1515_v47  ;;  %v4964_v60 = vpop.eup %4963 }
 0x76c   : > { %v1545_v61 = vsub.f32 1.0, %v4964_v60  ;;  %v1547_v63 = vmul.f32 %v4964_v60, %v5508_v55 }
 0x76d   : > { %v1543_v57 = vadd.f32 %v1541_v48, %v1540_v54 }
 0x76f   : > { %4965 = vtanh.f32 %v1543_v57 }
 0x779   : > { %v4966_v62 = vpop.eup %4965 }
 0x77a   : > { %v1546_v0 = vmul.f32 %v4966_v62, %v1545_v61 }
 0x77c   : > { %v5593_v8 = vadd.f32 %v1547_v63, %v1546_v0 }
 0x77e   : > { %v5597_v15 = vpack.c.bf16 %v5593_v8, %v5593_v8 }
 0x780   : > { %v1557_v7 = vrot.slane %v5597_v15, %v5409_v58 }
 0x782   : > { %v1305_v59 = vpop.f32.mrb[16].mxu0  ;;  %v1564_v18 = vrot.slane %v1557_v7, %v5409_v58 }
 0x783   : > { %v4529_v19 = vpop.f32.mrb[17].mxu0  ;;  %v1357_v20 = vsel %vm911_vm5, %v1356_v16, %v1305_v59 }
 0x784   : > { %v1308_v22 = vpop.f32.mrb[18].mxu0  ;;  %1358 = vrot.lane.b32.xlu1 %v1357_v20, %s5182_s29  ;;  %v1566_v25 = vunpack.i.h.s16 %v1564_v18  ;;  %v4242_v31 = vpack.i.b16 %v1564_v18, %v1564_v18 }
 0x785   : > { %v4530_v26 = vpop.f32.mrb[19].mxu0 }
 0x786   : > { %v1615_v27 = vpack.i.b16 %v1566_v25, %v1566_v25  ;;  %v1571_v32 = vrot.slane %v4242_v31, %v5392_v17 }
 0x788   : > { %v1619_v28 = vrot.slane %v1615_v27, %v5392_v17  ;;  %v4250_v27 = vld [vmem:[%s5301_s15 + $0x9] sm:$0x7] }
 0x78a   : > { %4570 = vmatmul.mubr.msk.bf16.vlgmr.msra.gmra.mrb[40].mxu1 %vm533_vm2, %v1619_v28  ;;  %v1941_v28 = vunpack.c.l.bf16 %v4250_v27 }
 0x78b   : > { %4580 = vmatpush3.bf16.msra.mxu1 %v5435_v39  ;;  %4581 = vmatprep.mubr.msk.bf16.mxu1 %vm5180_vm1, %v5179_v6 }
 0x78c   : > { %1858 = vmatprep.subr.bf16.mxu1 %v5314_v1 }
 0x7f6   : > { %v1359_v56 = vpop.permute.xlu1 %1358 }
 0x7f7   : > { %v1361_v29 = vsel %vm533_vm2, %v5508_v55, %v1359_v56 }
 0x7f8   : > { %v1362_v30 = vpack.c.bf16 %v1361_v29, %v1361_v29 }
 0x7fa   : > { %4546 = vmatmul.mubr.msk.bf16.vlgmr.msra.gmra.mrb[20].mxu0 %vm942_vm6, %v1362_v30 }
 0x7fb   : > { %4558 = vmatpush3.bf16.msra.mxu0 %v5367_v11  ;;  %4561 = vmatprep.mubr.msk.bf16.mxu0 %vm5180_vm1, %v5179_v6 }
 0x7fc   : > { %4559 = vmatprep.subr.bf16.mxu0 %v5179_v6 }
 0x7ff   : > { %4560 = vmatpush3.bf16.msra.mxu0 %v5379_v13 }
 0x800   : > { %4573 = vmatprep.subr.bf16.mxu0 %v5179_v6 }
 0x802   : > { %4562 = vmatmul.mubr.msk.bf16.vlgmr.msra.gmra.mrb[24].mxu0 %vm533_vm2, %v1571_v32  ;;  %v1950_v32 = vrot.slane %v1941_v28, 2 }
 0x803   : > { %4574 = vmatpush3.bf16.msra.mxu0 %v5442_v40  ;;  %4575 = vmatprep.mubr.msk.bf16.mxu0 %vm5180_vm1, %v5179_v6 }
 0x804   : > { %4585 = vmatprep.subr.bf16.mxu0 %v5179_v6 }
 0x85d   : > { %v1657_v1 = vpop.f32.mrb[40].mxu1 }
 0x85e   : > { %v4571_v11 = vpop.f32.mrb[41].mxu1  ;;  %v1666_v55 = vsel %vm784_vm3, %v1657_v1, -inf }
 0x85f   : > { %1667 = vmax.xlane.f32.xlu0 %v1666_v55  ;;  %v1660_v33 = vpop.f32.mrb[42].mxu1 }
 0x860   : > { %v4572_v13 = vpop.f32.mrb[43].mxu1 }
 0x8cd   : > { %v1400_v34 = vpop.f32.mrb[20].mxu0 }
 0x8ce   : > { %v1401_v35 = vadd.f32 %v5542_v24, %v1400_v34  ;;  %v4547_v36 = vpop.f32.mrb[21].mxu0 }
 0x8cf   : > { %v1403_v37 = vpop.f32.mrb[22].mxu0 }
 0x8d0   : > { %4967 = vtanh.f32 %v1401_v35  ;;  %v4548_v38 = vpop.f32.mrb[23].mxu0 }
 0x8d5   : > { %v1609_v41 = vpop.f32.mrb[24].mxu0 }
 0x8d6   : > { %v4563_v43 = vpop.f32.mrb[25].mxu0  ;;  %v1663_v44 = vsel %vm784_vm3, %v1609_v41, -inf }
 0x8d7   : > { %1664 = vmax.xlane.f32.xlu1 %v1663_v44  ;;  %v1612_v45 = vpop.f32.mrb[26].mxu0 }
 0x8d8   : > { %v4564_v46 = vpop.f32.mrb[27].mxu0 }
 0x8da   : > { %v4968_v47 = vpop.eup %4967 }
 0x8db   : > { %v1414_v48 = vrot.slane %v4968_v47, %v5409_v58  ;;  %v1960_v47 = vrot.slane %v1941_v28, 4 }
 0x8dd   : > { %v1415_v49 = vcombine.high %v1414_v48, %v1414_v48  ;;  %v1422_v54 = vrot.slane %v1414_v48, %v5409_v58 }
 0x8df   : > { %v1429_v57 = vrot.slane %v1415_v49, %v5409_v58  ;;  %1432 = vst.msk [vmem:[#allocation3 + $0x1] sm:$0x1] %vm1012_vm7, %v1422_v54 }
 0x8e1   : > { %1433 = vst.msk [vmem:[#allocation3 + $0x9] sm:$0x1] %vm1012_vm7, %v1429_v57 }
 0x8ec   : > { %v1668_v60 = vpop.xlane.xlu0 %1667 }
 0x8ed   : > { %v1670_v61 = vsub.f32 %v1657_v1, %v1668_v60 }
 0x8ef   : > { %v1673_v62 = vmul.f32 1.442695, %v1670_v61 }
 0x8f1   : > { %4969 = vpow2.f32 %v1673_v62 }
 0x8fb   : > { %v4970_v63 = vpop.eup %4969 }
 0x8fc   : > { %v1678_v0 = vsel %vm784_vm3, %v4970_v63, 0.0 }
 0x8fd   : > { %1679 = vadd.xlane.f32.xlu0 %v1678_v0 }
 0x964   : > { %v1665_v7 = vpop.xlane.xlu1 %1664 }
 0x965   : > { %v1669_v16 = vsub.f32 %v1609_v41, %v1665_v7 }
 0x967   : > { %v1671_v59 = vmul.f32 1.442695, %v1669_v16 }
 0x969   : > { %4971 = vpow2.f32 %v1671_v59 }
 0x973   : > { %v4972_v18 = vpop.eup %4971 }
 0x974   : > { %v1675_v19 = vsel %vm784_vm3, %v4972_v18, 0.0 }
 0x975   : > { %1676 = vadd.xlane.f32.xlu0 %v1675_v19 }
 0x98a   : > { %v1680_v20 = vpop.xlane.xlu0 %1679 }
 0x98b   : > { %4973 = vrcp.f32 %v1680_v20 }
 0x995   : > { %v4974_v22 = vpop.eup %4973 }
 0x996   : > { %v1684_v25 = vmul.f32 %v4974_v22, %v4970_v63  ;;  %v5692_v22 = vld [vmem:[%s6234_s4 + $0x4] ss:$12 sps:$4 sm:$0xff]  }
 0x998   : > { %1854 = vst.msk [vmem:[#allocation4 + $0xa] sm:$0x1] %vm784_vm3, %v1684_v25  ;;  %v1686_v26 = vpack.c.bf16 %v1684_v25, %v1684_v25 }
 0x99a   : > { %4582 = vmatmul.mubr.msk.bf16.vlgmr.msra.gmra.mrb[44].mxu1 %vm815_vm4, %v1686_v26 }
 0x99b   : > { %1859 = vmatpush1.bf16.msra.mxu1 %v5319_v2  ;;  %1890 = vmatprep.mubr.bf16.mxu1 %v5178_v3 }
 0x99c   : > { %1860 = vmatprep.subr.bf16.mxu1 %v5326_v4 }
 0x99f   : > { %1861 = vmatpush1.bf16.msra.mxu1 %v5331_v5 }
 0x9a0   : > { %4597 = vmatprep.subr.bf16.mxu1 %v5179_v6 }
 0x9a2   : > { %4248 = vmatmul.mubr.msk.bf16.vlgmr.msra.gmra.mrb[48].mxu1 %vm533_vm2, %v5597_v15 }
 0x9a3   : > { %4598 = vmatpush3.bf16.msra.mxu1 %v5346_v9  ;;  %4601 = vmatprep.mubr.msk.bf16.mxu1 %vm5180_vm1, %v5179_v6 }
 0x9a4   : > { %4599 = vmatprep.subr.bf16.mxu1 %v5179_v6 }
 0x9a7   : > { %4600 = vmatpush3.bf16.msra.mxu1 %v5352_v10 }
 0x9a8   : > { %4613 = vmatprep.subr.bf16.mxu1 %v5179_v6 }
 0x9aa   : > { %4602 = vmatmul.mubr.msk.bf16.vlgmr.msra.gmra.mrb[52].mxu1 %vm533_vm2, %v5597_v15 }
 0x9ab   : > { %4614 = vmatpush3.bf16.msra.mxu1 %v5372_v12  ;;  %4617 = vmatprep.mubr.msk.bf16.mxu1 %vm5180_vm1, %v5179_v6 }
 0x9ac   : > { %4615 = vmatprep.subr.bf16.mxu1 %v5179_v6 }
 0x9af   : > { %4616 = vmatpush3.bf16.msra.mxu1 %v5384_v14 }
 0x9b0   : > { %4627 = vmatprep.subr.bf16.mxu1 %v5179_v6 }
 0xa02   : > { %v1677_v2 = vpop.xlane.xlu0 %1676 }
 0xa03   : > { %4975 = vrcp.f32 %v1677_v2 }
 0xa0d   : > { %v4976_v4 = vpop.eup %4975 }
 0xa0e   : > { %v1682_v5 = vmul.f32 %v4976_v4, %v4972_v18 }
 0xa10   : > { %1853 = vst.msk [vmem:[#allocation4 + $0x2] sm:$0x1] %vm784_vm3, %v1682_v5  ;;  %v1685_v9 = vpack.c.bf16 %v1682_v5, %v1682_v5 }
 0xa12   : > { %4576 = vmatmul.mubr.msk.bf16.vlgmr.msra.gmra.mrb[28].mxu0 %vm815_vm4, %v1685_v9 }
 0xa13   : > { %4586 = vmatpush3.bf16.msra.mxu0 %v5476_v50  ;;  %4593 = vmatprep.mubr.msk.bf16.mxu0 %vm5180_vm1, %v5179_v6 }
 0xa14   : > { %4587 = vmatprep.subr.bf16.mxu0 %v5179_v6 }
 0xa17   : > { %4588 = vmatpush3.bf16.msra.mxu0 %v5482_v51 }
 0xa18   : > { %4589 = vmatprep.subr.bf16.mxu0 %v5179_v6 }
 0xa1b   : > { %4590 = vmatpush3.bf16.msra.mxu0 %v5489_v52 }
 0xa1c   : > { %4591 = vmatprep.subr.bf16.mxu0 %v5179_v6 }
 0xa1f   : > { %4592 = vmatpush3.bf16.msra.mxu0 %v5496_v53 }
 0xa20   : > { %4605 = vmatprep.subr.bf16.mxu0 %v5179_v6 }
 0xa6d   : > { %v1767_v10 = vpop.f32.mrb[44].mxu1 }
 0xa6e   : > { %v4583_v12 = vpop.f32.mrb[45].mxu1  ;;  %v1775_v25 = vrot.slane %v1767_v10, 7 }
 0xa6f   : > { %v1770_v14 = vpop.f32.mrb[46].mxu1 }
 0xa70   : > { %v4584_v15 = vpop.f32.mrb[47].mxu1 }
 0xa71   : > { %v5703_v15 = vld [vmem:[%s6233_s3] sm:$0xff]  }
 0xa75   : > { %v1892_v56 = vpop.f32.mrb[48].mxu1 }
 0xa76   : > { %v1893_v29 = vadd.f32 %v1892_v56, %v5399_v21  ;;  %v1894_v30 = vpop.f32.mrb[49].mxu1 }
 0xa77   : > { %v1895_v31 = vadd.f32 %v1894_v30, %v5401_v23  ;;  %v1896_v1 = vpop.f32.mrb[50].mxu1 }
 0xa78   : > { %v1942_v11 = vadd.f32 %v1941_v28, %v1893_v29  ;;  %v1897_v55 = vpop.f32.mrb[51].mxu1 }
 0xa79   : > { %v1952_v13 = vadd.f32 %v1950_v32, %v1895_v31 }
 0xa7a   : > { %v4251_v33 = vmul.f32 -1.442695, %v1942_v11 }
 0xa7b   : > { %v4252_v36 = vmul.f32 -1.442695, %v1952_v13 }
 0xa7c   : > { %4977 = vpow2.f32 %v4251_v33 }
 0xa7d   : > { %v1933_v34 = vpop.f32.mrb[52].mxu1  ;;  %4979 = vpow2.f32 %v4252_v36 }
 0xa7e   : > { %v4603_v35 = vpop.f32.mrb[53].mxu1  ;;  %v1934_v46 = vadd.f32 %v1933_v34, %v5405_v42 }
 0xa7f   : > { %v1936_v37 = vpop.f32.mrb[54].mxu1 }
 0xa80   : > { %v4604_v38 = vpop.f32.mrb[55].mxu1 }
 0xa86   : > { %v4978_v41 = vpop.eup %4977 }
 0xa87   : > { %v1946_v43 = vadd.f32 1.0, %v4978_v41  ;;  %v4980_v44 = vpop.eup %4979 }
 0xa88   : > { %v1956_v45 = vadd.f32 1.0, %v4980_v44 }
 0xa89   : > { %4981 = vrcp.f32 %v1946_v43 }
 0xa8a   : > { %4983 = vrcp.f32 %v1956_v45 }
 0xa93   : > { %v4982_v48 = vpop.eup %4981 }
 0xa94   : > { %v1959_v49 = vmul.f32 %v4982_v48, %v1934_v46  ;;  %v4984_v57 = vpop.eup %4983 }
 0xa95   : > { %v1964_v60 = vsub.f32 1.0, %v4984_v57  ;;  %v1966_v62 = vmul.f32 %v4984_v57, %v5593_v8 }
 0xa96   : > { %v1962_v54 = vadd.f32 %v1960_v47, %v1959_v49 }
 0xa98   : > { %4985 = vtanh.f32 %v1962_v54 }
 0xaa2   : > { %v4986_v61 = vpop.eup %4985 }
 0xaa3   : > { %v1965_v63 = vmul.f32 %v4986_v61, %v1964_v60 }
 0xaa5   : > { %v5675_v0 = vadd.f32 %v1966_v62, %v1965_v63 }
 0xaa7   : > { %v5679_v7 = vpack.c.bf16 %v5675_v0, %v5675_v0 }
 0xaa9   : > { %v1976_v16 = vrot.slane %v5679_v7, %v5409_v58 }
 0xaab   : > { %v1983_v59 = vrot.slane %v1976_v16, %v5409_v58 }
 0xaad   : > { %v1985_v18 = vunpack.i.h.s16 %v1983_v59  ;;  %v4253_v10 = vpack.i.b16 %v1983_v59, %v1983_v59 }
 0xaaf   : > { %v2034_v19 = vpack.i.b16 %v1985_v18, %v1985_v18  ;;  %v1990_v27 = vrot.slane %v4253_v10, %v5392_v17 }
 0xab1   : > { %v2038_v20 = vrot.slane %v2034_v19, %v5392_v17  ;;  %v5737_v19 = vld [vmem:[%s6234_s4] ss:$12 sps:$4 sm:$0xff]  }
 0xab3   : > { %4618 = vmatmul.mubr.msk.bf16.vlgmr.msra.gmra.mrb[56].mxu1 %vm533_vm2, %v2038_v20  ;;  %v5744_v20 = vld [vmem:[%s6234_s4 + $0x1c] ss:$12 sps:$4 sm:$0xff]  }
 0xab4   : > { %4628 = vmatpush3.bf16.msra.mxu1 %v5435_v39  ;;  %4629 = vmatprep.mubr.msk.bf16.mxu1 %vm5180_vm1, %v5179_v6 }
 0xab5   : > { %2277 = vmatprep.subr.bf16.mxu1 %v5692_v22 }
 0xae5   : > { %v1724_v26 = vpop.f32.mrb[28].mxu0 }
 0xae6   : > { %v4577_v2 = vpop.f32.mrb[29].mxu0  ;;  %v1776_v4 = vsel %vm911_vm5, %v1775_v25, %v1724_v26  ;;  %v5750_v25 = vld [vmem:[%s6234_s4 + $0x18] ss:$12 sps:$4 sm:$0xff]   ;;  %v5759_v26 = vld [vmem:[%s6234_s4 + $0x8] ss:$12 sps:$4 sm:$0xff]  }
 0xae7   : > { %v1727_v5 = vpop.f32.mrb[30].mxu0  ;;  %1777 = vrot.lane.b32.xlu0 %v1776_v4, %s5182_s29  ;;  %v5768_v2 = vld [vmem:[%s6234_s4 + $0x20] ss:$12 sps:$4 sm:$0xff]   ;;  %v5777_v4 = vld [vmem:[%s6233_s3 + $0x10] sm:$0xff]  }
 0xae8   : > { %v4578_v9 = vpop.f32.mrb[31].mxu0  ;;  %v5786_v5 = vld [vmem:[%s6233_s3 + $0x18] sm:$0xff]  }
 0xb59   : > { %v1778_v39 = vpop.permute.xlu0 %1777 }
 0xb5a   : > { %v1780_v12 = vsel %vm533_vm2, %v5593_v8, %v1778_v39  ;;  %v5712_v8 = vld [vmem:[%s6233_s3 + $0x8] sm:$0xff]  }
 0xb5b   : > { %v1781_v14 = vpack.c.bf16 %v1780_v12, %v1780_v12 }
 0xb5d   : > { %4594 = vmatmul.mubr.msk.bf16.vlgmr.msra.gmra.mrb[32].mxu0 %vm942_vm6, %v1781_v14 }
 0xb5e   : > { %4606 = vmatpush3.bf16.msra.mxu0 %v5703_v15  ;;  %4609 = vmatprep.mubr.msk.bf16.mxu0 %vm5180_vm1, %v5179_v6 }
 0xb5f   : > { %4607 = vmatprep.subr.bf16.mxu0 %v5179_v6 }
 0xb62   : > { %4608 = vmatpush3.bf16.msra.mxu0 %v5712_v8 }
 0xb63   : > { %4621 = vmatprep.subr.bf16.mxu0 %v5179_v6 }
 0xb65   : > { %4610 = vmatmul.mubr.msk.bf16.vlgmr.msra.gmra.mrb[36].mxu0 %vm533_vm2, %v1990_v27 }
 0xb66   : > { %4622 = vmatpush3.bf16.msra.mxu0 %v5442_v40  ;;  %4623 = vmatprep.mubr.msk.bf16.mxu0 %vm5180_vm1, %v5179_v6 }
 0xb67   : > { %4633 = vmatprep.subr.bf16.mxu0 %v5179_v6 }
 0xb86   : > { %v2076_v28 = vpop.f32.mrb[56].mxu1 }
 0xb87   : > { %v4619_v56 = vpop.f32.mrb[57].mxu1  ;;  %v2085_v29 = vsel %vm784_vm3, %v2076_v28, -inf }
 0xb88   : > { %2086 = vmax.xlane.f32.xlu1 %v2085_v29  ;;  %v2079_v30 = vpop.f32.mrb[58].mxu1 }
 0xb89   : > { %v4620_v31 = vpop.f32.mrb[59].mxu1 }
 0xc15   : > { %v2087_v32 = vpop.xlane.xlu1 %2086 }
 0xc16   : > { %v2089_v1 = vsub.f32 %v2076_v28, %v2087_v32  ;;  %v4261_v28 = vld [vmem:[%s5301_s15 + $0xc] sm:$0x7] }
 0xc17   : > { %v2360_v56 = vunpack.c.l.bf16 %v4261_v28 }
 0xc18   : > { %v2092_v11 = vmul.f32 1.442695, %v2089_v1 }
 0xc19   : > { %v2369_v32 = vrot.slane %v2360_v56, 2 }
 0xc1a   : > { %4987 = vpow2.f32 %v2092_v11 }
 0xc24   : > { %v4988_v38 = vpop.eup %4987 }
 0xc25   : > { %v2097_v45 = vsel %vm784_vm3, %v4988_v38, 0.0 }
 0xc30   : > { %v1819_v55 = vpop.f32.mrb[32].mxu0 }
 0xc31   : > { %v1820_v33 = vadd.f32 %v5542_v24, %v1819_v55  ;;  %v4595_v40 = vpop.f32.mrb[33].mxu0 }
 0xc32   : > { %v1822_v13 = vpop.f32.mrb[34].mxu0 }
 0xc33   : > { %4989 = vtanh.f32 %v1820_v33  ;;  %v4596_v34 = vpop.f32.mrb[35].mxu0 }
 0xc38   : > { %v2028_v35 = vpop.f32.mrb[36].mxu0 }
 0xc39   : > { %v4611_v36 = vpop.f32.mrb[37].mxu0  ;;  %v2082_v37 = vsel %vm784_vm3, %v2028_v35, -inf }
 0xc3a   : > { %v2031_v41 = vpop.f32.mrb[38].mxu0  ;;  %2083 = vmax.xlane.f32.xlu1 %v2082_v37 }
 0xc3b   : > { %v4612_v43 = vpop.f32.mrb[39].mxu0 }
 0xc3d   : > { %v4990_v44 = vpop.eup %4989 }
 0xc3e   : > { %v1833_v46 = vrot.slane %v4990_v44, %v5409_v58  ;;  %2098 = vadd.xlane.f32.xlu1 %v2097_v45  ;;  %v2379_v44 = vrot.slane %v2360_v56, 4 }
 0xc40   : > { %v1834_v47 = vcombine.high %v1833_v46, %v1833_v46  ;;  %v1841_v48 = vrot.slane %v1833_v46, %v5409_v58 }
 0xc42   : > { %v1848_v49 = vrot.slane %v1834_v47, %v5409_v58  ;;  %1851 = vst.msk [vmem:[#allocation3 + $0x2] sm:$0x1] %vm1012_vm7, %v1841_v48 }
 0xc44   : > { %1852 = vst.msk [vmem:[#allocation3 + $0xa] sm:$0x1] %vm1012_vm7, %v1848_v49 }
 0xcc7   : > { %v2084_v54 = vpop.xlane.xlu1 %2083 }
 0xcc8   : > { %v2088_v57 = vsub.f32 %v2028_v35, %v2084_v54 }
 0xcca   : > { %v2090_v60 = vmul.f32 1.442695, %v2088_v57 }
 0xccb   : > { %v2099_v61 = vpop.xlane.xlu1 %2098 }
 0xccc   : > { %4991 = vpow2.f32 %v2090_v60 }
 0xccd   : > { %4993 = vrcp.f32 %v2099_v61 }
 0xcd6   : > { %v4992_v62 = vpop.eup %4991 }
 0xcd7   : > { %v4994_v63 = vpop.eup %4993  ;;  %v2094_v16 = vsel %vm784_vm3, %v4992_v62, 0.0 }
 0xcd8   : > { %v2103_v59 = vmul.f32 %v4994_v63, %v4988_v38  ;;  %2095 = vadd.xlane.f32.xlu1 %v2094_v16 }
 0xcda   : > { %2273 = vst.msk [vmem:[#allocation4 + $0xb] sm:$0x1] %vm784_vm3, %v2103_v59  ;;  %v2105_v18 = vpack.c.bf16 %v2103_v59, %v2103_v59 }
 0xcdc   : > { %4630 = vmatmul.mubr.msk.bf16.vlgmr.msra.gmra.mrb[60].mxu1 %vm815_vm4, %v2105_v18 }
 0xcdd   : > { %2278 = vmatpush1.bf16.msra.mxu1 %v5737_v19  ;;  %2309 = vmatprep.mubr.bf16.mxu1 %v5178_v3 }
 0xcde   : > { %2279 = vmatprep.subr.bf16.mxu1 %v5744_v20 }
 0xce1   : > { %2280 = vmatpush1.bf16.msra.mxu1 %v5750_v25 }
 0xce2   : > { %4645 = vmatprep.subr.bf16.mxu1 %v5179_v6 }
 0xce4   : > { %4259 = vmatmul.mubr.msk.bf16.vlgmr.msra.gmra.mrb[64].mxu1 %vm533_vm2, %v5679_v7 }
 0xce5   : > { %4646 = vmatpush3.bf16.msra.mxu1 %v5759_v26  ;;  %4649 = vmatprep.mubr.msk.bf16.mxu1 %vm5180_vm1, %v5179_v6 }
 0xce6   : > { %4647 = vmatprep.subr.bf16.mxu1 %v5179_v6 }
 0xce9   : > { %4648 = vmatpush3.bf16.msra.mxu1 %v5768_v2 }
 0xcea   : > { %4661 = vmatprep.subr.bf16.mxu1 %v5179_v6 }
 0xcec   : > { %4650 = vmatmul.mubr.msk.bf16.vlgmr.msra.gmra.mrb[68].mxu1 %vm533_vm2, %v5679_v7 }
 0xced   : > { %4662 = vmatpush3.bf16.msra.mxu1 %v5777_v4  ;;  %4665 = vmatprep.mubr.msk.bf16.mxu1 %vm5180_vm1, %v5179_v6 }
 0xcee   : > { %4663 = vmatprep.subr.bf16.mxu1 %v5179_v6 }
 0xcf1   : > { %4664 = vmatpush3.bf16.msra.mxu1 %v5786_v5 }
 0xcf2   : > { %4675 = vmatprep.subr.bf16.mxu1 %v5179_v6 }
 0xd65   : > { %v2096_v7 = vpop.xlane.xlu1 %2095 }
 0xd66   : > { %4995 = vrcp.f32 %v2096_v7 }
 0xd70   : > { %v4996_v9 = vpop.eup %4995 }
 0xd71   : > { %v2101_v39 = vmul.f32 %v4996_v9, %v4992_v62  ;;  %v5821_v9 = vld [vmem:[%s6232_s2 + $0x8] sm:$0xff]  }
 0xd73   : > { %2272 = vst.msk [vmem:[#allocation4 + $0x3] sm:$0x1] %vm784_vm3, %v2101_v39  ;;  %v2104_v12 = vpack.c.bf16 %v2101_v39, %v2101_v39 }
 0xd75   : > { %4624 = vmatmul.mubr.msk.bf16.vlgmr.msra.gmra.mrb[40].mxu0 %vm815_vm4, %v2104_v12 }
 0xd76   : > { %4634 = vmatpush3.bf16.msra.mxu0 %v5476_v50  ;;  %4641 = vmatprep.mubr.msk.bf16.mxu0 %vm5180_vm1, %v5179_v6 }
 0xd77   : > { %4635 = vmatprep.subr.bf16.mxu0 %v5179_v6 }
 0xd7a   : > { %4636 = vmatpush3.bf16.msra.mxu0 %v5482_v51 }
 0xd7b   : > { %4637 = vmatprep.subr.bf16.mxu0 %v5179_v6 }
 0xd7e   : > { %4638 = vmatpush3.bf16.msra.mxu0 %v5489_v52 }
 0xd7f   : > { %4639 = vmatprep.subr.bf16.mxu0 %v5179_v6 }
 0xd82   : > { %4640 = vmatpush3.bf16.msra.mxu0 %v5496_v53 }
 0xd83   : > { %4653 = vmatprep.subr.bf16.mxu0 %v5179_v6 }
 0xdaf   : > { %v2186_v14 = vpop.f32.mrb[60].mxu1 }
 0xdb0   : > { %v4631_v10 = vpop.f32.mrb[61].mxu1  ;;  %v2194_v39 = vrot.slane %v2186_v14, 7 }
 0xdb1   : > { %v2189_v50 = vpop.f32.mrb[62].mxu1 }
 0xdb2   : > { %v4632_v27 = vpop.f32.mrb[63].mxu1 }
 0xdb7   : > { %v2311_v29 = vpop.f32.mrb[64].mxu1 }
 0xdb8   : > { %v2312_v30 = vadd.f32 %v2311_v29, %v5399_v21  ;;  %v2313_v51 = vpop.f32.mrb[65].mxu1 }
 0xdb9   : > { %v2314_v31 = vadd.f32 %v2313_v51, %v5401_v23  ;;  %v2315_v52 = vpop.f32.mrb[66].mxu1 }
 0xdba   : > { %v2361_v1 = vadd.f32 %v2360_v56, %v2312_v30  ;;  %v2316_v11 = vpop.f32.mrb[67].mxu1  ;;  %v5844_v52 = vld [vmem:[%s6232_s2] sm:$0xff]  }
 0xdbb   : > { %v2371_v53 = vadd.f32 %v2369_v32, %v2314_v31 }
 0xdbc   : > { %v4262_v55 = vmul.f32 -1.442695, %v2361_v1 }
 0xdbd   : > { %v4263_v13 = vmul.f32 -1.442695, %v2371_v53 }
 0xdbe   : > { %4997 = vpow2.f32 %v4262_v55 }
 0xdbf   : > { %v2352_v33 = vpop.f32.mrb[68].mxu1  ;;  %4999 = vpow2.f32 %v4263_v13 }
 0xdc0   : > { %v4651_v40 = vpop.f32.mrb[69].mxu1  ;;  %v2353_v43 = vadd.f32 %v2352_v33, %v5405_v42 }
 0xdc1   : > { %v2355_v34 = vpop.f32.mrb[70].mxu1 }
 0xdc2   : > { %v4652_v35 = vpop.f32.mrb[71].mxu1 }
 0xdc8   : > { %v4998_v36 = vpop.eup %4997 }
 0xdc9   : > { %v2365_v37 = vadd.f32 1.0, %v4998_v36  ;;  %v5000_v38 = vpop.eup %4999 }
 0xdca   : > { %v2375_v41 = vadd.f32 1.0, %v5000_v38 }
 0xdcb   : > { %5001 = vrcp.f32 %v2365_v37 }
 0xdcc   : > { %5003 = vrcp.f32 %v2375_v41 }
 0xdd5   : > { %v5002_v45 = vpop.eup %5001 }
 0xdd6   : > { %v2378_v46 = vmul.f32 %v5002_v45, %v2353_v43  ;;  %v5004_v48 = vpop.eup %5003 }
 0xdd7   : > { %v2383_v49 = vsub.f32 1.0, %v5004_v48  ;;  %v2385_v57 = vmul.f32 %v5004_v48, %v5675_v0 }
 0xdd8   : > { %v2381_v47 = vadd.f32 %v2379_v44, %v2378_v46 }
 0xdda   : > { %5005 = vtanh.f32 %v2381_v47 }
 0xde4   : > { %v5006_v54 = vpop.eup %5005 }
 0xde5   : > { %v2384_v60 = vmul.f32 %v5006_v54, %v2383_v49 }
 0xde7   : > { %v5807_v61 = vadd.f32 %v2385_v57, %v2384_v60 }
 0xde9   : > { %v5811_v62 = vpack.c.bf16 %v5807_v61, %v5807_v61 }
 0xdeb   : > { %v2395_v63 = vrot.slane %v5811_v62, %v5409_v58 }
 0xded   : > { %v2402_v16 = vrot.slane %v2395_v63, %v5409_v58 }
 0xdef   : > { %v2404_v59 = vunpack.i.h.s16 %v2402_v16  ;;  %v4264_v14 = vpack.i.b16 %v2402_v16, %v2402_v16 }
 0xdf1   : > { %v2453_v18 = vpack.i.b16 %v2404_v59, %v2404_v59  ;;  %v2409_v51 = vrot.slane %v4264_v14, %v5392_v17 }
 0xdf3   : > { %v2457_v7 = vrot.slane %v2453_v18, %v5392_v17 }
 0xdf5   : > { %4666 = vmatmul.mubr.msk.bf16.vlgmr.msra.gmra.mrb[72].mxu1 %vm533_vm2, %v2457_v7 }
 0xdf6   : > { %4676 = vmatpush3.bf16.msra.mxu1 %v5821_v9  ;;  %4677 = vmatprep.mubr.msk.bf16.mxu1 %vm5180_vm1, %v5179_v6 }
 0xdf7   : > { %2696 = vmatprep.subr.bf16.mxu1 %v5692_v22 }
 0xe48   : > { %v2143_v12 = vpop.f32.mrb[40].mxu0 }
 0xe49   : > { %v4625_v10 = vpop.f32.mrb[41].mxu0  ;;  %v2195_v50 = vsel %vm911_vm5, %v2194_v39, %v2143_v12 }
 0xe4a   : > { %v2146_v27 = vpop.f32.mrb[42].mxu0  ;;  %2196 = vrot.lane.b32.xlu0 %v2195_v50, %s5182_s29 }
 0xe4b   : > { %v4626_v28 = vpop.f32.mrb[43].mxu0 }
 0xebc   : > { %v2197_v56 = vpop.permute.xlu0 %2196 }
 0xebd   : > { %v2199_v29 = vsel %vm533_vm2, %v5675_v0, %v2197_v56 }
 0xebe   : > { %v2200_v30 = vpack.c.bf16 %v2199_v29, %v2199_v29  ;;  %v5889_v29 = vld [vmem:[%s6236_s6] sm:$0xff]  }
 0xec0   : > { %4642 = vmatmul.mubr.msk.bf16.vlgmr.msra.gmra.mrb[44].mxu0 %vm942_vm6, %v2200_v30 }
 0xec1   : > { %4654 = vmatpush3.bf16.msra.mxu0 %v5703_v15  ;;  %4657 = vmatprep.mubr.msk.bf16.mxu0 %vm5180_vm1, %v5179_v6 }
 0xec2   : > { %4655 = vmatprep.subr.bf16.mxu0 %v5179_v6 }
 0xec5   : > { %4656 = vmatpush3.bf16.msra.mxu0 %v5712_v8 }
 0xec6   : > { %4669 = vmatprep.subr.bf16.mxu0 %v5179_v6 }
 0xec8   : > { %v2495_v31 = vpop.f32.mrb[72].mxu1  ;;  %4658 = vmatmul.mubr.msk.bf16.vlgmr.msra.gmra.mrb[48].mxu0 %vm533_vm2, %v2409_v51  ;;  %v4272_v51 = vld [vmem:[%s5301_s15 + $0xf] sm:$0x7] }
 0xec9   : > { %v4667_v0 = vpop.f32.mrb[73].mxu1  ;;  %v2504_v32 = vsel %vm784_vm3, %v2495_v31, -inf  ;;  %4670 = vmatpush3.bf16.msra.mxu0 %v5844_v52  ;;  %4671 = vmatprep.mubr.msk.bf16.mxu0 %vm5180_vm1, %v5179_v6 }
 0xeca   : > { %2505 = vmax.xlane.f32.xlu1 %v2504_v32  ;;  %v2498_v1 = vpop.f32.mrb[74].mxu1  ;;  %4681 = vmatprep.subr.bf16.mxu0 %v5179_v6  ;;  %v2779_v0 = vunpack.c.l.bf16 %v4272_v51 }
 0xecb   : > { %v4668_v11 = vpop.f32.mrb[75].mxu1 }
 0xf57   : > { %v2506_v55 = vpop.xlane.xlu1 %2505 }
 0xf58   : > { %v2508_v53 = vsub.f32 %v2495_v31, %v2506_v55  ;;  %v5899_v31 = vld [vmem:[%s6236_s6 + $0x8] sm:$0xff]   ;;  %v5907_v55 = vld [vmem:[%s6236_s6 + $0x10] sm:$0xff]  }
 0xf5a   : > { %v2511_v33 = vmul.f32 1.442695, %v2508_v53 }
 0xf5c   : > { %5007 = vpow2.f32 %v2511_v33  ;;  %v2788_v33 = vrot.slane %v2779_v0, 2 }
 0xf66   : > { %v5008_v40 = vpop.eup %5007 }
 0xf67   : > { %v2516_v13 = vsel %vm784_vm3, %v5008_v40, 0.0 }
 0xf68   : > { %2517 = vadd.xlane.f32.xlu1 %v2516_v13 }
 0xf93   : > { %v2238_v34 = vpop.f32.mrb[44].mxu0 }
 0xf94   : > { %v2239_v35 = vadd.f32 %v5542_v24, %v2238_v34  ;;  %v4643_v36 = vpop.f32.mrb[45].mxu0 }
 0xf95   : > { %v2241_v37 = vpop.f32.mrb[46].mxu0  ;;  %v5915_v36 = vld [vmem:[%s6236_s6 + $0x18] sm:$0xff]  }
 0xf96   : > { %5009 = vtanh.f32 %v2239_v35  ;;  %v4644_v38 = vpop.f32.mrb[47].mxu0 }
 0xf9b   : > { %v2447_v41 = vpop.f32.mrb[48].mxu0 }
 0xf9c   : > { %v4659_v43 = vpop.f32.mrb[49].mxu0  ;;  %v2501_v44 = vsel %vm784_vm3, %v2447_v41, -inf }
 0xf9d   : > { %2502 = vmax.xlane.f32.xlu0 %v2501_v44  ;;  %v2450_v45 = vpop.f32.mrb[50].mxu0 }
 0xf9e   : > { %v4660_v46 = vpop.f32.mrb[51].mxu0 }
 0xfa0   : > { %v5010_v47 = vpop.eup %5009 }
 0xfa1   : > { %v2252_v48 = vrot.slane %v5010_v47, %v5409_v58 }
 0xfa3   : > { %v2253_v49 = vcombine.high %v2252_v48, %v2252_v48  ;;  %v2260_v54 = vrot.slane %v2252_v48, %v5409_v58 }
 0xfa5   : > { %v2267_v57 = vrot.slane %v2253_v49, %v5409_v58  ;;  %2270 = vst.msk [vmem:[#allocation3 + $0x3] sm:$0x1] %vm1012_vm7, %v2260_v54 }
 0xfa7   : > { %2271 = vst.msk [vmem:[#allocation3 + $0xb] sm:$0x1] %vm1012_vm7, %v2267_v57  ;;  %v2798_v57 = vrot.slane %v2779_v0, 4 }
 0xff5   : > { %v2518_v24 = vpop.xlane.xlu1 %2517 }
 0xff6   : > { %5011 = vrcp.f32 %v2518_v24 }
0x1000   : > { %v5012_v60 = vpop.eup %5011 }
0x1001   : > { %v2522_v63 = vmul.f32 %v5012_v60, %v5008_v40 }
0x1003   : > { %2692 = vst.msk [vmem:[#allocation4 + $0xc] sm:$0x1] %vm784_vm3, %v2522_v63  ;;  %v2524_v16 = vpack.c.bf16 %v2522_v63, %v2522_v63 }
0x1005   : > { %4678 = vmatmul.mubr.msk.bf16.vlgmr.msra.gmra.mrb[76].mxu1 %vm815_vm4, %v2524_v16 }
0x1006   : > { %2697 = vmatpush1.bf16.msra.mxu1 %v5737_v19  ;;  %2728 = vmatprep.mubr.bf16.mxu1 %v5178_v3 }
0x1007   : > { %2698 = vmatprep.subr.bf16.mxu1 %v5744_v20 }
0x100a   : > { %2699 = vmatpush1.bf16.msra.mxu1 %v5750_v25 }
0x100b   : > { %4693 = vmatprep.subr.bf16.mxu1 %v5179_v6 }
0x100d   : > { %4270 = vmatmul.mubr.msk.bf16.vlgmr.msra.gmra.mrb[80].mxu1 %vm533_vm2, %v5811_v62 }
0x100e   : > { %4694 = vmatpush3.bf16.msra.mxu1 %v5759_v26  ;;  %4697 = vmatprep.mubr.msk.bf16.mxu1 %vm5180_vm1, %v5179_v6 }
0x100f   : > { %4695 = vmatprep.subr.bf16.mxu1 %v5179_v6 }
0x1012   : > { %4696 = vmatpush3.bf16.msra.mxu1 %v5768_v2 }
0x1013   : > { %4709 = vmatprep.subr.bf16.mxu1 %v5179_v6 }
0x1015   : > { %4698 = vmatmul.mubr.msk.bf16.vlgmr.msra.gmra.mrb[84].mxu1 %vm533_vm2, %v5811_v62 }
0x1016   : > { %4710 = vmatpush3.bf16.msra.mxu1 %v5777_v4  ;;  %4713 = vmatprep.mubr.msk.bf16.mxu1 %vm5180_vm1, %v5179_v6 }
0x1017   : > { %4711 = vmatprep.subr.bf16.mxu1 %v5179_v6 }
0x101a   : > { %4712 = vmatpush3.bf16.msra.mxu1 %v5786_v5 }
0x101b   : > { %4723 = vmatprep.subr.bf16.mxu1 %v5179_v6 }
0x102a   : > { %v2503_v59 = vpop.xlane.xlu0 %2502 }
0x102b   : > { %v2507_v18 = vsub.f32 %v2447_v41, %v2503_v59 }
0x102d   : > { %v2509_v7 = vmul.f32 1.442695, %v2507_v18 }
0x102f   : > { %5013 = vpow2.f32 %v2509_v7 }
0x1039   : > { %v5014_v39 = vpop.eup %5013 }
0x103a   : > { %v2513_v12 = vsel %vm784_vm3, %v5014_v39, 0.0 }
0x103b   : > { %2514 = vadd.xlane.f32.xlu1 %v2513_v12 }
0x10c8   : > { %v2515_v62 = vpop.xlane.xlu1 %2514 }
0x10c9   : > { %5015 = vrcp.f32 %v2515_v62 }
0x10d3   : > { %v5016_v10 = vpop.eup %5015 }
0x10d4   : > { %v2520_v50 = vmul.f32 %v5016_v10, %v5014_v39 }
0x10d6   : > { %2691 = vst.msk [vmem:[#allocation4 + $0x4] sm:$0x1] %vm784_vm3, %v2520_v50  ;;  %v2523_v27 = vpack.c.bf16 %v2520_v50, %v2520_v50 }
0x10d8   : > { %v5883_v28 = vpop.f32.mrb[76].mxu1  ;;  %4672 = vmatmul.mubr.msk.bf16.vlgmr.msra.gmra.mrb[52].mxu0 %vm815_vm4, %v2523_v27 }
0x10d9   : > { %v4679_v56 = vpop.f32.mrb[77].mxu1  ;;  %4682 = vmatpush3.bf16.msra.mxu0 %v5889_v29  ;;  %4689 = vmatprep.mubr.msk.bf16.mxu0 %vm5180_vm1, %v5179_v6 }
0x10da   : > { %v2608_v30 = vpop.f32.mrb[78].mxu1  ;;  %4683 = vmatprep.subr.bf16.mxu0 %v5179_v6 }
0x10db   : > { %v4680_v14 = vpop.f32.mrb[79].mxu1 }
0x10dc   : > { %v2613_v14 = vrot.slane %v5883_v28, 7 }
0x10dd   : > { %4684 = vmatpush3.bf16.msra.mxu0 %v5899_v31 }
0x10de   : > { %4685 = vmatprep.subr.bf16.mxu0 %v5179_v6 }
0x10e0   : > { %v2730_v32 = vpop.f32.mrb[80].mxu1 }
0x10e1   : > { %v2731_v1 = vadd.f32 %v2730_v32, %v5399_v21  ;;  %v2732_v11 = vpop.f32.mrb[81].mxu1  ;;  %4686 = vmatpush3.bf16.msra.mxu0 %v5907_v55 }
0x10e2   : > { %v2733_v53 = vadd.f32 %v2732_v11, %v5401_v23  ;;  %v2734_v40 = vpop.f32.mrb[82].mxu1  ;;  %4687 = vmatprep.subr.bf16.mxu0 %v5179_v6 }
0x10e3   : > { %v2780_v13 = vadd.f32 %v2779_v0, %v2731_v1  ;;  %v2735_v34 = vpop.f32.mrb[83].mxu1 }
0x10e4   : > { %v2790_v37 = vadd.f32 %v2788_v33, %v2733_v53 }
0x10e5   : > { %v4273_v35 = vmul.f32 -1.442695, %v2780_v13  ;;  %4688 = vmatpush3.bf16.msra.mxu0 %v5915_v36 }
0x10e6   : > { %4701 = vmatprep.subr.bf16.mxu0 %v5179_v6  ;;  %v4274_v43 = vmul.f32 -1.442695, %v2790_v37 }
0x10e7   : > { %5017 = vpow2.f32 %v4273_v35 }
0x10e8   : > { %v2771_v38 = vpop.f32.mrb[84].mxu1  ;;  %5019 = vpow2.f32 %v4274_v43 }
0x10e9   : > { %v4699_v41 = vpop.f32.mrb[85].mxu1  ;;  %v2772_v54 = vadd.f32 %v2771_v38, %v5405_v42 }
0x10ea   : > { %v2774_v44 = vpop.f32.mrb[86].mxu1 }
0x10eb   : > { %v4700_v45 = vpop.f32.mrb[87].mxu1 }
0x10f1   : > { %v5018_v46 = vpop.eup %5017 }
0x10f2   : > { %v2784_v47 = vadd.f32 1.0, %v5018_v46  ;;  %v5020_v48 = vpop.eup %5019  ;;  %v5958_v46 = vld [vmem:[%s6237_s7] ss:$0 sm:$0xff] }
0x10f3   : > { %v2794_v49 = vadd.f32 1.0, %v5020_v48 }
0x10f4   : > { %5021 = vrcp.f32 %v2784_v47 }
0x10f5   : > { %5023 = vrcp.f32 %v2794_v49 }
0x10fe   : > { %v5022_v24 = vpop.eup %5021 }
0x10ff   : > { %v2797_v60 = vmul.f32 %v5022_v24, %v2772_v54  ;;  %v5024_v16 = vpop.eup %5023 }
0x1100   : > { %v2802_v59 = vsub.f32 1.0, %v5024_v16  ;;  %v2804_v7 = vmul.f32 %v5024_v16, %v5807_v61 }
0x1101   : > { %v2800_v63 = vadd.f32 %v2798_v57, %v2797_v60 }
0x1103   : > { %5025 = vtanh.f32 %v2800_v63 }
0x110d   : > { %v5026_v18 = vpop.eup %5025 }
0x110e   : > { %v2803_v39 = vmul.f32 %v5026_v18, %v2802_v59 }
0x1110   : > { %v5921_v12 = vadd.f32 %v2804_v7, %v2803_v39 }
0x1112   : > { %v5925_v62 = vpack.c.bf16 %v5921_v12, %v5921_v12 }
0x1114   : > { %v2814_v10 = vrot.slane %v5925_v62, %v5409_v58 }
0x1116   : > { %v2821_v50 = vrot.slane %v2814_v10, %v5409_v58 }
0x1118   : > { %v2823_v27 = vunpack.i.h.s16 %v2821_v50  ;;  %v4275_v38 = vpack.i.b16 %v2821_v50, %v2821_v50 }
0x111a   : > { %v2872_v56 = vpack.i.b16 %v2823_v27, %v2823_v27  ;;  %v2828_v41 = vrot.slane %v4275_v38, %v5392_v17  ;;  %v4283_v38 = vld [vmem:[%s5301_s15 + $0x12] sm:$0x7] }
0x111c   : > { %v2876_v30 = vrot.slane %v2872_v56, %v5392_v17 }
0x111e   : > { %4714 = vmatmul.mubr.msk.bf16.vlgmr.msra.gmra.mrb[88].mxu1 %vm533_vm2, %v2876_v30 }
0x111f   : > { %4724 = vmatpush3.bf16.msra.mxu1 %v5821_v9  ;;  %4725 = vmatprep.mubr.msk.bf16.mxu1 %vm5180_vm1, %v5179_v6 }
0x1120   : > { %3115 = vmatprep.subr.bf16.mxu1 %v5692_v22 }
0x11ab   : > { %v2562_v51 = vpop.f32.mrb[52].mxu0 }
0x11ac   : > { %v4673_v0 = vpop.f32.mrb[53].mxu0  ;;  %v2614_v32 = vsel %vm911_vm5, %v2613_v14, %v2562_v51 }
0x11ad   : > { %v2565_v1 = vpop.f32.mrb[54].mxu0  ;;  %2615 = vrot.lane.b32.xlu1 %v2614_v32, %s5182_s29 }
0x11ae   : > { %v4674_v11 = vpop.f32.mrb[55].mxu0 }
0x11f1   : > { %v2914_v53 = vpop.f32.mrb[88].mxu1 }
0x11f2   : > { %v4715_v33 = vpop.f32.mrb[89].mxu1  ;;  %v2923_v40 = vsel %vm784_vm3, %v2914_v53, -inf }
0x11f3   : > { %2924 = vmax.xlane.f32.xlu1 %v2923_v40  ;;  %v2917_v13 = vpop.f32.mrb[90].mxu1 }
0x11f4   : > { %v4716_v34 = vpop.f32.mrb[91].mxu1 }
0x121f   : > { %v2616_v35 = vpop.permute.xlu1 %2615 }
0x1220   : > { %v2618_v37 = vsel %vm533_vm2, %v5807_v61, %v2616_v35 }
0x1221   : > { %v2619_v28 = vpack.c.bf16 %v2618_v37, %v2618_v37 }
0x1223   : > { %4690 = vmatmul.mubr.msk.bf16.vlgmr.msra.gmra.mrb[56].mxu0 %vm942_vm6, %v2619_v28 }
0x1224   : > { %4702 = vmatpush3.bf16.msra.mxu0 %v5703_v15  ;;  %4705 = vmatprep.mubr.msk.bf16.mxu0 %vm5180_vm1, %v5179_v6 }
0x1225   : > { %4703 = vmatprep.subr.bf16.mxu0 %v5179_v6 }
0x1228   : > { %4704 = vmatpush3.bf16.msra.mxu0 %v5712_v8 }
0x1229   : > { %4717 = vmatprep.subr.bf16.mxu0 %v5179_v6 }
0x122b   : > { %4706 = vmatmul.mubr.msk.bf16.vlgmr.msra.gmra.mrb[60].mxu0 %vm533_vm2, %v2828_v41  ;;  %v3198_v41 = vunpack.c.l.bf16 %v4283_v38 }
0x122c   : > { %4718 = vmatpush3.bf16.msra.mxu0 %v5844_v52  ;;  %4719 = vmatprep.mubr.msk.bf16.mxu0 %vm5180_vm1, %v5179_v6 }
0x122d   : > { %4729 = vmatprep.subr.bf16.mxu0 %v5179_v6 }
0x1280   : > { %v2925_v61 = vpop.xlane.xlu1 %2924 }
0x1281   : > { %v2927_v43 = vsub.f32 %v2914_v53, %v2925_v61 }
0x1283   : > { %v2930_v44 = vmul.f32 1.442695, %v2927_v43 }
0x1285   : > { %5027 = vpow2.f32 %v2930_v44 }
0x128f   : > { %v5028_v63 = vpop.eup %5027 }
0x1290   : > { %v2935_v7 = vsel %vm784_vm3, %v5028_v63, 0.0 }
0x12f6   : > { %v2657_v45 = vpop.f32.mrb[56].mxu0 }
0x12f7   : > { %v2658_v47 = vadd.f32 %v5958_v46, %v2657_v45  ;;  %v4691_v48 = vpop.f32.mrb[57].mxu0 }
0x12f8   : > { %v2660_v49 = vpop.f32.mrb[58].mxu0 }
0x12f9   : > { %5029 = vtanh.f32 %v2658_v47  ;;  %v4692_v54 = vpop.f32.mrb[59].mxu0  ;;  %v3207_v47 = vrot.slane %v3198_v41, 2 }
0x12fe   : > { %v2866_v57 = vpop.f32.mrb[60].mxu0 }
0x12ff   : > { %v4707_v24 = vpop.f32.mrb[61].mxu0  ;;  %v2920_v60 = vsel %vm784_vm3, %v2866_v57, -inf }
0x1300   : > { %2921 = vmax.xlane.f32.xlu0 %v2920_v60  ;;  %v2869_v16 = vpop.f32.mrb[62].mxu0 }
0x1301   : > { %v4708_v59 = vpop.f32.mrb[63].mxu0 }
0x1303   : > { %v5030_v18 = vpop.eup %5029 }
0x1304   : > { %v2671_v39 = vrot.slane %v5030_v18, %v5409_v58  ;;  %2936 = vadd.xlane.f32.xlu0 %v2935_v7 }
0x1306   : > { %v2672_v10 = vcombine.high %v2671_v39, %v2671_v39  ;;  %v2679_v50 = vrot.slane %v2671_v39, %v5409_v58 }
0x1308   : > { %v2686_v27 = vrot.slane %v2672_v10, %v5409_v58  ;;  %2689 = vst.msk [vmem:[#allocation3 + $0x4] sm:$0x1] %vm1012_vm7, %v2679_v50 }
0x130a   : > { %2690 = vst.msk [vmem:[#allocation3 + $0xc] sm:$0x1] %vm1012_vm7, %v2686_v27 }
0x138d   : > { %v2922_v56 = vpop.xlane.xlu0 %2921 }
0x138e   : > { %v2926_v30 = vsub.f32 %v2866_v57, %v2922_v56  ;;  %v3217_v56 = vrot.slane %v3198_v41, 4 }
0x1390   : > { %v2928_v14 = vmul.f32 1.442695, %v2926_v30 }
0x1391   : > { %v2937_v51 = vpop.xlane.xlu0 %2936 }
0x1392   : > { %5031 = vpow2.f32 %v2928_v14 }
0x1393   : > { %5033 = vrcp.f32 %v2937_v51 }
0x139c   : > { %v5032_v0 = vpop.eup %5031 }
0x139d   : > { %v5034_v32 = vpop.eup %5033  ;;  %v2932_v1 = vsel %vm784_vm3, %v5032_v0, 0.0 }
0x139e   : > { %v2941_v11 = vmul.f32 %v5034_v32, %v5028_v63  ;;  %2933 = vadd.xlane.f32.xlu0 %v2932_v1 }
0x13a0   : > { %3111 = vst.msk [vmem:[#allocation4 + $0xd] sm:$0x1] %vm784_vm3, %v2941_v11  ;;  %v2943_v53 = vpack.c.bf16 %v2941_v11, %v2941_v11 }
0x13a2   : > { %4726 = vmatmul.mubr.msk.bf16.vlgmr.msra.gmra.mrb[92].mxu1 %vm815_vm4, %v2943_v53 }
0x13a3   : > { %3116 = vmatpush1.bf16.msra.mxu1 %v5737_v19  ;;  %3147 = vmatprep.mubr.bf16.mxu1 %v5178_v3 }
0x13a4   : > { %3117 = vmatprep.subr.bf16.mxu1 %v5744_v20 }
0x13a7   : > { %3118 = vmatpush1.bf16.msra.mxu1 %v5750_v25 }
0x13a8   : > { %4741 = vmatprep.subr.bf16.mxu1 %v5179_v6 }
0x13aa   : > { %4281 = vmatmul.mubr.msk.bf16.vlgmr.msra.gmra.mrb[96].mxu1 %vm533_vm2, %v5925_v62 }
0x13ab   : > { %4742 = vmatpush3.bf16.msra.mxu1 %v5759_v26  ;;  %4745 = vmatprep.mubr.msk.bf16.mxu1 %vm5180_vm1, %v5179_v6 }
0x13ac   : > { %4743 = vmatprep.subr.bf16.mxu1 %v5179_v6 }
0x13af   : > { %4744 = vmatpush3.bf16.msra.mxu1 %v5768_v2 }
0x13b0   : > { %4757 = vmatprep.subr.bf16.mxu1 %v5179_v6 }
0x13b2   : > { %4746 = vmatmul.mubr.msk.bf16.vlgmr.msra.gmra.mrb[100].mxu1 %vm533_vm2, %v5925_v62 }
0x13b3   : > { %4758 = vmatpush3.bf16.msra.mxu1 %v5777_v4  ;;  %4761 = vmatprep.mubr.msk.bf16.mxu1 %vm5180_vm1, %v5179_v6 }
0x13b4   : > { %4759 = vmatprep.subr.bf16.mxu1 %v5179_v6 }
0x13b7   : > { %4760 = vmatpush3.bf16.msra.mxu1 %v5786_v5 }
0x13b8   : > { %4771 = vmatprep.subr.bf16.mxu1 %v5179_v6 }
0x142b   : > { %v2934_v33 = vpop.xlane.xlu0 %2933 }
0x142c   : > { %5035 = vrcp.f32 %v2934_v33 }
0x1436   : > { %v5036_v40 = vpop.eup %5035 }
0x1437   : > { %v2939_v13 = vmul.f32 %v5036_v40, %v5032_v0 }
0x1439   : > { %3110 = vst.msk [vmem:[#allocation4 + $0x5] sm:$0x1] %vm784_vm3, %v2939_v13  ;;  %v2942_v34 = vpack.c.bf16 %v2939_v13, %v2939_v13 }
0x143b   : > { %4720 = vmatmul.mubr.msk.bf16.vlgmr.msra.gmra.mrb[64].mxu0 %vm815_vm4, %v2942_v34 }
0x143c   : > { %4730 = vmatpush3.bf16.msra.mxu0 %v5889_v29  ;;  %4737 = vmatprep.mubr.msk.bf16.mxu0 %vm5180_vm1, %v5179_v6 }
0x143d   : > { %4731 = vmatprep.subr.bf16.mxu0 %v5179_v6 }
0x1440   : > { %4732 = vmatpush3.bf16.msra.mxu0 %v5899_v31 }
0x1441   : > { %4733 = vmatprep.subr.bf16.mxu0 %v5179_v6 }
0x1444   : > { %4734 = vmatpush3.bf16.msra.mxu0 %v5907_v55 }
0x1445   : > { %4735 = vmatprep.subr.bf16.mxu0 %v5179_v6 }
0x1448   : > { %4736 = vmatpush3.bf16.msra.mxu0 %v5915_v36 }
0x1449   : > { %4749 = vmatprep.subr.bf16.mxu0 %v5179_v6 }
0x1475   : > { %v3024_v62 = vpop.f32.mrb[92].mxu1 }
0x1476   : > { %v4727_v35 = vpop.f32.mrb[93].mxu1  ;;  %v3032_v38 = vrot.slane %v3024_v62, 7 }
0x1477   : > { %v3027_v37 = vpop.f32.mrb[94].mxu1 }
0x1478   : > { %v4728_v28 = vpop.f32.mrb[95].mxu1 }
0x147d   : > { %v3149_v61 = vpop.f32.mrb[96].mxu1 }
0x147e   : > { %v3150_v43 = vadd.f32 %v3149_v61, %v5399_v21  ;;  %v3151_v44 = vpop.f32.mrb[97].mxu1 }
0x147f   : > { %v3152_v45 = vadd.f32 %v3151_v44, %v5401_v23  ;;  %v3153_v48 = vpop.f32.mrb[98].mxu1 }
0x1480   : > { %v3199_v49 = vadd.f32 %v3198_v41, %v3150_v43  ;;  %v3154_v54 = vpop.f32.mrb[99].mxu1 }
0x1481   : > { %v3209_v24 = vadd.f32 %v3207_v47, %v3152_v45 }
0x1482   : > { %v4284_v57 = vmul.f32 -1.442695, %v3199_v49 }
0x1483   : > { %v4285_v16 = vmul.f32 -1.442695, %v3209_v24 }
0x1484   : > { %5037 = vpow2.f32 %v4284_v57 }
0x1485   : > { %v3190_v60 = vpop.f32.mrb[100].mxu1  ;;  %5039 = vpow2.f32 %v4285_v16 }
0x1486   : > { %v4747_v63 = vpop.f32.mrb[101].mxu1  ;;  %v3191_v27 = vadd.f32 %v3190_v60, %v5405_v42 }
0x1487   : > { %v3193_v59 = vpop.f32.mrb[102].mxu1 }
0x1488   : > { %v4748_v18 = vpop.f32.mrb[103].mxu1 }
0x148e   : > { %v5038_v7 = vpop.eup %5037 }
0x148f   : > { %v3203_v39 = vadd.f32 1.0, %v5038_v7  ;;  %v5040_v10 = vpop.eup %5039 }
0x1490   : > { %v3213_v50 = vadd.f32 1.0, %v5040_v10 }
0x1491   : > { %5041 = vrcp.f32 %v3203_v39 }
0x1492   : > { %5043 = vrcp.f32 %v3213_v50 }
0x149b   : > { %v5042_v30 = vpop.eup %5041 }
0x149c   : > { %v3216_v14 = vmul.f32 %v5042_v30, %v3191_v27  ;;  %v5044_v0 = vpop.eup %5043 }
0x149d   : > { %v3221_v32 = vsub.f32 1.0, %v5044_v0  ;;  %v3223_v11 = vmul.f32 %v5044_v0, %v5921_v12 }
0x149e   : > { %v3219_v51 = vadd.f32 %v3217_v56, %v3216_v14 }
0x14a0   : > { %5045 = vtanh.f32 %v3219_v51 }
0x14aa   : > { %v5046_v1 = vpop.eup %5045 }
0x14ab   : > { %v3222_v53 = vmul.f32 %v5046_v1, %v3221_v32 }
0x14ad   : > { %v6009_v33 = vadd.f32 %v3223_v11, %v3222_v53 }
0x14af   : > { %v6013_v40 = vpack.c.bf16 %v6009_v33, %v6009_v33 }
0x14b1   : > { %v3233_v13 = vrot.slane %v6013_v40, %v5409_v58 }
0x14b3   : > { %v3240_v34 = vrot.slane %v3233_v13, %v5409_v58 }
0x14b5   : > { %v3242_v35 = vunpack.i.h.s16 %v3240_v34 }
0x14b7   : > { %v3291_v37 = vpack.i.b16 %v3242_v35, %v3242_v35 }
0x14b9   : > { %v3295_v28 = vrot.slane %v3291_v37, %v5392_v17 }
0x14bb   : > { %4762 = vmatmul.mubr.msk.bf16.vlgmr.msra.gmra.mrb[104].mxu1 %vm533_vm2, %v3295_v28 }
0x14bc   : > { %4772 = vmatpush3.bf16.msra.mxu1 %v5821_v9  ;;  %4773 = vmatprep.mubr.msk.bf16.mxu1 %vm5180_vm1, %v5179_v6 }
0x14bd   : > { %3534 = vmatprep.subr.bf16.mxu1 %v5692_v22  ;;  %v4286_v22 = vpack.i.b16 %v3240_v34, %v3240_v34 }
0x14bf   : > { %v3247_v62 = vrot.slane %v4286_v22, %v5392_v17 }
0x150e   : > { %v2981_v41 = vpop.f32.mrb[64].mxu0 }
0x150f   : > { %v4721_v61 = vpop.f32.mrb[65].mxu0  ;;  %v3033_v43 = vsel %vm911_vm5, %v3032_v38, %v2981_v41 }
0x1510   : > { %v2984_v44 = vpop.f32.mrb[66].mxu0  ;;  %3034 = vrot.lane.b32.xlu0 %v3033_v43, %s5182_s29  ;;  %v4294_v43 = vld [vmem:[%s5301_s15 + $0x15] sm:$0x7] }
0x1511   : > { %v4722_v45 = vpop.f32.mrb[67].mxu0  ;;  %v3617_v44 = vunpack.c.l.bf16 %v4294_v43  ;;  %v5097_v43 = vld [vmem:[%s6233_s3 + $0x8] sm:$0xff]  }
0x1513   : > { %v3626_v22 = vrot.slane %v3617_v44, 2 }
0x1582   : > { %v3035_v47 = vpop.permute.xlu0 %3034 }
0x1583   : > { %v3037_v48 = vsel %vm533_vm2, %v5921_v12, %v3035_v47 }
0x1584   : > { %v3038_v49 = vpack.c.bf16 %v3037_v48, %v3037_v48 }
0x1586   : > { %4738 = vmatmul.mubr.msk.bf16.vlgmr.msra.gmra.mrb[68].mxu0 %vm942_vm6, %v3038_v49 }
0x1587   : > { %4750 = vmatpush3.bf16.msra.mxu0 %v5703_v15  ;;  %4753 = vmatprep.mubr.msk.bf16.mxu0 %vm5180_vm1, %v5179_v6 }
0x1588   : > { %4751 = vmatprep.subr.bf16.mxu0 %v5179_v6 }
0x158b   : > { %4752 = vmatpush3.bf16.msra.mxu0 %v5712_v8 }
0x158c   : > { %4765 = vmatprep.subr.bf16.mxu0 %v5179_v6 }
0x158e   : > { %v3333_v54 = vpop.f32.mrb[104].mxu1  ;;  %4754 = vmatmul.mubr.msk.bf16.vlgmr.msra.gmra.mrb[72].mxu0 %vm533_vm2, %v3247_v62 }
0x158f   : > { %v4763_v12 = vpop.f32.mrb[105].mxu1  ;;  %v3342_v57 = vsel %vm784_vm3, %v3333_v54, -inf  ;;  %4766 = vmatpush3.bf16.msra.mxu0 %v5844_v52  ;;  %4767 = vmatprep.mubr.msk.bf16.mxu0 %vm5180_vm1, %v5179_v6 }
0x1590   : > { %3343 = vmax.xlane.f32.xlu1 %v3342_v57  ;;  %v3336_v15 = vpop.f32.mrb[106].mxu1  ;;  %4777 = vmatprep.subr.bf16.mxu0 %v5179_v6 }
0x1591   : > { %v4764_v8 = vpop.f32.mrb[107].mxu1 }
0x161d   : > { %v3344_v24 = vpop.xlane.xlu1 %3343 }
0x161e   : > { %v3346_v60 = vsub.f32 %v3333_v54, %v3344_v24 }
0x1620   : > { %v3349_v63 = vmul.f32 1.442695, %v3346_v60 }
0x1622   : > { %5047 = vpow2.f32 %v3349_v63 }
0x162c   : > { %v5048_v16 = vpop.eup %5047 }
0x162d   : > { %v3354_v59 = vsel %vm784_vm3, %v5048_v16, 0.0 }
0x162e   : > { %3355 = vadd.xlane.f32.xlu1 %v3354_v59 }
0x1659   : > { %v3076_v18 = vpop.f32.mrb[68].mxu0 }
0x165a   : > { %v3077_v7 = vadd.f32 %v5958_v46, %v3076_v18  ;;  %v4739_v39 = vpop.f32.mrb[69].mxu0 }
0x165b   : > { %v3079_v10 = vpop.f32.mrb[70].mxu0  ;;  %v3636_v39 = vrot.slane %v3617_v44, 4 }
0x165c   : > { %5049 = vtanh.f32 %v3077_v7  ;;  %v4740_v50 = vpop.f32.mrb[71].mxu0 }
0x1661   : > { %v3285_v27 = vpop.f32.mrb[72].mxu0 }
0x1662   : > { %v4755_v56 = vpop.f32.mrb[73].mxu0  ;;  %v3339_v30 = vsel %vm784_vm3, %v3285_v27, -inf }
0x1663   : > { %3340 = vmax.xlane.f32.xlu0 %v3339_v30  ;;  %v3288_v14 = vpop.f32.mrb[74].mxu0 }
0x1664   : > { %v4756_v51 = vpop.f32.mrb[75].mxu0 }
0x1666   : > { %v5050_v0 = vpop.eup %5049 }
0x1667   : > { %v3090_v32 = vrot.slane %v5050_v0, %v5409_v58 }
0x1669   : > { %v3091_v1 = vcombine.high %v3090_v32, %v3090_v32  ;;  %v3098_v11 = vrot.slane %v3090_v32, %v5409_v58 }
0x166b   : > { %v3105_v53 = vrot.slane %v3091_v1, %v5409_v58  ;;  %3108 = vst.msk [vmem:[#allocation3 + $0x5] sm:$0x1] %vm1012_vm7, %v3098_v11 }
0x166d   : > { %3109 = vst.msk [vmem:[#allocation3 + $0xd] sm:$0x1] %vm1012_vm7, %v3105_v53 }
0x16bb   : > { %v3356_v13 = vpop.xlane.xlu1 %3355 }
0x16bc   : > { %5051 = vrcp.f32 %v3356_v13 }
0x16c6   : > { %v5052_v34 = vpop.eup %5051 }
0x16c7   : > { %v3360_v35 = vmul.f32 %v5052_v34, %v5048_v16 }
0x16c9   : > { %3530 = vst.msk [vmem:[#allocation4 + $0xe] sm:$0x1] %vm784_vm3, %v3360_v35  ;;  %v3362_v37 = vpack.c.bf16 %v3360_v35, %v3360_v35 }
0x16cb   : > { %4774 = vmatmul.mubr.msk.bf16.vlgmr.msra.gmra.mrb[108].mxu1 %vm815_vm4, %v3362_v37 }
0x16cc   : > { %3535 = vmatpush1.bf16.msra.mxu1 %v5737_v19  ;;  %3566 = vmatprep.mubr.bf16.mxu1 %v5178_v3 }
0x16cd   : > { %3536 = vmatprep.subr.bf16.mxu1 %v5744_v20 }
0x16d0   : > { %3537 = vmatpush1.bf16.msra.mxu1 %v5750_v25 }
0x16d1   : > { %4789 = vmatprep.subr.bf16.mxu1 %v5179_v6 }
0x16d3   : > { %4292 = vmatmul.mubr.msk.bf16.vlgmr.msra.gmra.mrb[112].mxu1 %vm533_vm2, %v6013_v40 }
0x16d4   : > { %4790 = vmatpush3.bf16.msra.mxu1 %v5759_v26  ;;  %4793 = vmatprep.mubr.msk.bf16.mxu1 %vm5180_vm1, %v5179_v6 }
0x16d5   : > { %4791 = vmatprep.subr.bf16.mxu1 %v5179_v6 }
0x16d8   : > { %4792 = vmatpush3.bf16.msra.mxu1 %v5768_v2 }
0x16d9   : > { %4805 = vmatprep.subr.bf16.mxu1 %v5179_v6 }
0x16db   : > { %4794 = vmatmul.mubr.msk.bf16.vlgmr.msra.gmra.mrb[116].mxu1 %vm533_vm2, %v6013_v40 }
0x16dc   : > { %4806 = vmatpush3.bf16.msra.mxu1 %v5777_v4  ;;  %4809 = vmatprep.mubr.msk.bf16.mxu1 %vm5180_vm1, %v5179_v6 }
0x16dd   : > { %4807 = vmatprep.subr.bf16.mxu1 %v5179_v6 }
0x16e0   : > { %4808 = vmatpush3.bf16.msra.mxu1 %v5786_v5 }
0x16e1   : > { %4819 = vmatprep.subr.bf16.mxu1 %v5179_v6 }
0x16f0   : > { %v3341_v3 = vpop.xlane.xlu0 %3340 }
0x16f1   : > { %v3345_v19 = vsub.f32 %v3285_v27, %v3341_v3 }
0x16f3   : > { %v3347_v20 = vmul.f32 1.442695, %v3345_v19 }
0x16f5   : > { %5053 = vpow2.f32 %v3347_v20 }
0x16ff   : > { %v5054_v25 = vpop.eup %5053 }
0x1700   : > { %v3351_v26 = vsel %vm784_vm3, %v5054_v25, 0.0 }
0x1701   : > { %3352 = vadd.xlane.f32.xlu1 %v3351_v26 }
0x178e   : > { %v3353_v2 = vpop.xlane.xlu1 %3352 }
0x178f   : > { %5055 = vrcp.f32 %v3353_v2 }
0x1799   : > { %v5056_v4 = vpop.eup %5055 }
0x179a   : > { %v3358_v40 = vmul.f32 %v5056_v4, %v5054_v25 }
0x179c   : > { %3529 = vst.msk [vmem:[#allocation4 + $0x6] sm:$0x1] %vm784_vm3, %v3358_v40  ;;  %v3361_v28 = vpack.c.bf16 %v3358_v40, %v3358_v40 }
0x179e   : > { %v6075_v38 = vpop.f32.mrb[108].mxu1  ;;  %4768 = vmatmul.mubr.msk.bf16.vlgmr.msra.gmra.mrb[76].mxu0 %vm815_vm4, %v3361_v28 }
0x179f   : > { %v4775_v5 = vpop.f32.mrb[109].mxu1  ;;  %4778 = vmatpush3.bf16.msra.mxu0 %v5889_v29  ;;  %4785 = vmatprep.mubr.msk.bf16.mxu0 %vm5180_vm1, %v5179_v6  ;;  %v3451_v35 = vrot.slane %v6075_v38, 7 }
0x17a0   : > { %v3446_v41 = vpop.f32.mrb[110].mxu1  ;;  %4779 = vmatprep.subr.bf16.mxu0 %v5179_v6 }
0x17a1   : > { %v4776_v61 = vpop.f32.mrb[111].mxu1  ;;  %v5096_v41 = vld [vmem:[%s6233_s3] sm:$0xff]  }
0x17a3   : > { %4780 = vmatpush3.bf16.msra.mxu0 %v5899_v31 }
0x17a4   : > { %4781 = vmatprep.subr.bf16.mxu0 %v5179_v6 }
0x17a6   : > { %v3568_v45 = vpop.f32.mrb[112].mxu1 }
0x17a7   : > { %v3569_v47 = vadd.f32 %v3568_v45, %v5399_v21  ;;  %v3570_v48 = vpop.f32.mrb[113].mxu1  ;;  %4782 = vmatpush3.bf16.msra.mxu0 %v5907_v55 }
0x17a8   : > { %v3571_v49 = vadd.f32 %v3570_v48, %v5401_v23  ;;  %v3572_v62 = vpop.f32.mrb[114].mxu1  ;;  %4783 = vmatprep.subr.bf16.mxu0 %v5179_v6 }
0x17a9   : > { %v3618_v54 = vadd.f32 %v3617_v44, %v3569_v47  ;;  %v3573_v12 = vpop.f32.mrb[115].mxu1 }
0x17aa   : > { %v3628_v15 = vadd.f32 %v3626_v22, %v3571_v49 }
0x17ab   : > { %v4295_v57 = vmul.f32 -1.442695, %v3618_v54  ;;  %4784 = vmatpush3.bf16.msra.mxu0 %v5915_v36 }
0x17ac   : > { %4797 = vmatprep.subr.bf16.mxu0 %v5179_v6  ;;  %v4296_v24 = vmul.f32 -1.442695, %v3628_v15 }
0x17ad   : > { %5057 = vpow2.f32 %v4295_v57 }
0x17ae   : > { %v3609_v8 = vpop.f32.mrb[116].mxu1  ;;  %5059 = vpow2.f32 %v4296_v24 }
0x17af   : > { %v4795_v21 = vpop.f32.mrb[117].mxu1  ;;  %v3610_v7 = vadd.f32 %v3609_v8, %v5405_v42 }
0x17b0   : > { %v3612_v60 = vpop.f32.mrb[118].mxu1 }
0x17b1   : > { %v4796_v63 = vpop.f32.mrb[119].mxu1 }
0x17b7   : > { %v5058_v23 = vpop.eup %5057 }
0x17b8   : > { %v3622_v16 = vadd.f32 1.0, %v5058_v23  ;;  %v5060_v59 = vpop.eup %5059 }
0x17b9   : > { %v3632_v18 = vadd.f32 1.0, %v5060_v59 }
0x17ba   : > { %5061 = vrcp.f32 %v3622_v16 }
0x17bb   : > { %5063 = vrcp.f32 %v3632_v18 }
0x17c4   : > { %v5062_v10 = vpop.eup %5061 }
0x17c5   : > { %v3635_v50 = vmul.f32 %v5062_v10, %v3610_v7  ;;  %v5064_v56 = vpop.eup %5063 }
0x17c6   : > { %v3640_v30 = vsub.f32 1.0, %v5064_v56  ;;  %v3642_v51 = vmul.f32 %v5064_v56, %v6009_v33 }
0x17c7   : > { %v3638_v27 = vadd.f32 %v3636_v39, %v3635_v50 }
0x17c9   : > { %5065 = vtanh.f32 %v3638_v27 }
0x17d3   : > { %v5066_v14 = vpop.eup %5065 }
0x17d4   : > { %v3641_v0 = vmul.f32 %v5066_v14, %v3640_v30 }
0x17d6   : > { %v6093_v32 = vadd.f32 %v3642_v51, %v3641_v0 }
0x17d8   : > { %3951 = vst.msk [vmem:[#allocation2] sm:$0x3] %vm3950_vm8, %v6093_v32  ;;  %v3644_v42 = vpack.c.bf16 %v6093_v32, %v6093_v32 }
0x17da   : > { %v3652_v1 = vrot.slane %v3644_v42, %v5409_v58 }
0x17dc   : > { %v3659_v11 = vrot.slane %v3652_v1, %v5409_v58 }
0x17de   : > { %v3661_v53 = vunpack.i.h.s16 %v3659_v11  ;;  %v4297_v61 = vpack.i.b16 %v3659_v11, %v3659_v11 }
0x17e0   : > { %v3710_v13 = vpack.i.b16 %v3661_v53, %v3661_v53 }
0x17e2   : > { %v3714_v34 = vrot.slane %v3710_v13, %v5392_v17 }
0x17e4   : > { %4810 = vmatmul.mubr.msk.bf16.vlgmr.msra.gmra.mrb[120].mxu1 %vm533_vm2, %v3714_v34 }
0x17e5   : > { %4820 = vmatpush3.bf16.msra.mxu1 %v5821_v9  ;;  %4821 = vmatprep.mubr.msk.bf16.mxu1 %vm5180_vm1, %v5179_v6 }
0x1871   : > { %v3400_v37 = vpop.f32.mrb[76].mxu0 }
0x1872   : > { %v4769_v3 = vpop.f32.mrb[77].mxu0  ;;  %v3452_v19 = vsel %vm911_vm5, %v3451_v35, %v3400_v37 }
0x1873   : > { %v3403_v20 = vpop.f32.mrb[78].mxu0  ;;  %3453 = vrot.lane.b32.xlu1 %v3452_v19, %s5182_s29 }
0x1874   : > { %v4770_v25 = vpop.f32.mrb[79].mxu0 }
0x18b7   : > { %v3752_v26 = vpop.f32.mrb[120].mxu1 }
0x18b8   : > { %v4811_v2 = vpop.f32.mrb[121].mxu1  ;;  %v3761_v4 = vsel %vm784_vm3, %v3752_v26, -inf }
0x18b9   : > { %3762 = vmax.xlane.f32.xlu1 %v3761_v4  ;;  %v3755_v40 = vpop.f32.mrb[122].mxu1 }
0x18ba   : > { %v4812_v9 = vpop.f32.mrb[123].mxu1 }
0x18e5   : > { %v3454_v28 = vpop.permute.xlu1 %3453 }
0x18e6   : > { %v3456_v5 = vsel %vm533_vm2, %v6009_v33, %v3454_v28  ;;  %v3666_v33 = vrot.slane %v4297_v61, %v5392_v17 }
0x18e7   : > { %v3457_v38 = vpack.c.bf16 %v3456_v5, %v3456_v5 }
0x18e9   : > { %4786 = vmatmul.mubr.msk.bf16.vlgmr.msra.gmra.mrb[80].mxu0 %vm942_vm6, %v3457_v38 }
0x18ea   : > { %4798 = vmatpush3.bf16.msra.mxu0 %v5096_v41  ;;  %4801 = vmatprep.mubr.msk.bf16.mxu0 %vm5180_vm1, %v5179_v6 }
0x18eb   : > { %4799 = vmatprep.subr.bf16.mxu0 %v5179_v6 }
0x18ee   : > { %4800 = vmatpush3.bf16.msra.mxu0 %v5097_v43 }
0x18ef   : > { %4813 = vmatprep.subr.bf16.mxu0 %v5179_v6 }
0x18f1   : > { %4802 = vmatmul.mubr.msk.bf16.vlgmr.msra.gmra.mrb[84].mxu0 %vm533_vm2, %v3666_v33 }
0x18f2   : > { %4814 = vmatpush3.bf16.msra.mxu0 %v5844_v52  ;;  %4815 = vmatprep.mubr.msk.bf16.mxu0 %vm5180_vm1, %v5179_v6 }
0x18f3   : > { %4825 = vmatprep.subr.bf16.mxu0 %v5179_v6 }
0x1946   : > { %v3763_v44 = vpop.xlane.xlu1 %3762 }
0x1947   : > { %v3765_v45 = vsub.f32 %v3752_v26, %v3763_v44 }
0x1949   : > { %v3768_v47 = vmul.f32 1.442695, %v3765_v45 }
0x194b   : > { %5067 = vpow2.f32 %v3768_v47 }
0x1955   : > { %v5068_v57 = vpop.eup %5067 }
0x1956   : > { %v3773_v24 = vsel %vm784_vm3, %v5068_v57, 0.0 }
0x19bc   : > { %v3495_v48 = vpop.f32.mrb[80].mxu0 }
0x19bd   : > { %v3496_v49 = vadd.f32 %v5958_v46, %v3495_v48  ;;  %v4787_v22 = vpop.f32.mrb[81].mxu0 }
0x19be   : > { %v3498_v17 = vpop.f32.mrb[82].mxu0 }
0x19bf   : > { %5069 = vtanh.f32 %v3496_v49  ;;  %v4788_v62 = vpop.f32.mrb[83].mxu0 }
0x19c4   : > { %v3704_v54 = vpop.f32.mrb[84].mxu0 }
0x19c5   : > { %v4803_v12 = vpop.f32.mrb[85].mxu0  ;;  %v3758_v52 = vsel %vm784_vm3, %v3704_v54, -inf }
0x19c6   : > { %3759 = vmax.xlane.f32.xlu0 %v3758_v52  ;;  %v3707_v15 = vpop.f32.mrb[86].mxu0 }
0x19c7   : > { %v4804_v8 = vpop.f32.mrb[87].mxu0 }
0x19c9   : > { %v5070_v21 = vpop.eup %5069 }
0x19ca   : > { %v3509_v60 = vrot.slane %v5070_v21, %v5409_v58  ;;  %3774 = vadd.xlane.f32.xlu0 %v3773_v24 }
0x19cc   : > { %v3510_v63 = vcombine.high %v3509_v60, %v3509_v60  ;;  %v3517_v23 = vrot.slane %v3509_v60, %v5409_v58 }
0x19ce   : > { %v3524_v16 = vrot.slane %v3510_v63, %v5409_v58  ;;  %3527 = vst.msk [vmem:[#allocation3 + $0x6] sm:$0x1] %vm1012_vm7, %v3517_v23 }
0x19d0   : > { %3528 = vst.msk [vmem:[#allocation3 + $0xe] sm:$0x1] %vm1012_vm7, %v3524_v16 }
0x1a53   : > { %v3760_v59 = vpop.xlane.xlu0 %3759 }
0x1a54   : > { %v3764_v18 = vsub.f32 %v3704_v54, %v3760_v59 }
0x1a56   : > { %v3766_v7 = vmul.f32 1.442695, %v3764_v18 }
0x1a57   : > { %v3775_v39 = vpop.xlane.xlu0 %3774 }
0x1a58   : > { %5071 = vpow2.f32 %v3766_v7 }
0x1a59   : > { %5073 = vrcp.f32 %v3775_v39 }
0x1a62   : > { %v5072_v10 = vpop.eup %5071 }
0x1a63   : > { %v5074_v50 = vpop.eup %5073  ;;  %v3770_v27 = vsel %vm784_vm3, %v5072_v10, 0.0 }
0x1a64   : > { %v3779_v56 = vmul.f32 %v5074_v50, %v5068_v57  ;;  %3771 = vadd.xlane.f32.xlu0 %v3770_v27 }
0x1a66   : > { %3949 = vst.msk [vmem:[#allocation4 + $0xf] sm:$0x1] %vm784_vm3, %v3779_v56  ;;  %v3781_v30 = vpack.c.bf16 %v3779_v56, %v3779_v56 }
0x1a68   : > { %4822 = vmatmul.mubr.msk.bf16.vlgmr.msra.gmra.mrb[124].mxu1 %vm815_vm4, %v3781_v30 }
0x1a6d   : > { %v3960_v14 = vld [vmem:[#allocation4 + $0x8] sm:$0xff] }
0x1a6e   : > { %3962 = vst.msk [vmem:[%s5305_s18 + $0x8] sm:$0xff] %vm815_vm4, %v3960_v14 }
0x1af1   : > { %v3772_v51 = vpop.xlane.xlu0 %3771 }
0x1af2   : > { %5075 = vrcp.f32 %v3772_v51 }
0x1afc   : > { %v5076_v0 = vpop.eup %5075 }
0x1afd   : > { %v3777_v42 = vmul.f32 %v5076_v0, %v5072_v10 }
0x1aff   : > { %3948 = vst.msk [vmem:[#allocation4 + $0x7] sm:$0x1] %vm784_vm3, %v3777_v42  ;;  %v3780_v1 = vpack.c.bf16 %v3777_v42, %v3777_v42 }
0x1b01   : > { %4816 = vmatmul.mubr.msk.bf16.vlgmr.msra.gmra.mrb[88].mxu0 %vm815_vm4, %v3780_v1 }
0x1b02   : > { %4826 = vmatpush3.bf16.msra.mxu0 %v5889_v29  ;;  %4833 = vmatprep.mubr.msk.bf16.mxu0 %vm5180_vm1, %v5179_v6 }
0x1b03   : > { %4827 = vmatprep.subr.bf16.mxu0 %v5179_v6 }
0x1b06   : > { %v3959_v11 = vld [vmem:[#allocation4] sm:$0xff]  ;;  %4828 = vmatpush3.bf16.msra.mxu0 %v5899_v31 }
0x1b07   : > { %3961 = vst.msk [vmem:[%s5305_s18] sm:$0xff] %vm815_vm4, %v3959_v11  ;;  %4829 = vmatprep.subr.bf16.mxu0 %v5179_v6 }
0x1b0a   : > { %4830 = vmatpush3.bf16.msra.mxu0 %v5907_v55 }
0x1b0b   : > { %4831 = vmatprep.subr.bf16.mxu0 %v5179_v6 }
0x1b0e   : > { %4832 = vmatpush3.bf16.msra.mxu0 %v5915_v36 }
0x1b3b   : > { %v3862_v53 = vpop.f32.mrb[124].mxu1 }
0x1b3c   : > { %v4823_v29 = vpop.f32.mrb[125].mxu1  ;;  %v3870_v35 = vrot.slane %v3862_v53, 7 }
0x1b3d   : > { %v3865_v13 = vpop.f32.mrb[126].mxu1 }
0x1b3e   : > { %v4824_v34 = vpop.f32.mrb[127].mxu1 }
0x1bd4   : > { %v3819_v37 = vpop.f32.mrb[88].mxu0 }
0x1bd5   : > { %v4817_v3 = vpop.f32.mrb[89].mxu0  ;;  %v3871_v19 = vsel %vm911_vm5, %v3870_v35, %v3819_v37 }
0x1bd6   : > { %v3822_v31 = vpop.f32.mrb[90].mxu0  ;;  %3872 = vrot.lane.b32.xlu0 %v3871_v19, %s5182_s29  ;;  %s3968_s29 = scalar_lea.sflag [#allocation7], %s5293_s23 }
0x1bd7   : > { %v4818_v20 = vpop.f32.mrb[91].mxu0 }
0x1c48   : > { %v3873_v25 = vpop.permute.xlu0 %3872 }
0x1c49   : > { %v3875_v55 = vsel %vm533_vm2, %v6093_v32, %v3873_v25 }
0x1c4a   : > { %v3876_v6 = vpack.c.bf16 %v3875_v55, %v3875_v55 }
0x1c4c   : > { %4834 = vmatmul.mubr.msk.bf16.vlgmr.msra.gmra.mrb[92].mxu0 %vm942_vm6, %v3876_v6 }
0x1d1f   : > { %v3914_v36 = vpop.f32.mrb[92].mxu0 }
0x1d20   : > { %v3915_v26 = vadd.f32 %v5958_v46, %v3914_v36  ;;  %v4835_v2 = vpop.f32.mrb[93].mxu0 }
0x1d21   : > { %v3917_v4 = vpop.f32.mrb[94].mxu0 }
0x1d22   : > { %5077 = vtanh.f32 %v3915_v26  ;;  %v4836_v40 = vpop.f32.mrb[95].mxu0 }
0x1d2c   : > { %v5078_v9 = vpop.eup %5077 }
0x1d2d   : > { %v3928_v28 = vrot.slane %v5078_v9, %v5409_v58 }
0x1d2f   : > { %v3929_v5 = vcombine.high %v3928_v28, %v3928_v28  ;;  %v3936_v38 = vrot.slane %v3928_v28, %v5409_v58 }
0x1d31   : > { %v3943_v32 = vrot.slane %v3929_v5, %v5409_v58  ;;  %3946 = vst.msk [vmem:[#allocation3 + $0x7] sm:$0x1] %vm1012_vm7, %v3936_v38 }
0x1d33   : > { %3947 = vst.msk [vmem:[#allocation3 + $0xf] sm:$0x1] %vm1012_vm7, %v3943_v32 }
0x1d37   : > { %3974 = sbr.rel (!%p5277_p4) target bundleno = 7494 (0x1d46), region = 60 }
0x1d38   : > { %v3952_v46 = vld [vmem:[#allocation3] sm:$0xff] }
0x1d39   : > { %v3954_v41 = vpack.c.bf16 %v3952_v46, %v3952_v46 }
0x1d3a   : > { %v3953_v61 = vld [vmem:[#allocation3 + $0x8] sm:$0xff] }
0x1d3b   : > { %v3955_v43 = vpack.c.bf16 %v3953_v61, %v3953_v61  ;;  %3957 = vst.msk [vmem:[%s5303_s16] sm:$0xf] %vm3956_vm9, %v3954_v41 }
0x1d3d   : > { %3958 = vst.msk [vmem:[%s5303_s16 + $0x4] sm:$0xf] %vm3956_vm9, %v3955_v43 }
0x1d42   : > { %v3995_v58 = vld [vmem:[%s5303_s16] sm:$0xf] }
0x1d43   : > { %3996 = vst [vmem:[%s3979_s24] sm:$0xf] %v3995_v58 }
0x1d44   : > { %v3997_v33 = vld [vmem:[%s5303_s16 + $0x4] sm:$0xf] }
0x1d45   : > { %3998 = vst [vmem:[%s3979_s24 + $0x8] sm:$0xf] %v3997_v33 }
0x1d46 PF: > { %s4306_s27 = sshll.u32 %s5168_s12, 7  ;;  %s4034_s15 = sshll.u32 %s5305_s18, 4  ;;  %s6183_s15 = int_to_ptr.vmem [resolvable:$true] %s4034_s15 }
0x1d47   : > { %s6181_s26 = scalar_lea.hbm %s6239_s9, %s4306_s27  ;;  %s5098_s16 = scalar_lea.vmem %s6183_s15, 256 }
0x1d48   : > { %p5099_p13 = scmp.ne.s32.totalorder %s6183_s15, %s5098_s16  ;;  %s5183_s28 = smov [#allocation6]  }
0x1d49   : > { %s5102_s13 = sshll.u32 %s5183_s28, 4  ;;  %s5103_s13 = int_to_ptr.vmem [resolvable:$false] %s5102_s13 }
0x1d4a   : > { %p5100_p0 = pnand %p5099_p13, %p5277_p4  ;;  %s5104_s12 = scalar_lea.vmem %s5103_s13, 512 }
0x1d4b   : > { %p5105_p2 = scmp.lt.s32.totalorder %s6183_s15, %s5103_s13  ;;  %p5106_p3 = scmp.lt.s32.totalorder %s5104_s12, %s5098_s16 }
0x1d4c   : > { %p5101_p1 = pneg %p5100_p0 }
0x1d4d   : > { %p5107_p5 = por %p5106_p3, %p5105_p2 }
0x1d4f   : > { %p5108_p6 = pnand %p5107_p5, %p5101_p1 }
0x1d51   : > { %5111 = shalt.err (!%p5108_p6)
}
0x1d52   : > { %s5112_s18 = scalar_lea.hbm %s6181_s26, 256  ;;  %s5116_s27 = scalar_lea.hbm %s6239_s9, 512 }
0x1d53   : > { %p5113_p7 = scmp.ne.s32.totalorder %s6181_s26, %s5112_s18  ;;  %p5117_p11 = scmp.lt.u32.totalorder %s6181_s26, %s6239_s9 }
0x1d54   : > { %p5118_p12 = scmp.lt.u32.totalorder %s5116_s27, %s5112_s18  ;;  %p5120_p0 = scmp.lt.u32.totalorder %s5112_s18, %s6181_s26 }
0x1d55   : > { %p5114_p9 = pnand %p5113_p7, %p5277_p4 }
0x1d56   : > { %p5119_p13 = por %p5118_p12, %p5117_p11 }
0x1d57   : > { %p5115_p10 = pneg %p5114_p9 }
0x1d58   : > { %p5121_p1 = por %p5120_p0, %p5119_p13 }
0x1d5a   : > { %p5122_p2 = pnand %p5121_p1, %p5115_p10 }
0x1d5c   : > { %5125 = shalt.err (!%p5122_p2)
}
0x1d5d   : > { %s5184_s16 = smov 128   ;;  %s5185_s28 = smov 256  }
0x1d5e   : > { %s5186_s13 = smov 8  }
0x1d5f   : > { %4838 = dma.vmem_to_hbm [thread:$0]  (%p5277_p4), %s6183_s15, 256, %s6181_s26, %s3968_s29, %s5184_s16, %s5185_s28, %s5186_s13  }
0x1d60 PF: > { %p4844_p3 = scmp.ge.s32.totalorder %s5176_s14, 2  ;;  %s4056_s12 = sand.u32 1, %s5156_s30  }
0x1d61   : > { %s4057_s18 = scalar_lea.sflag [#allocation7], %s4056_s12 }
0x1d62   : > { %p4841_p5 = pnand %p4844_p3, %p5284_p8 }
0x1d64   : > { %5151 = dma.done.wait (!%p4841_p5), %s4057_s18, 256  }
0x1d65   : > { %5153 = vsyncadd (!%p4841_p5), %s4057_s18, 4294967040  ;;  %s23_s14 = sadd.s32 1, %s5176_s14   ;;  %s6246_s12 = sld [smem:[#allocation9_spill]] }
0x1d66   : > { %p20_p6 = scmp.ge.s32.totalorder %s23_s14, 4   ;;  %s6247_s13 = sld [smem:[#allocation10_spill]] }
0x1d67   : > { %s6248_s30 = smov %s5160_s10  ;;  %s6249_s10 = smov %s5164_s11 }
0x1d68   : > { %s6250_s11 = smov %s5290_s22  ;;  %22 = sbr.rel (!%p20_p6) target bundleno = 4 (0x4), region = 160 }
0x1d6f   :  { %4062 = vsyncpa [#allocation7], 1 }
0x1d70   :  { %4064 = vsyncpa [#allocation7 + $0x1], 1 }

</bundles_post_ra>
